<compile_context>
chip_gen: v6e
topology: v6e:2x2x1
jax: 0.10.0
libtpu: 0.0.40
codegen_flags: <defaults>
</compile_context>

<pallas_src>
import functools

import jax
import jax.numpy as jnp
from jax import lax
from jax.experimental import pallas as pl
from jax.experimental.pallas import tpu as pltpu  # noqa: F401  (no TPU-specific params needed at this size)

# ----------------------------- model config ---------------------------------
VOCAB = 64
MAX_POS = 32
TYPE_VOCAB = 2
HIDDEN = 32          # cfg.MODEL.BERT_OUT_SIZE
N_LAYERS = 2
N_HEADS = 2
HEAD_DIM = HIDDEN // N_HEADS
FFN = 64
MID_DIM = 32         # cfg.MODEL.MID_LINEAR_DIM
NUM_LABEL = 4        # cfg.CLS.NUM_LABEL
NUM_TAG = 8          # cfg.NER.NUM_TAG
LN_EPS = 1e-12

# mid_w/tag_w share the 32-row packed weight buffer -> packing requires this.
assert MID_DIM == HIDDEN

# lane layout of the single packed (rows, 128) output
OUT_LANES = 128
LLH_COL = NUM_LABEL          # llh lives right after the logits
BEST_COL = 8                 # decoded tags (as f32) start here


# ----------------------------- packed-weight layout --------------------------
def _wh_entries():
    """Matrices with HIDDEN rows, concatenated along the lane axis."""
    e = []
    for l in range(N_LAYERS):
        e += [(f"wqkv{l}", 3 * HIDDEN), (f"wo{l}", HIDDEN), (f"w1{l}", FFN)]
    e += [("pool_w", HIDDEN), ("emo_w", NUM_LABEL), ("mid_w", MID_DIM), ("tag_w", NUM_TAG)]
    return e


def _wv_entries(T):
    """Matrices with HIDDEN columns, concatenated along the sublane axis.
    word_emb and type_emb MUST stay first and adjacent (combined one-hot matmul)."""
    e = [("word_emb", VOCAB), ("type_emb", TYPE_VOCAB), ("pos_emb", T)]
    for l in range(N_LAYERS):
        e.append((f"w2{l}", FFN))
    return e


def _vb_entries():
    """All 1-D bias / LayerNorm vectors, concatenated into one (1, N) row."""
    e = [("emb_ln_g", HIDDEN), ("emb_ln_b", HIDDEN)]
    for l in range(N_LAYERS):
        e += [(f"bqkv{l}", 3 * HIDDEN), (f"bo{l}", HIDDEN),
              (f"ln1_g{l}", HIDDEN), (f"ln1_b{l}", HIDDEN),
              (f"b1{l}", FFN), (f"b2{l}", HIDDEN),
              (f"ln2_g{l}", HIDDEN), (f"ln2_b{l}", HIDDEN)]
    e += [("pool_b", HIDDEN), ("emo_b", NUM_LABEL), ("mid_b", MID_DIM), ("tag_b", NUM_TAG)]
    return e


def _offsets(entries):
    offs, off = {}, 0
    for name, size in entries:
        offs[name] = (off, size)
        off += size
    return offs, off


# ----------------------------- fused kernel ----------------------------------
def _layer_norm(h, g, b):
    mu = jnp.mean(h, axis=-1, keepdims=True)
    var = jnp.mean((h - mu) ** 2, axis=-1, keepdims=True)
    return (h - mu) * lax.rsqrt(var + LN_EPS) * g + b


def _gelu(y):
    # tanh approximation of GELU.
    return 0.5 * y * (1.0 + jnp.tanh(0.7978845608028654 * (y + 0.044715 * y * y * y)))


def _fused_bert_crf_kernel(ids_ref, types_ref, maskf_ref, tags_ref,
                           wh_ref, wv_ref, vb_ref, crf_ref, out_ref, *, B, T):
    H, NT = HIDDEN, NUM_TAG
    BT = B * T
    f32 = jnp.float32

    wh_offs, _ = _offsets(_wh_entries())
    wv_offs, _ = _offsets(_wv_entries(T))
    vb_offs, _ = _offsets(_vb_entries())

    def WH(name):
        o, w = wh_offs[name]
        return wh_ref[:, o:o + w]

    def WV(name):
        o, r = wv_offs[name]
        return wv_ref[o:o + r, :]

    def VB(name):
        o, w = vb_offs[name]
        return vb_ref[:, o:o + w]          # (1, w), broadcasts over rows

    ids = ids_ref[...]                     # (B, T) int32
    typ = types_ref[...]                   # (B, T) int32
    maskf = maskf_ref[...]                 # (B, T) f32 in {0, 1}
    tags = tags_ref[...]                   # (B, T) int32

    # ---- embeddings: combined word+type one-hot matmul gather + positional ----
    word_oh = (lax.broadcasted_iota(jnp.int32, (B, T, VOCAB), 2) == ids[:, :, None]).astype(f32)
    type_oh = (lax.broadcasted_iota(jnp.int32, (B, T, TYPE_VOCAB), 2) == typ[:, :, None]).astype(f32)
    oh = jnp.concatenate([word_oh, type_oh], axis=2).reshape(BT, VOCAB + TYPE_VOCAB)
    emb_tbl = wv_ref[0:VOCAB + TYPE_VOCAB, :]          # [word_emb ; type_emb] rows (adjacent)
    x = jnp.dot(oh, emb_tbl, preferred_element_type=f32)          # (BT, H)
    x = x + jnp.concatenate([WV("pos_emb")] * B, axis=0)
    x = _layer_norm(x, VB("emb_ln_g"), VB("emb_ln_b"))

    # ---- transformer layers: fused QKV matmul, attention batched over B ------
    bias3 = ((1.0 - maskf) * -1e9)[:, None, :]         # (B, 1, T) additive key mask
    scale = 1.0 / (HEAD_DIM ** 0.5)
    for l in range(N_LAYERS):
        qkv = jnp.dot(x, WH(f"wqkv{l}"), preferred_element_type=f32) + VB(f"bqkv{l}")  # (BT, 3H)
        head_ctx = []
        for h in range(N_HEADS):                       # heads unrolled, batched over B
            q = qkv[:, h * HEAD_DIM:(h + 1) * HEAD_DIM].reshape(B, T, HEAD_DIM)
            k = qkv[:, H + h * HEAD_DIM:H + (h + 1) * HEAD_DIM].reshape(B, T, HEAD_DIM)
            v = qkv[:, 2 * H + h * HEAD_DIM:2 * H + (h + 1) * HEAD_DIM].reshape(B, T, HEAD_DIM)
            s = jnp.einsum('bqd,bkd->bqk', q, k, preferred_element_type=f32) * scale + bias3
            mx = jnp.max(s, axis=-1, keepdims=True)
            p = jnp.exp(s - mx)
            p = p * pl.reciprocal(jnp.sum(p, axis=-1, keepdims=True), approx=True)
            ctx = jnp.einsum('bqk,bkd->bqd', p, v, preferred_element_type=f32)
            head_ctx.append(ctx.reshape(BT, HEAD_DIM))
        ctx = jnp.concatenate(head_ctx, axis=1)        # (BT, H) head merge
        attn = jnp.dot(ctx, WH(f"wo{l}"), preferred_element_type=f32) + VB(f"bo{l}")
        x = _layer_norm(attn + x, VB(f"ln1_g{l}"), VB(f"ln1_b{l}"))
        ff = _gelu(jnp.dot(x, WH(f"w1{l}"), preferred_element_type=f32) + VB(f"b1{l}"))
        ff = jnp.dot(ff, WV(f"w2{l}"), preferred_element_type=f32) + VB(f"b2{l}")
        x = _layer_norm(ff + x, VB(f"ln2_g{l}"), VB(f"ln2_b{l}"))

    # ---- pooler + emotion classifier (Dropout = identity) --------------------
    cls = x.reshape(B, T, H)[:, 0, :]                  # (B, H)
    pooled = jnp.tanh(jnp.dot(cls, WH("pool_w"), preferred_element_type=f32) + VB("pool_b"))
    logits = jnp.dot(pooled, WH("emo_w"), preferred_element_type=f32) + VB("emo_b")   # (B, 4)

    # ---- mid_linear (+ReLU) + tag classifier: emissions stay in registers ----
    mid = jnp.maximum(jnp.dot(x, WH("mid_w"), preferred_element_type=f32) + VB("mid_b"), 0.0)
    em = jnp.dot(mid, WH("tag_w"), preferred_element_type=f32) + VB("tag_b")           # (BT, NT)
    em3 = em.reshape(B, T, NT)

    # ---- CRF: log-likelihood + Viterbi decode (statically unrolled over T) ---
    start = crf_ref[0:1, :]                            # (1, NT)
    end = crf_ref[1:2, :]                              # (1, NT)
    transT = crf_ref[2:2 + NT, :]                      # transT[j, i] = trans[i, j]

    iota_nt = lax.broadcasted_iota(jnp.int32, (B, NT), 1)
    iota_bt = lax.broadcasted_iota(jnp.int32, (B, T), 1)
    iota_prev = lax.broadcasted_iota(jnp.int32, (B, NT, NT), 2)   # prev-tag index (lane axis)

    # step 0 (torchcrf assumes mask[:, 0] == 1)
    tg0 = tags[:, 0:1]
    oh0 = (iota_nt == tg0).astype(f32)
    init = start + em3[:, 0, :]                        # (B, NT)
    num = jnp.sum(init * oh0, axis=-1, keepdims=True)  # gold-path score (B, 1)
    alpha = init                                       # forward (logsumexp) scores
    vit = init                                         # Viterbi (max) scores
    prev_oh = oh0
    last_tag = tg0
    hist = []                                          # register-resident backpointers

    for t in range(1, T):
        em_t = em3[:, t, :]                            # (B, NT)
        m_t = maskf[:, t:t + 1]                        # (B, 1)
        tg_t = tags[:, t:t + 1]
        cur_oh = (iota_nt == tg_t).astype(f32)
        # gold-path transition: one-hot matmul gather on the otherwise-idle MXU
        row = jnp.dot(cur_oh, transT, preferred_element_type=f32)   # row[b, i] = trans[i, cur_b]
        trans_val = jnp.sum(row * prev_oh, axis=-1, keepdims=True)  # trans[prev_b, cur_b]
        em_val = jnp.sum(em_t * cur_oh, axis=-1, keepdims=True)
        num = num + (trans_val + em_val) * m_t
        # forward logsumexp: reduce over the previous tag on the LANE axis
        sc = alpha[:, None, :] + transT[None, :, :] + em_t[:, :, None]   # (B, cur j, prev i)
        mx = jnp.max(sc, axis=-1, keepdims=True)
        nxt = jnp.log(jnp.sum(jnp.exp(sc - mx), axis=-1)) + mx[:, :, 0]
        alpha = jnp.where(m_t > 0, nxt, alpha)
        # Viterbi: max + backpointer over the previous tag on the LANE axis
        vsc = vit[:, None, :] + transT[None, :, :] + em_t[:, :, None]
        vmax = jnp.max(vsc, axis=-1)                   # (B, NT)
        bp = jnp.min(jnp.where(vsc >= vmax[:, :, None], iota_prev, NT),
                     axis=-1).astype(jnp.int32)        # smallest index on ties
        hist.append(bp)
        vit = jnp.where(m_t > 0, vmax, vit)
        prev_oh = cur_oh
        last_tag = jnp.where(m_t > 0, tg_t, last_tag)

    # log-likelihood (per batch element)
    alpha_end = alpha + end
    mx = jnp.max(alpha_end, axis=-1, keepdims=True)
    denom = jnp.log(jnp.sum(jnp.exp(alpha_end - mx), axis=-1, keepdims=True)) + mx
    num = num + jnp.sum(end * (iota_nt == last_tag).astype(f32), axis=-1, keepdims=True)
    llh = num - denom                                  # (B, 1)

    # Viterbi backtrack, register-resident; positions past each seq length stay 0
    vit_end = vit + end
    rmax = jnp.max(vit_end, axis=-1, keepdims=True)
    last_best = jnp.min(jnp.where(vit_end >= rmax, iota_nt, NT),
                        axis=-1, keepdims=True).astype(jnp.int32)       # (B, 1)
    seq_end = jnp.sum(maskf, axis=1, keepdims=True).astype(jnp.int32) - 1
    cur = jnp.zeros((B, 1), jnp.int32)
    best = jnp.zeros((B, T), jnp.int32)
    for t in range(T - 1, -1, -1):
        cur = jnp.where(seq_end == t, last_best, cur)  # start at each sequence end
        active = seq_end >= t
        best = jnp.where(jnp.logical_and(active, iota_bt == t), cur, best)
        if t >= 1:
            stepped = jnp.sum(jnp.where(iota_nt == cur, hist[t - 1], 0),
                              axis=-1, keepdims=True)  # hist[t][b, cur_b]
            cur = jnp.where(active, stepped, cur)

    # ---- single lane-dense output: [logits | llh | pad | best | pad] ---------
    rows = out_ref.shape[0]
    packed = jnp.concatenate(
        [logits,
         llh,
         jnp.zeros((B, BEST_COL - NUM_LABEL - 1), f32),
         best.astype(f32),
         jnp.zeros((B, OUT_LANES - BEST_COL - T), f32)], axis=1)        # (B, 128)
    if rows > B:
        packed = jnp.concatenate([packed, jnp.zeros((rows - B, OUT_LANES), f32)], axis=0)
    out_ref[...] = packed


# ----------------------------- wrapper ----------------------------------------
def bert_crf_forward(packed, input_ids, token_type_ids, masks, tag_labels, train=True):
    """Returns (logits[B,NUM_LABEL], tokens_out[B,T] int32, tokens_loss scalar).
    tokens_out positions past each valid sequence length are 0 (torchcrf returns
    variable-length Python lists)."""
    B, T = input_ids.shape
    out_rows = ((B + 7) // 8) * 8            # full sublane tile for an unmasked store
    out = pl.pallas_call(
        functools.partial(_fused_bert_crf_kernel, B=B, T=T),
        out_shape=jax.ShapeDtypeStruct((out_rows, OUT_LANES), jnp.float32),
    )(input_ids.astype(jnp.int32), token_type_ids.astype(jnp.int32),
      masks.astype(jnp.float32), tag_labels.astype(jnp.int32),
      packed["wh"], packed["wv"], packed["vb"], packed["crf"])
    logits = out[:B, :NUM_LABEL]
    llh = out[:B, LLH_COL:LLH_COL + 1]
    tokens_out = out[:B, BEST_COL:BEST_COL + T].astype(jnp.int32)
    tokens_loss = -1.0 * jnp.mean(llh) if train else None   # CRF reduction='mean', negated
    return logits, tokens_out, tokens_loss


# ----------------------------- parameter init / packing -----------------------
def init_params(key):
    ks = iter(jax.random.split(key, 32))

    def dense(fan_in, fan_out):
        w = jax.random.normal(next(ks), (fan_in, fan_out), jnp.float32) * 0.02
        return w, jnp.zeros((fan_out,), jnp.float32)

    p = {}
    p["word_emb"] = jax.random.normal(next(ks), (VOCAB, HIDDEN), jnp.float32) * 0.02
    p["pos_emb"] = jax.random.normal(next(ks), (MAX_POS, HIDDEN), jnp.float32) * 0.02
    p["type_emb"] = jax.random.normal(next(ks), (TYPE_VOCAB, HIDDEN), jnp.float32) * 0.02
    p["emb_ln_g"] = jnp.ones((HIDDEN,), jnp.float32)
    p["emb_ln_b"] = jnp.zeros((HIDDEN,), jnp.float32)
    layers = []
    for _ in range(N_LAYERS):
        l = {}
        # Wq/Wk/Wv stored pre-concatenated -> single (H, 3H) QKV matmul per layer.
        l["wqkv"], l["bqkv"] = dense(HIDDEN, 3 * HIDDEN)
        l["wo"], l["bo"] = dense(HIDDEN, HIDDEN)
        l["ln1_g"] = jnp.ones((HIDDEN,), jnp.float32)
        l["ln1_b"] = jnp.zeros((HIDDEN,), jnp.float32)
        l["w1"], l["b1"] = dense(HIDDEN, FFN)
        l["w2"], l["b2"] = dense(FFN, HIDDEN)
        l["ln2_g"] = jnp.ones((HIDDEN,), jnp.float32)
        l["ln2_b"] = jnp.zeros((HIDDEN,), jnp.float32)
        layers.append(l)
    p["layers"] = layers
    p["pool_w"], p["pool_b"] = dense(HIDDEN, HIDDEN)
    p["emo_w"], p["emo_b"] = dense(HIDDEN, NUM_LABEL)
    p["mid_w"], p["mid_b"] = dense(HIDDEN, MID_DIM)
    p["tag_w"], p["tag_b"] = dense(MID_DIM, NUM_TAG)
    p["crf_start"] = jax.random.uniform(next(ks), (NUM_TAG,), jnp.float32, -0.1, 0.1)
    p["crf_end"] = jax.random.uniform(next(ks), (NUM_TAG,), jnp.float32, -0.1, 0.1)
    p["crf_trans"] = jax.random.uniform(next(ks), (NUM_TAG, NUM_TAG), jnp.float32, -0.1, 0.1)
    return p


def _param_map(params, T):
    assert T <= MAX_POS
    m = {"word_emb": params["word_emb"], "type_emb": params["type_emb"],
         "pos_emb": params["pos_emb"][:T],
         "emb_ln_g": params["emb_ln_g"], "emb_ln_b": params["emb_ln_b"],
         "pool_w": params["pool_w"], "pool_b": params["pool_b"],
         "emo_w": params["emo_w"], "emo_b": params["emo_b"],
         "mid_w": params["mid_w"], "mid_b": params["mid_b"],
         "tag_w": params["tag_w"], "tag_b": params["tag_b"]}
    for l, layer in enumerate(params["layers"]):
        for k, v in layer.items():
            m[f"{k}{l}"] = v
    return m


def pack_params(params, T):
    """Pack all weights into 4 VMEM-friendly buffers (call ONCE, outside jit)."""
    m = _param_map(params, T)
    wh = jnp.concatenate([m[n] for n, _ in _wh_entries()], axis=1)      # (HIDDEN, ·)
    wv = jnp.concatenate([m[n] for n, _ in _wv_entries(T)], axis=0)     # (·, HIDDEN)
    vb = jnp.concatenate([m[n].reshape(1, -1) for n, _ in _vb_entries()], axis=1)
    crf = jnp.concatenate([params["crf_start"].reshape(1, NUM_TAG),
                           params["crf_end"].reshape(1, NUM_TAG),
                           params["crf_trans"].T], axis=0)              # [start; end; trans^T]
    return {"wh": wh.astype(jnp.float32), "wv": wv.astype(jnp.float32),
            "vb": vb.astype(jnp.float32), "crf": crf.astype(jnp.float32)}


# ----------------------------- main -------------------------------------------
if __name__ == "__main__":
    root = jax.random.PRNGKey(0)
    k_param, k_ids, k_tags = jax.random.split(root, 3)

    B, T = 2, 8
    params = init_params(k_param)
    packed = pack_params(params, T)   # one-time packing, outside the jitted forward

    input_ids = jax.random.randint(k_ids, (B, T), 0, VOCAB, dtype=jnp.int32)
    token_type_ids = jnp.zeros((B, T), jnp.int32)
    # torchcrf requires mask[:, 0] == 1; second sequence has length 5.
    masks = jnp.array([[1, 1, 1, 1, 1, 1, 1, 1],
                       [1, 1, 1, 1, 1, 0, 0, 0]], dtype=jnp.int32)
    tag_labels = jax.random.randint(k_tags, (B, T), 0, NUM_TAG, dtype=jnp.int32)

    fwd = jax.jit(bert_crf_forward, static_argnames=("train",))
    logits, tokens_out, tokens_loss = fwd(
        packed, input_ids, token_type_ids, masks, tag_labels, train=True)
    jax.block_until_ready((logits, tokens_out, tokens_loss))

    assert logits.shape == (B, NUM_LABEL)
    assert tokens_out.shape == (B, T)
    assert tokens_loss.shape == ()
    print("KERNEL_OK")
</pallas_src>

<mosaic_0001>
module attributes {stable_mosaic.version = 11 : i64} {
  func.func @_fused_bert_crf_kernel(%arg0: memref<2x8xi32, #tpu.memory_space<vmem>>, %arg1: memref<2x8xi32, #tpu.memory_space<vmem>>, %arg2: memref<2x8xf32, #tpu.memory_space<vmem>>, %arg3: memref<2x8xi32, #tpu.memory_space<vmem>>, %arg4: memref<32x460xf32, #tpu.memory_space<vmem>>, %arg5: memref<202x32xf32, #tpu.memory_space<vmem>>, %arg6: memref<1x844xf32, #tpu.memory_space<vmem>>, %arg7: memref<10x8xf32, #tpu.memory_space<vmem>>, %arg8: memref<8x128xf32, #tpu.memory_space<vmem>>) attributes {dimension_semantics = [], scalar_prefetch = 0 : i64, scratch_operands = 0 : i64, tpu.core_type = #tpu.core_type<tc>} {
    %c0 = arith.constant 0 : index
    %c0_0 = arith.constant 0 : index
    %0 = vector.load %arg0[%c0, %c0_0] : memref<2x8xi32, #tpu.memory_space<vmem>>, vector<2x8xi32>
    %c0_1 = arith.constant 0 : index
    %c0_2 = arith.constant 0 : index
    %1 = vector.load %arg1[%c0_1, %c0_2] : memref<2x8xi32, #tpu.memory_space<vmem>>, vector<2x8xi32>
    %c0_3 = arith.constant 0 : index
    %c0_4 = arith.constant 0 : index
    %2 = vector.load %arg2[%c0_3, %c0_4] : memref<2x8xf32, #tpu.memory_space<vmem>>, vector<2x8xf32>
    %c0_5 = arith.constant 0 : index
    %c0_6 = arith.constant 0 : index
    %3 = vector.load %arg3[%c0_5, %c0_6] : memref<2x8xi32, #tpu.memory_space<vmem>>, vector<2x8xi32>
    %4 = tpu.iota {dimensions = array<i32: 2>} : vector<2x8x64xi32>
    %5 = vector.shape_cast %0 : vector<2x8xi32> to vector<2x8x1xi32>
    %6 = vector.broadcast %5 : vector<2x8x1xi32> to vector<2x8x64xi32>
    %7 = arith.cmpi eq, %4, %6 : vector<2x8x64xi32>
    %8 = arith.extui %7 : vector<2x8x64xi1> to vector<2x8x64xi32>
    %9 = arith.sitofp %8 : vector<2x8x64xi32> to vector<2x8x64xf32>
    %10 = tpu.iota {dimensions = array<i32: 2>} : vector<2x8x2xi32>
    %11 = vector.shape_cast %1 : vector<2x8xi32> to vector<2x8x1xi32>
    %12 = vector.broadcast %11 : vector<2x8x1xi32> to vector<2x8x2xi32>
    %13 = arith.cmpi eq, %10, %12 : vector<2x8x2xi32>
    %14 = arith.extui %13 : vector<2x8x2xi1> to vector<2x8x2xi32>
    %15 = arith.sitofp %14 : vector<2x8x2xi32> to vector<2x8x2xf32>
    %16 = tpu.concatenate %9, %15 in 2 : vector<2x8x64xf32>, vector<2x8x2xf32> -> vector<2x8x66xf32>
    %17 = vector.shape_cast %16 : vector<2x8x66xf32> to vector<16x66xf32>
    %c0_7 = arith.constant 0 : index
    %c0_8 = arith.constant 0 : index
    %18 = vector.load %arg5[%c0_7, %c0_8] : memref<202x32xf32, #tpu.memory_space<vmem>>, vector<66x32xf32>
    %cst = arith.constant dense<0.000000e+00> : vector<16x32xf32>
    %19 = tpu.matmul %17, %18, %cst {dimension_numbers = #tpu.dot_dimension_numbers<[1], [0], [0], [1], [0, 0, 1, 1], [], []>} : vector<16x66xf32>, vector<66x32xf32>, vector<16x32xf32> -> vector<16x32xf32>
    %c66 = arith.constant 66 : index
    %c0_9 = arith.constant 0 : index
    %20 = vector.load %arg5[%c66, %c0_9] : memref<202x32xf32, #tpu.memory_space<vmem>>, vector<8x32xf32>
    %21 = tpu.concatenate %20, %20 in 0 : vector<8x32xf32>, vector<8x32xf32> -> vector<16x32xf32>
    %22 = arith.addf %19, %21 : vector<16x32xf32>
    %c0_10 = arith.constant 0 : index
    %c0_11 = arith.constant 0 : index
    %23 = vector.load %arg6[%c0_10, %c0_11] : memref<1x844xf32, #tpu.memory_space<vmem>>, vector<1x32xf32>
    %c0_12 = arith.constant 0 : index
    %c32 = arith.constant 32 : index
    %24 = vector.load %arg6[%c0_12, %c32] : memref<1x844xf32, #tpu.memory_space<vmem>>, vector<1x32xf32>
    %cst_13 = arith.constant dense<0.000000e+00> : vector<16xf32>
    %25 = vector.multi_reduction <add>, %22, %cst_13 [1] : vector<16x32xf32> to vector<16xf32>
    %26 = vector.shape_cast %25 : vector<16xf32> to vector<16x1xf32>
    %cst_14 = arith.constant 3.200000e+01 : f32
    %27 = vector.broadcast %cst_14 : f32 to vector<16x1xf32>
    %28 = arith.divf %26, %27 : vector<16x1xf32>
    %29 = vector.broadcast %28 : vector<16x1xf32> to vector<16x32xf32>
    %30 = arith.subf %22, %29 : vector<16x32xf32>
    %31 = arith.mulf %30, %30 : vector<16x32xf32>
    %cst_15 = arith.constant dense<0.000000e+00> : vector<16xf32>
    %32 = vector.multi_reduction <add>, %31, %cst_15 [1] : vector<16x32xf32> to vector<16xf32>
    %33 = vector.shape_cast %32 : vector<16xf32> to vector<16x1xf32>
    %cst_16 = arith.constant 3.200000e+01 : f32
    %34 = vector.broadcast %cst_16 : f32 to vector<16x1xf32>
    %35 = arith.divf %33, %34 : vector<16x1xf32>
    %36 = vector.broadcast %28 : vector<16x1xf32> to vector<16x32xf32>
    %37 = arith.subf %22, %36 : vector<16x32xf32>
    %cst_17 = arith.constant 9.99999996E-13 : f32
    %38 = vector.broadcast %cst_17 : f32 to vector<16x1xf32>
    %39 = arith.addf %35, %38 : vector<16x1xf32>
    %40 = math.rsqrt %39 : vector<16x1xf32>
    %41 = vector.broadcast %40 : vector<16x1xf32> to vector<16x32xf32>
    %42 = arith.mulf %37, %41 : vector<16x32xf32>
    %43 = vector.broadcast %23 : vector<1x32xf32> to vector<16x32xf32>
    %44 = arith.mulf %42, %43 : vector<16x32xf32>
    %45 = vector.broadcast %24 : vector<1x32xf32> to vector<16x32xf32>
    %46 = arith.addf %44, %45 : vector<16x32xf32>
    %cst_18 = arith.constant 1.000000e+00 : f32
    %47 = vector.broadcast %cst_18 : f32 to vector<2x8xf32>
    %48 = arith.subf %47, %2 : vector<2x8xf32>
    %cst_19 = arith.constant -1.000000e+09 : f32
    %49 = vector.broadcast %cst_19 : f32 to vector<2x8xf32>
    %50 = arith.mulf %48, %49 : vector<2x8xf32>
    %51 = vector.shape_cast %50 : vector<2x8xf32> to vector<2x1x8xf32>
    %c0_20 = arith.constant 0 : index
    %c0_21 = arith.constant 0 : index
    %52 = vector.load %arg4[%c0_20, %c0_21] : memref<32x460xf32, #tpu.memory_space<vmem>>, vector<32x96xf32>
    %cst_22 = arith.constant dense<0.000000e+00> : vector<16x96xf32>
    %53 = tpu.matmul %46, %52, %cst_22 {dimension_numbers = #tpu.dot_dimension_numbers<[1], [0], [0], [1], [0, 0, 1, 1], [], []>} : vector<16x32xf32>, vector<32x96xf32>, vector<16x96xf32> -> vector<16x96xf32>
    %c0_23 = arith.constant 0 : index
    %c64 = arith.constant 64 : index
    %54 = vector.load %arg6[%c0_23, %c64] : memref<1x844xf32, #tpu.memory_space<vmem>>, vector<1x96xf32>
    %55 = vector.broadcast %54 : vector<1x96xf32> to vector<16x96xf32>
    %56 = arith.addf %53, %55 : vector<16x96xf32>
    %57 = vector.extract_strided_slice %56 {offsets = [0, 0], sizes = [16, 16], strides = [1, 1]} : vector<16x96xf32> to vector<16x16xf32>
    %58 = vector.shape_cast %57 : vector<16x16xf32> to vector<2x8x16xf32>
    %59 = vector.extract_strided_slice %56 {offsets = [0, 32], sizes = [16, 16], strides = [1, 1]} : vector<16x96xf32> to vector<16x16xf32>
    %60 = vector.shape_cast %59 : vector<16x16xf32> to vector<2x8x16xf32>
    %61 = vector.extract_strided_slice %56 {offsets = [0, 64], sizes = [16, 16], strides = [1, 1]} : vector<16x96xf32> to vector<16x16xf32>
    %62 = vector.shape_cast %61 : vector<16x16xf32> to vector<2x8x16xf32>
    "tpu.trace_start"() <{level = 10 : i32, message = "bqd,bkd->bqk"}> : () -> ()
    %cst_24 = arith.constant dense<0.000000e+00> : vector<2x8x8xf32>
    %63 = tpu.matmul %58, %60, %cst_24 {dimension_numbers = #tpu.dot_dimension_numbers<[2], [2], [1], [1], [0, 0, 0, 1, 1, 1], [0], [0]>} : vector<2x8x16xf32>, vector<2x8x16xf32>, vector<2x8x8xf32> -> vector<2x8x8xf32>
    "tpu.trace_stop"() : () -> ()
    %cst_25 = arith.constant 2.500000e-01 : f32
    %64 = vector.broadcast %cst_25 : f32 to vector<2x8x8xf32>
    %65 = arith.mulf %63, %64 : vector<2x8x8xf32>
    %66 = vector.broadcast %51 : vector<2x1x8xf32> to vector<2x8x8xf32>
    %67 = arith.addf %65, %66 : vector<2x8x8xf32>
    %cst_26 = arith.constant dense<0xFF800000> : vector<2x8xf32>
    %68 = vector.multi_reduction <maximumf>, %67, %cst_26 [2] : vector<2x8x8xf32> to vector<2x8xf32>
    %69 = vector.shape_cast %68 : vector<2x8xf32> to vector<2x8x1xf32>
    %70 = vector.broadcast %69 : vector<2x8x1xf32> to vector<2x8x8xf32>
    %71 = arith.subf %67, %70 : vector<2x8x8xf32>
    %72 = math.exp %71 : vector<2x8x8xf32>
    %cst_27 = arith.constant dense<0.000000e+00> : vector<2x8xf32>
    %73 = vector.multi_reduction <add>, %72, %cst_27 [2] : vector<2x8x8xf32> to vector<2x8xf32>
    %74 = vector.shape_cast %73 : vector<2x8xf32> to vector<2x8x1xf32>
    %75 = tpu.reciprocal %74 {approx = true} : vector<2x8x1xf32> -> vector<2x8x1xf32>
    %76 = vector.broadcast %75 : vector<2x8x1xf32> to vector<2x8x8xf32>
    %77 = arith.mulf %72, %76 : vector<2x8x8xf32>
    "tpu.trace_start"() <{level = 10 : i32, message = "bqk,bkd->bqd"}> : () -> ()
    %cst_28 = arith.constant dense<0.000000e+00> : vector<2x8x16xf32>
    %78 = tpu.matmul %77, %62, %cst_28 {dimension_numbers = #tpu.dot_dimension_numbers<[2], [1], [1], [2], [0, 0, 0, 1, 1, 2], [0], [0]>} : vector<2x8x8xf32>, vector<2x8x16xf32>, vector<2x8x16xf32> -> vector<2x8x16xf32>
    "tpu.trace_stop"() : () -> ()
    %79 = vector.shape_cast %78 : vector<2x8x16xf32> to vector<16x16xf32>
    %80 = vector.extract_strided_slice %56 {offsets = [0, 16], sizes = [16, 16], strides = [1, 1]} : vector<16x96xf32> to vector<16x16xf32>
    %81 = vector.shape_cast %80 : vector<16x16xf32> to vector<2x8x16xf32>
    %82 = vector.extract_strided_slice %56 {offsets = [0, 48], sizes = [16, 16], strides = [1, 1]} : vector<16x96xf32> to vector<16x16xf32>
    %83 = vector.shape_cast %82 : vector<16x16xf32> to vector<2x8x16xf32>
    %84 = vector.extract_strided_slice %56 {offsets = [0, 80], sizes = [16, 16], strides = [1, 1]} : vector<16x96xf32> to vector<16x16xf32>
    %85 = vector.shape_cast %84 : vector<16x16xf32> to vector<2x8x16xf32>
    "tpu.trace_start"() <{level = 10 : i32, message = "bqd,bkd->bqk"}> : () -> ()
    %cst_29 = arith.constant dense<0.000000e+00> : vector<2x8x8xf32>
    %86 = tpu.matmul %81, %83, %cst_29 {dimension_numbers = #tpu.dot_dimension_numbers<[2], [2], [1], [1], [0, 0, 0, 1, 1, 1], [0], [0]>} : vector<2x8x16xf32>, vector<2x8x16xf32>, vector<2x8x8xf32> -> vector<2x8x8xf32>
    "tpu.trace_stop"() : () -> ()
    %cst_30 = arith.constant 2.500000e-01 : f32
    %87 = vector.broadcast %cst_30 : f32 to vector<2x8x8xf32>
    %88 = arith.mulf %86, %87 : vector<2x8x8xf32>
    %89 = vector.broadcast %51 : vector<2x1x8xf32> to vector<2x8x8xf32>
    %90 = arith.addf %88, %89 : vector<2x8x8xf32>
    %cst_31 = arith.constant dense<0xFF800000> : vector<2x8xf32>
    %91 = vector.multi_reduction <maximumf>, %90, %cst_31 [2] : vector<2x8x8xf32> to vector<2x8xf32>
    %92 = vector.shape_cast %91 : vector<2x8xf32> to vector<2x8x1xf32>
    %93 = vector.broadcast %92 : vector<2x8x1xf32> to vector<2x8x8xf32>
    %94 = arith.subf %90, %93 : vector<2x8x8xf32>
    %95 = math.exp %94 : vector<2x8x8xf32>
    %cst_32 = arith.constant dense<0.000000e+00> : vector<2x8xf32>
    %96 = vector.multi_reduction <add>, %95, %cst_32 [2] : vector<2x8x8xf32> to vector<2x8xf32>
    %97 = vector.shape_cast %96 : vector<2x8xf32> to vector<2x8x1xf32>
    %98 = tpu.reciprocal %97 {approx = true} : vector<2x8x1xf32> -> vector<2x8x1xf32>
    %99 = vector.broadcast %98 : vector<2x8x1xf32> to vector<2x8x8xf32>
    %100 = arith.mulf %95, %99 : vector<2x8x8xf32>
    "tpu.trace_start"() <{level = 10 : i32, message = "bqk,bkd->bqd"}> : () -> ()
    %cst_33 = arith.constant dense<0.000000e+00> : vector<2x8x16xf32>
    %101 = tpu.matmul %100, %85, %cst_33 {dimension_numbers = #tpu.dot_dimension_numbers<[2], [1], [1], [2], [0, 0, 0, 1, 1, 2], [0], [0]>} : vector<2x8x8xf32>, vector<2x8x16xf32>, vector<2x8x16xf32> -> vector<2x8x16xf32>
    "tpu.trace_stop"() : () -> ()
    %102 = vector.shape_cast %101 : vector<2x8x16xf32> to vector<16x16xf32>
    %103 = tpu.concatenate %79, %102 in 1 : vector<16x16xf32>, vector<16x16xf32> -> vector<16x32xf32>
    %c0_34 = arith.constant 0 : index
    %c96 = arith.constant 96 : index
    %104 = vector.load %arg4[%c0_34, %c96] : memref<32x460xf32, #tpu.memory_space<vmem>>, vector<32x32xf32>
    %cst_35 = arith.constant dense<0.000000e+00> : vector<16x32xf32>
    %105 = tpu.matmul %103, %104, %cst_35 {dimension_numbers = #tpu.dot_dimension_numbers<[1], [0], [0], [1], [0, 0, 1, 1], [], []>} : vector<16x32xf32>, vector<32x32xf32>, vector<16x32xf32> -> vector<16x32xf32>
    %c0_36 = arith.constant 0 : index
    %c160 = arith.constant 160 : index
    %106 = vector.load %arg6[%c0_36, %c160] : memref<1x844xf32, #tpu.memory_space<vmem>>, vector<1x32xf32>
    %107 = vector.broadcast %106 : vector<1x32xf32> to vector<16x32xf32>
    %108 = arith.addf %105, %107 : vector<16x32xf32>
    %109 = arith.addf %108, %46 : vector<16x32xf32>
    %c0_37 = arith.constant 0 : index
    %c192 = arith.constant 192 : index
    %110 = vector.load %arg6[%c0_37, %c192] : memref<1x844xf32, #tpu.memory_space<vmem>>, vector<1x32xf32>
    %c0_38 = arith.constant 0 : index
    %c224 = arith.constant 224 : index
    %111 = vector.load %arg6[%c0_38, %c224] : memref<1x844xf32, #tpu.memory_space<vmem>>, vector<1x32xf32>
    %cst_39 = arith.constant dense<0.000000e+00> : vector<16xf32>
    %112 = vector.multi_reduction <add>, %109, %cst_39 [1] : vector<16x32xf32> to vector<16xf32>
    %113 = vector.shape_cast %112 : vector<16xf32> to vector<16x1xf32>
    %cst_40 = arith.constant 3.200000e+01 : f32
    %114 = vector.broadcast %cst_40 : f32 to vector<16x1xf32>
    %115 = arith.divf %113, %114 : vector<16x1xf32>
    %116 = vector.broadcast %115 : vector<16x1xf32> to vector<16x32xf32>
    %117 = arith.subf %109, %116 : vector<16x32xf32>
    %118 = arith.mulf %117, %117 : vector<16x32xf32>
    %cst_41 = arith.constant dense<0.000000e+00> : vector<16xf32>
    %119 = vector.multi_reduction <add>, %118, %cst_41 [1] : vector<16x32xf32> to vector<16xf32>
    %120 = vector.shape_cast %119 : vector<16xf32> to vector<16x1xf32>
    %cst_42 = arith.constant 3.200000e+01 : f32
    %121 = vector.broadcast %cst_42 : f32 to vector<16x1xf32>
    %122 = arith.divf %120, %121 : vector<16x1xf32>
    %123 = vector.broadcast %115 : vector<16x1xf32> to vector<16x32xf32>
    %124 = arith.subf %109, %123 : vector<16x32xf32>
    %cst_43 = arith.constant 9.99999996E-13 : f32
    %125 = vector.broadcast %cst_43 : f32 to vector<16x1xf32>
    %126 = arith.addf %122, %125 : vector<16x1xf32>
    %127 = math.rsqrt %126 : vector<16x1xf32>
    %128 = vector.broadcast %127 : vector<16x1xf32> to vector<16x32xf32>
    %129 = arith.mulf %124, %128 : vector<16x32xf32>
    %130 = vector.broadcast %110 : vector<1x32xf32> to vector<16x32xf32>
    %131 = arith.mulf %129, %130 : vector<16x32xf32>
    %132 = vector.broadcast %111 : vector<1x32xf32> to vector<16x32xf32>
    %133 = arith.addf %131, %132 : vector<16x32xf32>
    %c0_44 = arith.constant 0 : index
    %c128 = arith.constant 128 : index
    %134 = vector.load %arg4[%c0_44, %c128] : memref<32x460xf32, #tpu.memory_space<vmem>>, vector<32x64xf32>
    %cst_45 = arith.constant dense<0.000000e+00> : vector<16x64xf32>
    %135 = tpu.matmul %133, %134, %cst_45 {dimension_numbers = #tpu.dot_dimension_numbers<[1], [0], [0], [1], [0, 0, 1, 1], [], []>} : vector<16x32xf32>, vector<32x64xf32>, vector<16x64xf32> -> vector<16x64xf32>
    %c0_46 = arith.constant 0 : index
    %c256 = arith.constant 256 : index
    %136 = vector.load %arg6[%c0_46, %c256] : memref<1x844xf32, #tpu.memory_space<vmem>>, vector<1x64xf32>
    %137 = vector.broadcast %136 : vector<1x64xf32> to vector<16x64xf32>
    %138 = arith.addf %135, %137 : vector<16x64xf32>
    %cst_47 = arith.constant 5.000000e-01 : f32
    %139 = vector.broadcast %cst_47 : f32 to vector<16x64xf32>
    %140 = arith.mulf %139, %138 : vector<16x64xf32>
    %cst_48 = arith.constant 4.471500e-02 : f32
    %141 = vector.broadcast %cst_48 : f32 to vector<16x64xf32>
    %142 = arith.mulf %141, %138 : vector<16x64xf32>
    %143 = arith.mulf %142, %138 : vector<16x64xf32>
    %144 = arith.mulf %143, %138 : vector<16x64xf32>
    %145 = arith.addf %138, %144 : vector<16x64xf32>
    %cst_49 = arith.constant 0.797884583 : f32
    %146 = vector.broadcast %cst_49 : f32 to vector<16x64xf32>
    %147 = arith.mulf %146, %145 : vector<16x64xf32>
    %148 = math.tanh %147 : vector<16x64xf32>
    %cst_50 = arith.constant 1.000000e+00 : f32
    %149 = vector.broadcast %cst_50 : f32 to vector<16x64xf32>
    %150 = arith.addf %149, %148 : vector<16x64xf32>
    %151 = arith.mulf %140, %150 : vector<16x64xf32>
    %c74 = arith.constant 74 : index
    %c0_51 = arith.constant 0 : index
    %152 = vector.load %arg5[%c74, %c0_51] : memref<202x32xf32, #tpu.memory_space<vmem>>, vector<64x32xf32>
    %cst_52 = arith.constant dense<0.000000e+00> : vector<16x32xf32>
    %153 = tpu.matmul %151, %152, %cst_52 {dimension_numbers = #tpu.dot_dimension_numbers<[1], [0], [0], [1], [0, 0, 1, 1], [], []>} : vector<16x64xf32>, vector<64x32xf32>, vector<16x32xf32> -> vector<16x32xf32>
    %c0_53 = arith.constant 0 : index
    %c320 = arith.constant 320 : index
    %154 = vector.load %arg6[%c0_53, %c320] : memref<1x844xf32, #tpu.memory_space<vmem>>, vector<1x32xf32>
    %155 = vector.broadcast %154 : vector<1x32xf32> to vector<16x32xf32>
    %156 = arith.addf %153, %155 : vector<16x32xf32>
    %157 = arith.addf %156, %133 : vector<16x32xf32>
    %c0_54 = arith.constant 0 : index
    %c352 = arith.constant 352 : index
    %158 = vector.load %arg6[%c0_54, %c352] : memref<1x844xf32, #tpu.memory_space<vmem>>, vector<1x32xf32>
    %c0_55 = arith.constant 0 : index
    %c384 = arith.constant 384 : index
    %159 = vector.load %arg6[%c0_55, %c384] : memref<1x844xf32, #tpu.memory_space<vmem>>, vector<1x32xf32>
    %cst_56 = arith.constant dense<0.000000e+00> : vector<16xf32>
    %160 = vector.multi_reduction <add>, %157, %cst_56 [1] : vector<16x32xf32> to vector<16xf32>
    %161 = vector.shape_cast %160 : vector<16xf32> to vector<16x1xf32>
    %cst_57 = arith.constant 3.200000e+01 : f32
    %162 = vector.broadcast %cst_57 : f32 to vector<16x1xf32>
    %163 = arith.divf %161, %162 : vector<16x1xf32>
    %164 = vector.broadcast %163 : vector<16x1xf32> to vector<16x32xf32>
    %165 = arith.subf %157, %164 : vector<16x32xf32>
    %166 = arith.mulf %165, %165 : vector<16x32xf32>
    %cst_58 = arith.constant dense<0.000000e+00> : vector<16xf32>
    %167 = vector.multi_reduction <add>, %166, %cst_58 [1] : vector<16x32xf32> to vector<16xf32>
    %168 = vector.shape_cast %167 : vector<16xf32> to vector<16x1xf32>
    %cst_59 = arith.constant 3.200000e+01 : f32
    %169 = vector.broadcast %cst_59 : f32 to vector<16x1xf32>
    %170 = arith.divf %168, %169 : vector<16x1xf32>
    %171 = vector.broadcast %163 : vector<16x1xf32> to vector<16x32xf32>
    %172 = arith.subf %157, %171 : vector<16x32xf32>
    %cst_60 = arith.constant 9.99999996E-13 : f32
    %173 = vector.broadcast %cst_60 : f32 to vector<16x1xf32>
    %174 = arith.addf %170, %173 : vector<16x1xf32>
    %175 = math.rsqrt %174 : vector<16x1xf32>
    %176 = vector.broadcast %175 : vector<16x1xf32> to vector<16x32xf32>
    %177 = arith.mulf %172, %176 : vector<16x32xf32>
    %178 = vector.broadcast %158 : vector<1x32xf32> to vector<16x32xf32>
    %179 = arith.mulf %177, %178 : vector<16x32xf32>
    %180 = vector.broadcast %159 : vector<1x32xf32> to vector<16x32xf32>
    %181 = arith.addf %179, %180 : vector<16x32xf32>
    %c0_61 = arith.constant 0 : index
    %c192_62 = arith.constant 192 : index
    %182 = vector.load %arg4[%c0_61, %c192_62] : memref<32x460xf32, #tpu.memory_space<vmem>>, vector<32x96xf32>
    %cst_63 = arith.constant dense<0.000000e+00> : vector<16x96xf32>
    %183 = tpu.matmul %181, %182, %cst_63 {dimension_numbers = #tpu.dot_dimension_numbers<[1], [0], [0], [1], [0, 0, 1, 1], [], []>} : vector<16x32xf32>, vector<32x96xf32>, vector<16x96xf32> -> vector<16x96xf32>
    %c0_64 = arith.constant 0 : index
    %c416 = arith.constant 416 : index
    %184 = vector.load %arg6[%c0_64, %c416] : memref<1x844xf32, #tpu.memory_space<vmem>>, vector<1x96xf32>
    %185 = vector.broadcast %184 : vector<1x96xf32> to vector<16x96xf32>
    %186 = arith.addf %183, %185 : vector<16x96xf32>
    %187 = vector.extract_strided_slice %186 {offsets = [0, 0], sizes = [16, 16], strides = [1, 1]} : vector<16x96xf32> to vector<16x16xf32>
    %188 = vector.shape_cast %187 : vector<16x16xf32> to vector<2x8x16xf32>
    %189 = vector.extract_strided_slice %186 {offsets = [0, 32], sizes = [16, 16], strides = [1, 1]} : vector<16x96xf32> to vector<16x16xf32>
    %190 = vector.shape_cast %189 : vector<16x16xf32> to vector<2x8x16xf32>
    %191 = vector.extract_strided_slice %186 {offsets = [0, 64], sizes = [16, 16], strides = [1, 1]} : vector<16x96xf32> to vector<16x16xf32>
    %192 = vector.shape_cast %191 : vector<16x16xf32> to vector<2x8x16xf32>
    "tpu.trace_start"() <{level = 10 : i32, message = "bqd,bkd->bqk"}> : () -> ()
    %cst_65 = arith.constant dense<0.000000e+00> : vector<2x8x8xf32>
    %193 = tpu.matmul %188, %190, %cst_65 {dimension_numbers = #tpu.dot_dimension_numbers<[2], [2], [1], [1], [0, 0, 0, 1, 1, 1], [0], [0]>} : vector<2x8x16xf32>, vector<2x8x16xf32>, vector<2x8x8xf32> -> vector<2x8x8xf32>
    "tpu.trace_stop"() : () -> ()
    %cst_66 = arith.constant 2.500000e-01 : f32
    %194 = vector.broadcast %cst_66 : f32 to vector<2x8x8xf32>
    %195 = arith.mulf %193, %194 : vector<2x8x8xf32>
    %196 = vector.broadcast %51 : vector<2x1x8xf32> to vector<2x8x8xf32>
    %197 = arith.addf %195, %196 : vector<2x8x8xf32>
    %cst_67 = arith.constant dense<0xFF800000> : vector<2x8xf32>
    %198 = vector.multi_reduction <maximumf>, %197, %cst_67 [2] : vector<2x8x8xf32> to vector<2x8xf32>
    %199 = vector.shape_cast %198 : vector<2x8xf32> to vector<2x8x1xf32>
    %200 = vector.broadcast %199 : vector<2x8x1xf32> to vector<2x8x8xf32>
    %201 = arith.subf %197, %200 : vector<2x8x8xf32>
    %202 = math.exp %201 : vector<2x8x8xf32>
    %cst_68 = arith.constant dense<0.000000e+00> : vector<2x8xf32>
    %203 = vector.multi_reduction <add>, %202, %cst_68 [2] : vector<2x8x8xf32> to vector<2x8xf32>
    %204 = vector.shape_cast %203 : vector<2x8xf32> to vector<2x8x1xf32>
    %205 = tpu.reciprocal %204 {approx = true} : vector<2x8x1xf32> -> vector<2x8x1xf32>
    %206 = vector.broadcast %205 : vector<2x8x1xf32> to vector<2x8x8xf32>
    %207 = arith.mulf %202, %206 : vector<2x8x8xf32>
    "tpu.trace_start"() <{level = 10 : i32, message = "bqk,bkd->bqd"}> : () -> ()
    %cst_69 = arith.constant dense<0.000000e+00> : vector<2x8x16xf32>
    %208 = tpu.matmul %207, %192, %cst_69 {dimension_numbers = #tpu.dot_dimension_numbers<[2], [1], [1], [2], [0, 0, 0, 1, 1, 2], [0], [0]>} : vector<2x8x8xf32>, vector<2x8x16xf32>, vector<2x8x16xf32> -> vector<2x8x16xf32>
    "tpu.trace_stop"() : () -> ()
    %209 = vector.shape_cast %208 : vector<2x8x16xf32> to vector<16x16xf32>
    %210 = vector.extract_strided_slice %186 {offsets = [0, 16], sizes = [16, 16], strides = [1, 1]} : vector<16x96xf32> to vector<16x16xf32>
    %211 = vector.shape_cast %210 : vector<16x16xf32> to vector<2x8x16xf32>
    %212 = vector.extract_strided_slice %186 {offsets = [0, 48], sizes = [16, 16], strides = [1, 1]} : vector<16x96xf32> to vector<16x16xf32>
    %213 = vector.shape_cast %212 : vector<16x16xf32> to vector<2x8x16xf32>
    %214 = vector.extract_strided_slice %186 {offsets = [0, 80], sizes = [16, 16], strides = [1, 1]} : vector<16x96xf32> to vector<16x16xf32>
    %215 = vector.shape_cast %214 : vector<16x16xf32> to vector<2x8x16xf32>
    "tpu.trace_start"() <{level = 10 : i32, message = "bqd,bkd->bqk"}> : () -> ()
    %cst_70 = arith.constant dense<0.000000e+00> : vector<2x8x8xf32>
    %216 = tpu.matmul %211, %213, %cst_70 {dimension_numbers = #tpu.dot_dimension_numbers<[2], [2], [1], [1], [0, 0, 0, 1, 1, 1], [0], [0]>} : vector<2x8x16xf32>, vector<2x8x16xf32>, vector<2x8x8xf32> -> vector<2x8x8xf32>
    "tpu.trace_stop"() : () -> ()
    %cst_71 = arith.constant 2.500000e-01 : f32
    %217 = vector.broadcast %cst_71 : f32 to vector<2x8x8xf32>
    %218 = arith.mulf %216, %217 : vector<2x8x8xf32>
    %219 = vector.broadcast %51 : vector<2x1x8xf32> to vector<2x8x8xf32>
    %220 = arith.addf %218, %219 : vector<2x8x8xf32>
    %cst_72 = arith.constant dense<0xFF800000> : vector<2x8xf32>
    %221 = vector.multi_reduction <maximumf>, %220, %cst_72 [2] : vector<2x8x8xf32> to vector<2x8xf32>
    %222 = vector.shape_cast %221 : vector<2x8xf32> to vector<2x8x1xf32>
    %223 = vector.broadcast %222 : vector<2x8x1xf32> to vector<2x8x8xf32>
    %224 = arith.subf %220, %223 : vector<2x8x8xf32>
    %225 = math.exp %224 : vector<2x8x8xf32>
    %cst_73 = arith.constant dense<0.000000e+00> : vector<2x8xf32>
    %226 = vector.multi_reduction <add>, %225, %cst_73 [2] : vector<2x8x8xf32> to vector<2x8xf32>
    %227 = vector.shape_cast %226 : vector<2x8xf32> to vector<2x8x1xf32>
    %228 = tpu.reciprocal %227 {approx = true} : vector<2x8x1xf32> -> vector<2x8x1xf32>
    %229 = vector.broadcast %228 : vector<2x8x1xf32> to vector<2x8x8xf32>
    %230 = arith.mulf %225, %229 : vector<2x8x8xf32>
    "tpu.trace_start"() <{level = 10 : i32, message = "bqk,bkd->bqd"}> : () -> ()
    %cst_74 = arith.constant dense<0.000000e+00> : vector<2x8x16xf32>
    %231 = tpu.matmul %230, %215, %cst_74 {dimension_numbers = #tpu.dot_dimension_numbers<[2], [1], [1], [2], [0, 0, 0, 1, 1, 2], [0], [0]>} : vector<2x8x8xf32>, vector<2x8x16xf32>, vector<2x8x16xf32> -> vector<2x8x16xf32>
    "tpu.trace_stop"() : () -> ()
    %232 = vector.shape_cast %231 : vector<2x8x16xf32> to vector<16x16xf32>
    %233 = tpu.concatenate %209, %232 in 1 : vector<16x16xf32>, vector<16x16xf32> -> vector<16x32xf32>
    %c0_75 = arith.constant 0 : index
    %c288 = arith.constant 288 : index
    %234 = vector.load %arg4[%c0_75, %c288] : memref<32x460xf32, #tpu.memory_space<vmem>>, vector<32x32xf32>
    %cst_76 = arith.constant dense<0.000000e+00> : vector<16x32xf32>
    %235 = tpu.matmul %233, %234, %cst_76 {dimension_numbers = #tpu.dot_dimension_numbers<[1], [0], [0], [1], [0, 0, 1, 1], [], []>} : vector<16x32xf32>, vector<32x32xf32>, vector<16x32xf32> -> vector<16x32xf32>
    %c0_77 = arith.constant 0 : index
    %c512 = arith.constant 512 : index
    %236 = vector.load %arg6[%c0_77, %c512] : memref<1x844xf32, #tpu.memory_space<vmem>>, vector<1x32xf32>
    %237 = vector.broadcast %236 : vector<1x32xf32> to vector<16x32xf32>
    %238 = arith.addf %235, %237 : vector<16x32xf32>
    %239 = arith.addf %238, %181 : vector<16x32xf32>
    %c0_78 = arith.constant 0 : index
    %c544 = arith.constant 544 : index
    %240 = vector.load %arg6[%c0_78, %c544] : memref<1x844xf32, #tpu.memory_space<vmem>>, vector<1x32xf32>
    %c0_79 = arith.constant 0 : index
    %c576 = arith.constant 576 : index
    %241 = vector.load %arg6[%c0_79, %c576] : memref<1x844xf32, #tpu.memory_space<vmem>>, vector<1x32xf32>
    %cst_80 = arith.constant dense<0.000000e+00> : vector<16xf32>
    %242 = vector.multi_reduction <add>, %239, %cst_80 [1] : vector<16x32xf32> to vector<16xf32>
    %243 = vector.shape_cast %242 : vector<16xf32> to vector<16x1xf32>
    %cst_81 = arith.constant 3.200000e+01 : f32
    %244 = vector.broadcast %cst_81 : f32 to vector<16x1xf32>
    %245 = arith.divf %243, %244 : vector<16x1xf32>
    %246 = vector.broadcast %245 : vector<16x1xf32> to vector<16x32xf32>
    %247 = arith.subf %239, %246 : vector<16x32xf32>
    %248 = arith.mulf %247, %247 : vector<16x32xf32>
    %cst_82 = arith.constant dense<0.000000e+00> : vector<16xf32>
    %249 = vector.multi_reduction <add>, %248, %cst_82 [1] : vector<16x32xf32> to vector<16xf32>
    %250 = vector.shape_cast %249 : vector<16xf32> to vector<16x1xf32>
    %cst_83 = arith.constant 3.200000e+01 : f32
    %251 = vector.broadcast %cst_83 : f32 to vector<16x1xf32>
    %252 = arith.divf %250, %251 : vector<16x1xf32>
    %253 = vector.broadcast %245 : vector<16x1xf32> to vector<16x32xf32>
    %254 = arith.subf %239, %253 : vector<16x32xf32>
    %cst_84 = arith.constant 9.99999996E-13 : f32
    %255 = vector.broadcast %cst_84 : f32 to vector<16x1xf32>
    %256 = arith.addf %252, %255 : vector<16x1xf32>
    %257 = math.rsqrt %256 : vector<16x1xf32>
    %258 = vector.broadcast %257 : vector<16x1xf32> to vector<16x32xf32>
    %259 = arith.mulf %254, %258 : vector<16x32xf32>
    %260 = vector.broadcast %240 : vector<1x32xf32> to vector<16x32xf32>
    %261 = arith.mulf %259, %260 : vector<16x32xf32>
    %262 = vector.broadcast %241 : vector<1x32xf32> to vector<16x32xf32>
    %263 = arith.addf %261, %262 : vector<16x32xf32>
    %c0_85 = arith.constant 0 : index
    %c320_86 = arith.constant 320 : index
    %264 = vector.load %arg4[%c0_85, %c320_86] : memref<32x460xf32, #tpu.memory_space<vmem>>, vector<32x64xf32>
    %cst_87 = arith.constant dense<0.000000e+00> : vector<16x64xf32>
    %265 = tpu.matmul %263, %264, %cst_87 {dimension_numbers = #tpu.dot_dimension_numbers<[1], [0], [0], [1], [0, 0, 1, 1], [], []>} : vector<16x32xf32>, vector<32x64xf32>, vector<16x64xf32> -> vector<16x64xf32>
    %c0_88 = arith.constant 0 : index
    %c608 = arith.constant 608 : index
    %266 = vector.load %arg6[%c0_88, %c608] : memref<1x844xf32, #tpu.memory_space<vmem>>, vector<1x64xf32>
    %267 = vector.broadcast %266 : vector<1x64xf32> to vector<16x64xf32>
    %268 = arith.addf %265, %267 : vector<16x64xf32>
    %cst_89 = arith.constant 5.000000e-01 : f32
    %269 = vector.broadcast %cst_89 : f32 to vector<16x64xf32>
    %270 = arith.mulf %269, %268 : vector<16x64xf32>
    %cst_90 = arith.constant 4.471500e-02 : f32
    %271 = vector.broadcast %cst_90 : f32 to vector<16x64xf32>
    %272 = arith.mulf %271, %268 : vector<16x64xf32>
    %273 = arith.mulf %272, %268 : vector<16x64xf32>
    %274 = arith.mulf %273, %268 : vector<16x64xf32>
    %275 = arith.addf %268, %274 : vector<16x64xf32>
    %cst_91 = arith.constant 0.797884583 : f32
    %276 = vector.broadcast %cst_91 : f32 to vector<16x64xf32>
    %277 = arith.mulf %276, %275 : vector<16x64xf32>
    %278 = math.tanh %277 : vector<16x64xf32>
    %cst_92 = arith.constant 1.000000e+00 : f32
    %279 = vector.broadcast %cst_92 : f32 to vector<16x64xf32>
    %280 = arith.addf %279, %278 : vector<16x64xf32>
    %281 = arith.mulf %270, %280 : vector<16x64xf32>
    %c138 = arith.constant 138 : index
    %c0_93 = arith.constant 0 : index
    %282 = vector.load %arg5[%c138, %c0_93] : memref<202x32xf32, #tpu.memory_space<vmem>>, vector<64x32xf32>
    %cst_94 = arith.constant dense<0.000000e+00> : vector<16x32xf32>
    %283 = tpu.matmul %281, %282, %cst_94 {dimension_numbers = #tpu.dot_dimension_numbers<[1], [0], [0], [1], [0, 0, 1, 1], [], []>} : vector<16x64xf32>, vector<64x32xf32>, vector<16x32xf32> -> vector<16x32xf32>
    %c0_95 = arith.constant 0 : index
    %c672 = arith.constant 672 : index
    %284 = vector.load %arg6[%c0_95, %c672] : memref<1x844xf32, #tpu.memory_space<vmem>>, vector<1x32xf32>
    %285 = vector.broadcast %284 : vector<1x32xf32> to vector<16x32xf32>
    %286 = arith.addf %283, %285 : vector<16x32xf32>
    %287 = arith.addf %286, %263 : vector<16x32xf32>
    %c0_96 = arith.constant 0 : index
    %c704 = arith.constant 704 : index
    %288 = vector.load %arg6[%c0_96, %c704] : memref<1x844xf32, #tpu.memory_space<vmem>>, vector<1x32xf32>
    %c0_97 = arith.constant 0 : index
    %c736 = arith.constant 736 : index
    %289 = vector.load %arg6[%c0_97, %c736] : memref<1x844xf32, #tpu.memory_space<vmem>>, vector<1x32xf32>
    %cst_98 = arith.constant dense<0.000000e+00> : vector<16xf32>
    %290 = vector.multi_reduction <add>, %287, %cst_98 [1] : vector<16x32xf32> to vector<16xf32>
    %291 = vector.shape_cast %290 : vector<16xf32> to vector<16x1xf32>
    %cst_99 = arith.constant 3.200000e+01 : f32
    %292 = vector.broadcast %cst_99 : f32 to vector<16x1xf32>
    %293 = arith.divf %291, %292 : vector<16x1xf32>
    %294 = vector.broadcast %293 : vector<16x1xf32> to vector<16x32xf32>
    %295 = arith.subf %287, %294 : vector<16x32xf32>
    %296 = arith.mulf %295, %295 : vector<16x32xf32>
    %cst_100 = arith.constant dense<0.000000e+00> : vector<16xf32>
    %297 = vector.multi_reduction <add>, %296, %cst_100 [1] : vector<16x32xf32> to vector<16xf32>
    %298 = vector.shape_cast %297 : vector<16xf32> to vector<16x1xf32>
    %cst_101 = arith.constant 3.200000e+01 : f32
    %299 = vector.broadcast %cst_101 : f32 to vector<16x1xf32>
    %300 = arith.divf %298, %299 : vector<16x1xf32>
    %301 = vector.broadcast %293 : vector<16x1xf32> to vector<16x32xf32>
    %302 = arith.subf %287, %301 : vector<16x32xf32>
    %cst_102 = arith.constant 9.99999996E-13 : f32
    %303 = vector.broadcast %cst_102 : f32 to vector<16x1xf32>
    %304 = arith.addf %300, %303 : vector<16x1xf32>
    %305 = math.rsqrt %304 : vector<16x1xf32>
    %306 = vector.broadcast %305 : vector<16x1xf32> to vector<16x32xf32>
    %307 = arith.mulf %302, %306 : vector<16x32xf32>
    %308 = vector.broadcast %288 : vector<1x32xf32> to vector<16x32xf32>
    %309 = arith.mulf %307, %308 : vector<16x32xf32>
    %310 = vector.broadcast %289 : vector<1x32xf32> to vector<16x32xf32>
    %311 = arith.addf %309, %310 : vector<16x32xf32>
    %312 = vector.shape_cast %311 : vector<16x32xf32> to vector<2x8x32xf32>
    %313 = vector.extract_strided_slice %312 {offsets = [0, 0, 0], sizes = [2, 1, 32], strides = [1, 1, 1]} : vector<2x8x32xf32> to vector<2x1x32xf32>
    %314 = vector.shape_cast %313 : vector<2x1x32xf32> to vector<2x32xf32>
    %c0_103 = arith.constant 0 : index
    %c384_104 = arith.constant 384 : index
    %315 = vector.load %arg4[%c0_103, %c384_104] : memref<32x460xf32, #tpu.memory_space<vmem>>, vector<32x32xf32>
    %cst_105 = arith.constant dense<0.000000e+00> : vector<2x32xf32>
    %316 = tpu.matmul %314, %315, %cst_105 {dimension_numbers = #tpu.dot_dimension_numbers<[1], [0], [0], [1], [0, 0, 1, 1], [], []>} : vector<2x32xf32>, vector<32x32xf32>, vector<2x32xf32> -> vector<2x32xf32>
    %c0_106 = arith.constant 0 : index
    %c768 = arith.constant 768 : index
    %317 = vector.load %arg6[%c0_106, %c768] : memref<1x844xf32, #tpu.memory_space<vmem>>, vector<1x32xf32>
    %318 = vector.broadcast %317 : vector<1x32xf32> to vector<2x32xf32>
    %319 = arith.addf %316, %318 : vector<2x32xf32>
    %320 = math.tanh %319 : vector<2x32xf32>
    %c0_107 = arith.constant 0 : index
    %c416_108 = arith.constant 416 : index
    %321 = vector.load %arg4[%c0_107, %c416_108] : memref<32x460xf32, #tpu.memory_space<vmem>>, vector<32x4xf32>
    %cst_109 = arith.constant dense<0.000000e+00> : vector<2x4xf32>
    %322 = tpu.matmul %320, %321, %cst_109 {dimension_numbers = #tpu.dot_dimension_numbers<[1], [0], [0], [1], [0, 0, 1, 1], [], []>} : vector<2x32xf32>, vector<32x4xf32>, vector<2x4xf32> -> vector<2x4xf32>
    %c0_110 = arith.constant 0 : index
    %c800 = arith.constant 800 : index
    %323 = vector.load %arg6[%c0_110, %c800] : memref<1x844xf32, #tpu.memory_space<vmem>>, vector<1x4xf32>
    %324 = vector.broadcast %323 : vector<1x4xf32> to vector<2x4xf32>
    %325 = arith.addf %322, %324 : vector<2x4xf32>
    %c0_111 = arith.constant 0 : index
    %c420 = arith.constant 420 : index
    %326 = vector.load %arg4[%c0_111, %c420] : memref<32x460xf32, #tpu.memory_space<vmem>>, vector<32x32xf32>
    %cst_112 = arith.constant dense<0.000000e+00> : vector<16x32xf32>
    %327 = tpu.matmul %311, %326, %cst_112 {dimension_numbers = #tpu.dot_dimension_numbers<[1], [0], [0], [1], [0, 0, 1, 1], [], []>} : vector<16x32xf32>, vector<32x32xf32>, vector<16x32xf32> -> vector<16x32xf32>
    %c0_113 = arith.constant 0 : index
    %c804 = arith.constant 804 : index
    %328 = vector.load %arg6[%c0_113, %c804] : memref<1x844xf32, #tpu.memory_space<vmem>>, vector<1x32xf32>
    %329 = vector.broadcast %328 : vector<1x32xf32> to vector<16x32xf32>
    %330 = arith.addf %327, %329 : vector<16x32xf32>
    %cst_114 = arith.constant 0.000000e+00 : f32
    %331 = vector.broadcast %cst_114 : f32 to vector<16x32xf32>
    %332 = arith.maximumf %330, %331 : vector<16x32xf32>
    %c0_115 = arith.constant 0 : index
    %c452 = arith.constant 452 : index
    %333 = vector.load %arg4[%c0_115, %c452] : memref<32x460xf32, #tpu.memory_space<vmem>>, vector<32x8xf32>
    %cst_116 = arith.constant dense<0.000000e+00> : vector<16x8xf32>
    %334 = tpu.matmul %332, %333, %cst_116 {dimension_numbers = #tpu.dot_dimension_numbers<[1], [0], [0], [1], [0, 0, 1, 1], [], []>} : vector<16x32xf32>, vector<32x8xf32>, vector<16x8xf32> -> vector<16x8xf32>
    %c0_117 = arith.constant 0 : index
    %c836 = arith.constant 836 : index
    %335 = vector.load %arg6[%c0_117, %c836] : memref<1x844xf32, #tpu.memory_space<vmem>>, vector<1x8xf32>
    %336 = vector.broadcast %335 : vector<1x8xf32> to vector<16x8xf32>
    %337 = arith.addf %334, %336 : vector<16x8xf32>
    %338 = vector.shape_cast %337 : vector<16x8xf32> to vector<2x8x8xf32>
    %c0_118 = arith.constant 0 : index
    %c0_119 = arith.constant 0 : index
    %339 = vector.load %arg7[%c0_118, %c0_119] : memref<10x8xf32, #tpu.memory_space<vmem>>, vector<1x8xf32>
    %c1 = arith.constant 1 : index
    %c0_120 = arith.constant 0 : index
    %340 = vector.load %arg7[%c1, %c0_120] : memref<10x8xf32, #tpu.memory_space<vmem>>, vector<1x8xf32>
    %c2 = arith.constant 2 : index
    %c0_121 = arith.constant 0 : index
    %341 = vector.load %arg7[%c2, %c0_121] : memref<10x8xf32, #tpu.memory_space<vmem>>, vector<8x8xf32>
    %342 = tpu.iota {dimensions = array<i32: 1>} : vector<2x8xi32>
    %343 = tpu.iota {dimensions = array<i32: 1>} : vector<2x8xi32>
    %344 = tpu.iota {dimensions = array<i32: 2>} : vector<2x8x8xi32>
    %345 = vector.extract_strided_slice %3 {offsets = [0, 0], sizes = [2, 1], strides = [1, 1]} : vector<2x8xi32> to vector<2x1xi32>
    %346 = vector.broadcast %345 : vector<2x1xi32> to vector<2x8xi32>
    %347 = arith.cmpi eq, %342, %346 : vector<2x8xi32>
    %348 = arith.extui %347 : vector<2x8xi1> to vector<2x8xi32>
    %349 = arith.sitofp %348 : vector<2x8xi32> to vector<2x8xf32>
    %350 = vector.extract_strided_slice %338 {offsets = [0, 0, 0], sizes = [2, 1, 8], strides = [1, 1, 1]} : vector<2x8x8xf32> to vector<2x1x8xf32>
    %351 = vector.shape_cast %350 : vector<2x1x8xf32> to vector<2x8xf32>
    %352 = vector.broadcast %339 : vector<1x8xf32> to vector<2x8xf32>
    %353 = arith.addf %352, %351 : vector<2x8xf32>
    %354 = arith.mulf %353, %349 : vector<2x8xf32>
    %cst_122 = arith.constant dense<0.000000e+00> : vector<2xf32>
    %355 = vector.multi_reduction <add>, %354, %cst_122 [1] : vector<2x8xf32> to vector<2xf32>
    %356 = vector.shape_cast %355 : vector<2xf32> to vector<2x1xf32>
    %357 = vector.extract_strided_slice %338 {offsets = [0, 1, 0], sizes = [2, 1, 8], strides = [1, 1, 1]} : vector<2x8x8xf32> to vector<2x1x8xf32>
    %358 = vector.shape_cast %357 : vector<2x1x8xf32> to vector<2x8xf32>
    %359 = vector.extract_strided_slice %2 {offsets = [0, 1], sizes = [2, 1], strides = [1, 1]} : vector<2x8xf32> to vector<2x1xf32>
    %360 = vector.extract_strided_slice %3 {offsets = [0, 1], sizes = [2, 1], strides = [1, 1]} : vector<2x8xi32> to vector<2x1xi32>
    %361 = vector.broadcast %360 : vector<2x1xi32> to vector<2x8xi32>
    %362 = arith.cmpi eq, %342, %361 : vector<2x8xi32>
    %363 = arith.extui %362 : vector<2x8xi1> to vector<2x8xi32>
    %364 = arith.sitofp %363 : vector<2x8xi32> to vector<2x8xf32>
    %cst_123 = arith.constant dense<0.000000e+00> : vector<2x8xf32>
    %365 = tpu.matmul %364, %341, %cst_123 {dimension_numbers = #tpu.dot_dimension_numbers<[1], [0], [0], [1], [0, 0, 1, 1], [], []>} : vector<2x8xf32>, vector<8x8xf32>, vector<2x8xf32> -> vector<2x8xf32>
    %366 = arith.mulf %365, %349 : vector<2x8xf32>
    %cst_124 = arith.constant dense<0.000000e+00> : vector<2xf32>
    %367 = vector.multi_reduction <add>, %366, %cst_124 [1] : vector<2x8xf32> to vector<2xf32>
    %368 = vector.shape_cast %367 : vector<2xf32> to vector<2x1xf32>
    %369 = arith.mulf %358, %364 : vector<2x8xf32>
    %cst_125 = arith.constant dense<0.000000e+00> : vector<2xf32>
    %370 = vector.multi_reduction <add>, %369, %cst_125 [1] : vector<2x8xf32> to vector<2xf32>
    %371 = vector.shape_cast %370 : vector<2xf32> to vector<2x1xf32>
    %372 = arith.addf %368, %371 : vector<2x1xf32>
    %373 = arith.mulf %372, %359 : vector<2x1xf32>
    %374 = arith.addf %356, %373 : vector<2x1xf32>
    %375 = vector.shape_cast %353 : vector<2x8xf32> to vector<2x1x8xf32>
    %376 = vector.shape_cast %341 : vector<8x8xf32> to vector<1x8x8xf32>
    %377 = vector.broadcast %375 : vector<2x1x8xf32> to vector<2x8x8xf32>
    %378 = vector.broadcast %376 : vector<1x8x8xf32> to vector<2x8x8xf32>
    %379 = arith.addf %377, %378 : vector<2x8x8xf32>
    %380 = vector.shape_cast %358 : vector<2x8xf32> to vector<2x8x1xf32>
    %381 = vector.broadcast %380 : vector<2x8x1xf32> to vector<2x8x8xf32>
    %382 = arith.addf %379, %381 : vector<2x8x8xf32>
    %cst_126 = arith.constant dense<0xFF800000> : vector<2x8xf32>
    %383 = vector.multi_reduction <maximumf>, %382, %cst_126 [2] : vector<2x8x8xf32> to vector<2x8xf32>
    %384 = vector.shape_cast %383 : vector<2x8xf32> to vector<2x8x1xf32>
    %385 = vector.broadcast %384 : vector<2x8x1xf32> to vector<2x8x8xf32>
    %386 = arith.subf %382, %385 : vector<2x8x8xf32>
    %387 = math.exp %386 : vector<2x8x8xf32>
    %cst_127 = arith.constant dense<0.000000e+00> : vector<2x8xf32>
    %388 = vector.multi_reduction <add>, %387, %cst_127 [2] : vector<2x8x8xf32> to vector<2x8xf32>
    %389 = math.log %388 : vector<2x8xf32>
    %390 = vector.shape_cast %384 : vector<2x8x1xf32> to vector<2x8xf32>
    %391 = arith.addf %389, %390 : vector<2x8xf32>
    %cst_128 = arith.constant 0.000000e+00 : f32
    %392 = vector.broadcast %cst_128 : f32 to vector<2x1xf32>
    %393 = arith.cmpf ogt, %359, %392 : vector<2x1xf32>
    %394 = vector.shape_cast %393 : vector<2x1xi1> to vector<2x1xi1>
    %395 = vector.broadcast %394 : vector<2x1xi1> to vector<2x8xi1>
    %396 = arith.select %395, %391, %353 : vector<2x8xi1>, vector<2x8xf32>
    %397 = vector.shape_cast %353 : vector<2x8xf32> to vector<2x1x8xf32>
    %398 = vector.shape_cast %341 : vector<8x8xf32> to vector<1x8x8xf32>
    %399 = vector.broadcast %397 : vector<2x1x8xf32> to vector<2x8x8xf32>
    %400 = vector.broadcast %398 : vector<1x8x8xf32> to vector<2x8x8xf32>
    %401 = arith.addf %399, %400 : vector<2x8x8xf32>
    %402 = vector.shape_cast %358 : vector<2x8xf32> to vector<2x8x1xf32>
    %403 = vector.broadcast %402 : vector<2x8x1xf32> to vector<2x8x8xf32>
    %404 = arith.addf %401, %403 : vector<2x8x8xf32>
    %cst_129 = arith.constant dense<0xFF800000> : vector<2x8xf32>
    %405 = vector.multi_reduction <maximumf>, %404, %cst_129 [2] : vector<2x8x8xf32> to vector<2x8xf32>
    %406 = vector.shape_cast %405 : vector<2x8xf32> to vector<2x8x1xf32>
    %407 = vector.broadcast %406 : vector<2x8x1xf32> to vector<2x8x8xf32>
    %408 = arith.cmpf oge, %404, %407 : vector<2x8x8xf32>
    %c8_i32 = arith.constant 8 : i32
    %409 = vector.broadcast %c8_i32 : i32 to vector<2x8x8xi32>
    %410 = arith.select %408, %344, %409 : vector<2x8x8xi1>, vector<2x8x8xi32>
    %cst_130 = arith.constant dense<2147483647> : vector<2x8xi32>
    %411 = vector.multi_reduction <minsi>, %410, %cst_130 [2] : vector<2x8x8xi32> to vector<2x8xi32>
    %cst_131 = arith.constant 0.000000e+00 : f32
    %412 = vector.broadcast %cst_131 : f32 to vector<2x1xf32>
    %413 = arith.cmpf ogt, %359, %412 : vector<2x1xf32>
    %414 = vector.shape_cast %413 : vector<2x1xi1> to vector<2x1xi1>
    %415 = vector.broadcast %414 : vector<2x1xi1> to vector<2x8xi1>
    %416 = arith.select %415, %405, %353 : vector<2x8xi1>, vector<2x8xf32>
    %cst_132 = arith.constant 0.000000e+00 : f32
    %417 = vector.broadcast %cst_132 : f32 to vector<2x1xf32>
    %418 = arith.cmpf ogt, %359, %417 : vector<2x1xf32>
    %419 = arith.select %418, %360, %345 : vector<2x1xi1>, vector<2x1xi32>
    %420 = vector.extract_strided_slice %338 {offsets = [0, 2, 0], sizes = [2, 1, 8], strides = [1, 1, 1]} : vector<2x8x8xf32> to vector<2x1x8xf32>
    %421 = vector.shape_cast %420 : vector<2x1x8xf32> to vector<2x8xf32>
    %422 = vector.extract_strided_slice %2 {offsets = [0, 2], sizes = [2, 1], strides = [1, 1]} : vector<2x8xf32> to vector<2x1xf32>
    %423 = vector.extract_strided_slice %3 {offsets = [0, 2], sizes = [2, 1], strides = [1, 1]} : vector<2x8xi32> to vector<2x1xi32>
    %424 = vector.broadcast %423 : vector<2x1xi32> to vector<2x8xi32>
    %425 = arith.cmpi eq, %342, %424 : vector<2x8xi32>
    %426 = arith.extui %425 : vector<2x8xi1> to vector<2x8xi32>
    %427 = arith.sitofp %426 : vector<2x8xi32> to vector<2x8xf32>
    %cst_133 = arith.constant dense<0.000000e+00> : vector<2x8xf32>
    %428 = tpu.matmul %427, %341, %cst_133 {dimension_numbers = #tpu.dot_dimension_numbers<[1], [0], [0], [1], [0, 0, 1, 1], [], []>} : vector<2x8xf32>, vector<8x8xf32>, vector<2x8xf32> -> vector<2x8xf32>
    %429 = arith.mulf %428, %364 : vector<2x8xf32>
    %cst_134 = arith.constant dense<0.000000e+00> : vector<2xf32>
    %430 = vector.multi_reduction <add>, %429, %cst_134 [1] : vector<2x8xf32> to vector<2xf32>
    %431 = vector.shape_cast %430 : vector<2xf32> to vector<2x1xf32>
    %432 = arith.mulf %421, %427 : vector<2x8xf32>
    %cst_135 = arith.constant dense<0.000000e+00> : vector<2xf32>
    %433 = vector.multi_reduction <add>, %432, %cst_135 [1] : vector<2x8xf32> to vector<2xf32>
    %434 = vector.shape_cast %433 : vector<2xf32> to vector<2x1xf32>
    %435 = arith.addf %431, %434 : vector<2x1xf32>
    %436 = arith.mulf %435, %422 : vector<2x1xf32>
    %437 = arith.addf %374, %436 : vector<2x1xf32>
    %438 = vector.shape_cast %396 : vector<2x8xf32> to vector<2x1x8xf32>
    %439 = vector.shape_cast %341 : vector<8x8xf32> to vector<1x8x8xf32>
    %440 = vector.broadcast %438 : vector<2x1x8xf32> to vector<2x8x8xf32>
    %441 = vector.broadcast %439 : vector<1x8x8xf32> to vector<2x8x8xf32>
    %442 = arith.addf %440, %441 : vector<2x8x8xf32>
    %443 = vector.shape_cast %421 : vector<2x8xf32> to vector<2x8x1xf32>
    %444 = vector.broadcast %443 : vector<2x8x1xf32> to vector<2x8x8xf32>
    %445 = arith.addf %442, %444 : vector<2x8x8xf32>
    %cst_136 = arith.constant dense<0xFF800000> : vector<2x8xf32>
    %446 = vector.multi_reduction <maximumf>, %445, %cst_136 [2] : vector<2x8x8xf32> to vector<2x8xf32>
    %447 = vector.shape_cast %446 : vector<2x8xf32> to vector<2x8x1xf32>
    %448 = vector.broadcast %447 : vector<2x8x1xf32> to vector<2x8x8xf32>
    %449 = arith.subf %445, %448 : vector<2x8x8xf32>
    %450 = math.exp %449 : vector<2x8x8xf32>
    %cst_137 = arith.constant dense<0.000000e+00> : vector<2x8xf32>
    %451 = vector.multi_reduction <add>, %450, %cst_137 [2] : vector<2x8x8xf32> to vector<2x8xf32>
    %452 = math.log %451 : vector<2x8xf32>
    %453 = vector.shape_cast %447 : vector<2x8x1xf32> to vector<2x8xf32>
    %454 = arith.addf %452, %453 : vector<2x8xf32>
    %cst_138 = arith.constant 0.000000e+00 : f32
    %455 = vector.broadcast %cst_138 : f32 to vector<2x1xf32>
    %456 = arith.cmpf ogt, %422, %455 : vector<2x1xf32>
    %457 = vector.shape_cast %456 : vector<2x1xi1> to vector<2x1xi1>
    %458 = vector.broadcast %457 : vector<2x1xi1> to vector<2x8xi1>
    %459 = arith.select %458, %454, %396 : vector<2x8xi1>, vector<2x8xf32>
    %460 = vector.shape_cast %416 : vector<2x8xf32> to vector<2x1x8xf32>
    %461 = vector.shape_cast %341 : vector<8x8xf32> to vector<1x8x8xf32>
    %462 = vector.broadcast %460 : vector<2x1x8xf32> to vector<2x8x8xf32>
    %463 = vector.broadcast %461 : vector<1x8x8xf32> to vector<2x8x8xf32>
    %464 = arith.addf %462, %463 : vector<2x8x8xf32>
    %465 = vector.shape_cast %421 : vector<2x8xf32> to vector<2x8x1xf32>
    %466 = vector.broadcast %465 : vector<2x8x1xf32> to vector<2x8x8xf32>
    %467 = arith.addf %464, %466 : vector<2x8x8xf32>
    %cst_139 = arith.constant dense<0xFF800000> : vector<2x8xf32>
    %468 = vector.multi_reduction <maximumf>, %467, %cst_139 [2] : vector<2x8x8xf32> to vector<2x8xf32>
    %469 = vector.shape_cast %468 : vector<2x8xf32> to vector<2x8x1xf32>
    %470 = vector.broadcast %469 : vector<2x8x1xf32> to vector<2x8x8xf32>
    %471 = arith.cmpf oge, %467, %470 : vector<2x8x8xf32>
    %c8_i32_140 = arith.constant 8 : i32
    %472 = vector.broadcast %c8_i32_140 : i32 to vector<2x8x8xi32>
    %473 = arith.select %471, %344, %472 : vector<2x8x8xi1>, vector<2x8x8xi32>
    %cst_141 = arith.constant dense<2147483647> : vector<2x8xi32>
    %474 = vector.multi_reduction <minsi>, %473, %cst_141 [2] : vector<2x8x8xi32> to vector<2x8xi32>
    %cst_142 = arith.constant 0.000000e+00 : f32
    %475 = vector.broadcast %cst_142 : f32 to vector<2x1xf32>
    %476 = arith.cmpf ogt, %422, %475 : vector<2x1xf32>
    %477 = vector.shape_cast %476 : vector<2x1xi1> to vector<2x1xi1>
    %478 = vector.broadcast %477 : vector<2x1xi1> to vector<2x8xi1>
    %479 = arith.select %478, %468, %416 : vector<2x8xi1>, vector<2x8xf32>
    %cst_143 = arith.constant 0.000000e+00 : f32
    %480 = vector.broadcast %cst_143 : f32 to vector<2x1xf32>
    %481 = arith.cmpf ogt, %422, %480 : vector<2x1xf32>
    %482 = arith.select %481, %423, %419 : vector<2x1xi1>, vector<2x1xi32>
    %483 = vector.extract_strided_slice %338 {offsets = [0, 3, 0], sizes = [2, 1, 8], strides = [1, 1, 1]} : vector<2x8x8xf32> to vector<2x1x8xf32>
    %484 = vector.shape_cast %483 : vector<2x1x8xf32> to vector<2x8xf32>
    %485 = vector.extract_strided_slice %2 {offsets = [0, 3], sizes = [2, 1], strides = [1, 1]} : vector<2x8xf32> to vector<2x1xf32>
    %486 = vector.extract_strided_slice %3 {offsets = [0, 3], sizes = [2, 1], strides = [1, 1]} : vector<2x8xi32> to vector<2x1xi32>
    %487 = vector.broadcast %486 : vector<2x1xi32> to vector<2x8xi32>
    %488 = arith.cmpi eq, %342, %487 : vector<2x8xi32>
    %489 = arith.extui %488 : vector<2x8xi1> to vector<2x8xi32>
    %490 = arith.sitofp %489 : vector<2x8xi32> to vector<2x8xf32>
    %cst_144 = arith.constant dense<0.000000e+00> : vector<2x8xf32>
    %491 = tpu.matmul %490, %341, %cst_144 {dimension_numbers = #tpu.dot_dimension_numbers<[1], [0], [0], [1], [0, 0, 1, 1], [], []>} : vector<2x8xf32>, vector<8x8xf32>, vector<2x8xf32> -> vector<2x8xf32>
    %492 = arith.mulf %491, %427 : vector<2x8xf32>
    %cst_145 = arith.constant dense<0.000000e+00> : vector<2xf32>
    %493 = vector.multi_reduction <add>, %492, %cst_145 [1] : vector<2x8xf32> to vector<2xf32>
    %494 = vector.shape_cast %493 : vector<2xf32> to vector<2x1xf32>
    %495 = arith.mulf %484, %490 : vector<2x8xf32>
    %cst_146 = arith.constant dense<0.000000e+00> : vector<2xf32>
    %496 = vector.multi_reduction <add>, %495, %cst_146 [1] : vector<2x8xf32> to vector<2xf32>
    %497 = vector.shape_cast %496 : vector<2xf32> to vector<2x1xf32>
    %498 = arith.addf %494, %497 : vector<2x1xf32>
    %499 = arith.mulf %498, %485 : vector<2x1xf32>
    %500 = arith.addf %437, %499 : vector<2x1xf32>
    %501 = vector.shape_cast %459 : vector<2x8xf32> to vector<2x1x8xf32>
    %502 = vector.shape_cast %341 : vector<8x8xf32> to vector<1x8x8xf32>
    %503 = vector.broadcast %501 : vector<2x1x8xf32> to vector<2x8x8xf32>
    %504 = vector.broadcast %502 : vector<1x8x8xf32> to vector<2x8x8xf32>
    %505 = arith.addf %503, %504 : vector<2x8x8xf32>
    %506 = vector.shape_cast %484 : vector<2x8xf32> to vector<2x8x1xf32>
    %507 = vector.broadcast %506 : vector<2x8x1xf32> to vector<2x8x8xf32>
    %508 = arith.addf %505, %507 : vector<2x8x8xf32>
    %cst_147 = arith.constant dense<0xFF800000> : vector<2x8xf32>
    %509 = vector.multi_reduction <maximumf>, %508, %cst_147 [2] : vector<2x8x8xf32> to vector<2x8xf32>
    %510 = vector.shape_cast %509 : vector<2x8xf32> to vector<2x8x1xf32>
    %511 = vector.broadcast %510 : vector<2x8x1xf32> to vector<2x8x8xf32>
    %512 = arith.subf %508, %511 : vector<2x8x8xf32>
    %513 = math.exp %512 : vector<2x8x8xf32>
    %cst_148 = arith.constant dense<0.000000e+00> : vector<2x8xf32>
    %514 = vector.multi_reduction <add>, %513, %cst_148 [2] : vector<2x8x8xf32> to vector<2x8xf32>
    %515 = math.log %514 : vector<2x8xf32>
    %516 = vector.shape_cast %510 : vector<2x8x1xf32> to vector<2x8xf32>
    %517 = arith.addf %515, %516 : vector<2x8xf32>
    %cst_149 = arith.constant 0.000000e+00 : f32
    %518 = vector.broadcast %cst_149 : f32 to vector<2x1xf32>
    %519 = arith.cmpf ogt, %485, %518 : vector<2x1xf32>
    %520 = vector.shape_cast %519 : vector<2x1xi1> to vector<2x1xi1>
    %521 = vector.broadcast %520 : vector<2x1xi1> to vector<2x8xi1>
    %522 = arith.select %521, %517, %459 : vector<2x8xi1>, vector<2x8xf32>
    %523 = vector.shape_cast %479 : vector<2x8xf32> to vector<2x1x8xf32>
    %524 = vector.shape_cast %341 : vector<8x8xf32> to vector<1x8x8xf32>
    %525 = vector.broadcast %523 : vector<2x1x8xf32> to vector<2x8x8xf32>
    %526 = vector.broadcast %524 : vector<1x8x8xf32> to vector<2x8x8xf32>
    %527 = arith.addf %525, %526 : vector<2x8x8xf32>
    %528 = vector.shape_cast %484 : vector<2x8xf32> to vector<2x8x1xf32>
    %529 = vector.broadcast %528 : vector<2x8x1xf32> to vector<2x8x8xf32>
    %530 = arith.addf %527, %529 : vector<2x8x8xf32>
    %cst_150 = arith.constant dense<0xFF800000> : vector<2x8xf32>
    %531 = vector.multi_reduction <maximumf>, %530, %cst_150 [2] : vector<2x8x8xf32> to vector<2x8xf32>
    %532 = vector.shape_cast %531 : vector<2x8xf32> to vector<2x8x1xf32>
    %533 = vector.broadcast %532 : vector<2x8x1xf32> to vector<2x8x8xf32>
    %534 = arith.cmpf oge, %530, %533 : vector<2x8x8xf32>
    %c8_i32_151 = arith.constant 8 : i32
    %535 = vector.broadcast %c8_i32_151 : i32 to vector<2x8x8xi32>
    %536 = arith.select %534, %344, %535 : vector<2x8x8xi1>, vector<2x8x8xi32>
    %cst_152 = arith.constant dense<2147483647> : vector<2x8xi32>
    %537 = vector.multi_reduction <minsi>, %536, %cst_152 [2] : vector<2x8x8xi32> to vector<2x8xi32>
    %cst_153 = arith.constant 0.000000e+00 : f32
    %538 = vector.broadcast %cst_153 : f32 to vector<2x1xf32>
    %539 = arith.cmpf ogt, %485, %538 : vector<2x1xf32>
    %540 = vector.shape_cast %539 : vector<2x1xi1> to vector<2x1xi1>
    %541 = vector.broadcast %540 : vector<2x1xi1> to vector<2x8xi1>
    %542 = arith.select %541, %531, %479 : vector<2x8xi1>, vector<2x8xf32>
    %cst_154 = arith.constant 0.000000e+00 : f32
    %543 = vector.broadcast %cst_154 : f32 to vector<2x1xf32>
    %544 = arith.cmpf ogt, %485, %543 : vector<2x1xf32>
    %545 = arith.select %544, %486, %482 : vector<2x1xi1>, vector<2x1xi32>
    %546 = vector.extract_strided_slice %338 {offsets = [0, 4, 0], sizes = [2, 1, 8], strides = [1, 1, 1]} : vector<2x8x8xf32> to vector<2x1x8xf32>
    %547 = vector.shape_cast %546 : vector<2x1x8xf32> to vector<2x8xf32>
    %548 = vector.extract_strided_slice %2 {offsets = [0, 4], sizes = [2, 1], strides = [1, 1]} : vector<2x8xf32> to vector<2x1xf32>
    %549 = vector.extract_strided_slice %3 {offsets = [0, 4], sizes = [2, 1], strides = [1, 1]} : vector<2x8xi32> to vector<2x1xi32>
    %550 = vector.broadcast %549 : vector<2x1xi32> to vector<2x8xi32>
    %551 = arith.cmpi eq, %342, %550 : vector<2x8xi32>
    %552 = arith.extui %551 : vector<2x8xi1> to vector<2x8xi32>
    %553 = arith.sitofp %552 : vector<2x8xi32> to vector<2x8xf32>
    %cst_155 = arith.constant dense<0.000000e+00> : vector<2x8xf32>
    %554 = tpu.matmul %553, %341, %cst_155 {dimension_numbers = #tpu.dot_dimension_numbers<[1], [0], [0], [1], [0, 0, 1, 1], [], []>} : vector<2x8xf32>, vector<8x8xf32>, vector<2x8xf32> -> vector<2x8xf32>
    %555 = arith.mulf %554, %490 : vector<2x8xf32>
    %cst_156 = arith.constant dense<0.000000e+00> : vector<2xf32>
    %556 = vector.multi_reduction <add>, %555, %cst_156 [1] : vector<2x8xf32> to vector<2xf32>
    %557 = vector.shape_cast %556 : vector<2xf32> to vector<2x1xf32>
    %558 = arith.mulf %547, %553 : vector<2x8xf32>
    %cst_157 = arith.constant dense<0.000000e+00> : vector<2xf32>
    %559 = vector.multi_reduction <add>, %558, %cst_157 [1] : vector<2x8xf32> to vector<2xf32>
    %560 = vector.shape_cast %559 : vector<2xf32> to vector<2x1xf32>
    %561 = arith.addf %557, %560 : vector<2x1xf32>
    %562 = arith.mulf %561, %548 : vector<2x1xf32>
    %563 = arith.addf %500, %562 : vector<2x1xf32>
    %564 = vector.shape_cast %522 : vector<2x8xf32> to vector<2x1x8xf32>
    %565 = vector.shape_cast %341 : vector<8x8xf32> to vector<1x8x8xf32>
    %566 = vector.broadcast %564 : vector<2x1x8xf32> to vector<2x8x8xf32>
    %567 = vector.broadcast %565 : vector<1x8x8xf32> to vector<2x8x8xf32>
    %568 = arith.addf %566, %567 : vector<2x8x8xf32>
    %569 = vector.shape_cast %547 : vector<2x8xf32> to vector<2x8x1xf32>
    %570 = vector.broadcast %569 : vector<2x8x1xf32> to vector<2x8x8xf32>
    %571 = arith.addf %568, %570 : vector<2x8x8xf32>
    %cst_158 = arith.constant dense<0xFF800000> : vector<2x8xf32>
    %572 = vector.multi_reduction <maximumf>, %571, %cst_158 [2] : vector<2x8x8xf32> to vector<2x8xf32>
    %573 = vector.shape_cast %572 : vector<2x8xf32> to vector<2x8x1xf32>
    %574 = vector.broadcast %573 : vector<2x8x1xf32> to vector<2x8x8xf32>
    %575 = arith.subf %571, %574 : vector<2x8x8xf32>
    %576 = math.exp %575 : vector<2x8x8xf32>
    %cst_159 = arith.constant dense<0.000000e+00> : vector<2x8xf32>
    %577 = vector.multi_reduction <add>, %576, %cst_159 [2] : vector<2x8x8xf32> to vector<2x8xf32>
    %578 = math.log %577 : vector<2x8xf32>
    %579 = vector.shape_cast %573 : vector<2x8x1xf32> to vector<2x8xf32>
    %580 = arith.addf %578, %579 : vector<2x8xf32>
    %cst_160 = arith.constant 0.000000e+00 : f32
    %581 = vector.broadcast %cst_160 : f32 to vector<2x1xf32>
    %582 = arith.cmpf ogt, %548, %581 : vector<2x1xf32>
    %583 = vector.shape_cast %582 : vector<2x1xi1> to vector<2x1xi1>
    %584 = vector.broadcast %583 : vector<2x1xi1> to vector<2x8xi1>
    %585 = arith.select %584, %580, %522 : vector<2x8xi1>, vector<2x8xf32>
    %586 = vector.shape_cast %542 : vector<2x8xf32> to vector<2x1x8xf32>
    %587 = vector.shape_cast %341 : vector<8x8xf32> to vector<1x8x8xf32>
    %588 = vector.broadcast %586 : vector<2x1x8xf32> to vector<2x8x8xf32>
    %589 = vector.broadcast %587 : vector<1x8x8xf32> to vector<2x8x8xf32>
    %590 = arith.addf %588, %589 : vector<2x8x8xf32>
    %591 = vector.shape_cast %547 : vector<2x8xf32> to vector<2x8x1xf32>
    %592 = vector.broadcast %591 : vector<2x8x1xf32> to vector<2x8x8xf32>
    %593 = arith.addf %590, %592 : vector<2x8x8xf32>
    %cst_161 = arith.constant dense<0xFF800000> : vector<2x8xf32>
    %594 = vector.multi_reduction <maximumf>, %593, %cst_161 [2] : vector<2x8x8xf32> to vector<2x8xf32>
    %595 = vector.shape_cast %594 : vector<2x8xf32> to vector<2x8x1xf32>
    %596 = vector.broadcast %595 : vector<2x8x1xf32> to vector<2x8x8xf32>
    %597 = arith.cmpf oge, %593, %596 : vector<2x8x8xf32>
    %c8_i32_162 = arith.constant 8 : i32
    %598 = vector.broadcast %c8_i32_162 : i32 to vector<2x8x8xi32>
    %599 = arith.select %597, %344, %598 : vector<2x8x8xi1>, vector<2x8x8xi32>
    %cst_163 = arith.constant dense<2147483647> : vector<2x8xi32>
    %600 = vector.multi_reduction <minsi>, %599, %cst_163 [2] : vector<2x8x8xi32> to vector<2x8xi32>
    %cst_164 = arith.constant 0.000000e+00 : f32
    %601 = vector.broadcast %cst_164 : f32 to vector<2x1xf32>
    %602 = arith.cmpf ogt, %548, %601 : vector<2x1xf32>
    %603 = vector.shape_cast %602 : vector<2x1xi1> to vector<2x1xi1>
    %604 = vector.broadcast %603 : vector<2x1xi1> to vector<2x8xi1>
    %605 = arith.select %604, %594, %542 : vector<2x8xi1>, vector<2x8xf32>
    %cst_165 = arith.constant 0.000000e+00 : f32
    %606 = vector.broadcast %cst_165 : f32 to vector<2x1xf32>
    %607 = arith.cmpf ogt, %548, %606 : vector<2x1xf32>
    %608 = arith.select %607, %549, %545 : vector<2x1xi1>, vector<2x1xi32>
    %609 = vector.extract_strided_slice %338 {offsets = [0, 5, 0], sizes = [2, 1, 8], strides = [1, 1, 1]} : vector<2x8x8xf32> to vector<2x1x8xf32>
    %610 = vector.shape_cast %609 : vector<2x1x8xf32> to vector<2x8xf32>
    %611 = vector.extract_strided_slice %2 {offsets = [0, 5], sizes = [2, 1], strides = [1, 1]} : vector<2x8xf32> to vector<2x1xf32>
    %612 = vector.extract_strided_slice %3 {offsets = [0, 5], sizes = [2, 1], strides = [1, 1]} : vector<2x8xi32> to vector<2x1xi32>
    %613 = vector.broadcast %612 : vector<2x1xi32> to vector<2x8xi32>
    %614 = arith.cmpi eq, %342, %613 : vector<2x8xi32>
    %615 = arith.extui %614 : vector<2x8xi1> to vector<2x8xi32>
    %616 = arith.sitofp %615 : vector<2x8xi32> to vector<2x8xf32>
    %cst_166 = arith.constant dense<0.000000e+00> : vector<2x8xf32>
    %617 = tpu.matmul %616, %341, %cst_166 {dimension_numbers = #tpu.dot_dimension_numbers<[1], [0], [0], [1], [0, 0, 1, 1], [], []>} : vector<2x8xf32>, vector<8x8xf32>, vector<2x8xf32> -> vector<2x8xf32>
    %618 = arith.mulf %617, %553 : vector<2x8xf32>
    %cst_167 = arith.constant dense<0.000000e+00> : vector<2xf32>
    %619 = vector.multi_reduction <add>, %618, %cst_167 [1] : vector<2x8xf32> to vector<2xf32>
    %620 = vector.shape_cast %619 : vector<2xf32> to vector<2x1xf32>
    %621 = arith.mulf %610, %616 : vector<2x8xf32>
    %cst_168 = arith.constant dense<0.000000e+00> : vector<2xf32>
    %622 = vector.multi_reduction <add>, %621, %cst_168 [1] : vector<2x8xf32> to vector<2xf32>
    %623 = vector.shape_cast %622 : vector<2xf32> to vector<2x1xf32>
    %624 = arith.addf %620, %623 : vector<2x1xf32>
    %625 = arith.mulf %624, %611 : vector<2x1xf32>
    %626 = arith.addf %563, %625 : vector<2x1xf32>
    %627 = vector.shape_cast %585 : vector<2x8xf32> to vector<2x1x8xf32>
    %628 = vector.shape_cast %341 : vector<8x8xf32> to vector<1x8x8xf32>
    %629 = vector.broadcast %627 : vector<2x1x8xf32> to vector<2x8x8xf32>
    %630 = vector.broadcast %628 : vector<1x8x8xf32> to vector<2x8x8xf32>
    %631 = arith.addf %629, %630 : vector<2x8x8xf32>
    %632 = vector.shape_cast %610 : vector<2x8xf32> to vector<2x8x1xf32>
    %633 = vector.broadcast %632 : vector<2x8x1xf32> to vector<2x8x8xf32>
    %634 = arith.addf %631, %633 : vector<2x8x8xf32>
    %cst_169 = arith.constant dense<0xFF800000> : vector<2x8xf32>
    %635 = vector.multi_reduction <maximumf>, %634, %cst_169 [2] : vector<2x8x8xf32> to vector<2x8xf32>
    %636 = vector.shape_cast %635 : vector<2x8xf32> to vector<2x8x1xf32>
    %637 = vector.broadcast %636 : vector<2x8x1xf32> to vector<2x8x8xf32>
    %638 = arith.subf %634, %637 : vector<2x8x8xf32>
    %639 = math.exp %638 : vector<2x8x8xf32>
    %cst_170 = arith.constant dense<0.000000e+00> : vector<2x8xf32>
    %640 = vector.multi_reduction <add>, %639, %cst_170 [2] : vector<2x8x8xf32> to vector<2x8xf32>
    %641 = math.log %640 : vector<2x8xf32>
    %642 = vector.shape_cast %636 : vector<2x8x1xf32> to vector<2x8xf32>
    %643 = arith.addf %641, %642 : vector<2x8xf32>
    %cst_171 = arith.constant 0.000000e+00 : f32
    %644 = vector.broadcast %cst_171 : f32 to vector<2x1xf32>
    %645 = arith.cmpf ogt, %611, %644 : vector<2x1xf32>
    %646 = vector.shape_cast %645 : vector<2x1xi1> to vector<2x1xi1>
    %647 = vector.broadcast %646 : vector<2x1xi1> to vector<2x8xi1>
    %648 = arith.select %647, %643, %585 : vector<2x8xi1>, vector<2x8xf32>
    %649 = vector.shape_cast %605 : vector<2x8xf32> to vector<2x1x8xf32>
    %650 = vector.shape_cast %341 : vector<8x8xf32> to vector<1x8x8xf32>
    %651 = vector.broadcast %649 : vector<2x1x8xf32> to vector<2x8x8xf32>
    %652 = vector.broadcast %650 : vector<1x8x8xf32> to vector<2x8x8xf32>
    %653 = arith.addf %651, %652 : vector<2x8x8xf32>
    %654 = vector.shape_cast %610 : vector<2x8xf32> to vector<2x8x1xf32>
    %655 = vector.broadcast %654 : vector<2x8x1xf32> to vector<2x8x8xf32>
    %656 = arith.addf %653, %655 : vector<2x8x8xf32>
    %cst_172 = arith.constant dense<0xFF800000> : vector<2x8xf32>
    %657 = vector.multi_reduction <maximumf>, %656, %cst_172 [2] : vector<2x8x8xf32> to vector<2x8xf32>
    %658 = vector.shape_cast %657 : vector<2x8xf32> to vector<2x8x1xf32>
    %659 = vector.broadcast %658 : vector<2x8x1xf32> to vector<2x8x8xf32>
    %660 = arith.cmpf oge, %656, %659 : vector<2x8x8xf32>
    %c8_i32_173 = arith.constant 8 : i32
    %661 = vector.broadcast %c8_i32_173 : i32 to vector<2x8x8xi32>
    %662 = arith.select %660, %344, %661 : vector<2x8x8xi1>, vector<2x8x8xi32>
    %cst_174 = arith.constant dense<2147483647> : vector<2x8xi32>
    %663 = vector.multi_reduction <minsi>, %662, %cst_174 [2] : vector<2x8x8xi32> to vector<2x8xi32>
    %cst_175 = arith.constant 0.000000e+00 : f32
    %664 = vector.broadcast %cst_175 : f32 to vector<2x1xf32>
    %665 = arith.cmpf ogt, %611, %664 : vector<2x1xf32>
    %666 = vector.shape_cast %665 : vector<2x1xi1> to vector<2x1xi1>
    %667 = vector.broadcast %666 : vector<2x1xi1> to vector<2x8xi1>
    %668 = arith.select %667, %657, %605 : vector<2x8xi1>, vector<2x8xf32>
    %cst_176 = arith.constant 0.000000e+00 : f32
    %669 = vector.broadcast %cst_176 : f32 to vector<2x1xf32>
    %670 = arith.cmpf ogt, %611, %669 : vector<2x1xf32>
    %671 = arith.select %670, %612, %608 : vector<2x1xi1>, vector<2x1xi32>
    %672 = vector.extract_strided_slice %338 {offsets = [0, 6, 0], sizes = [2, 1, 8], strides = [1, 1, 1]} : vector<2x8x8xf32> to vector<2x1x8xf32>
    %673 = vector.shape_cast %672 : vector<2x1x8xf32> to vector<2x8xf32>
    %674 = vector.extract_strided_slice %2 {offsets = [0, 6], sizes = [2, 1], strides = [1, 1]} : vector<2x8xf32> to vector<2x1xf32>
    %675 = vector.extract_strided_slice %3 {offsets = [0, 6], sizes = [2, 1], strides = [1, 1]} : vector<2x8xi32> to vector<2x1xi32>
    %676 = vector.broadcast %675 : vector<2x1xi32> to vector<2x8xi32>
    %677 = arith.cmpi eq, %342, %676 : vector<2x8xi32>
    %678 = arith.extui %677 : vector<2x8xi1> to vector<2x8xi32>
    %679 = arith.sitofp %678 : vector<2x8xi32> to vector<2x8xf32>
    %cst_177 = arith.constant dense<0.000000e+00> : vector<2x8xf32>
    %680 = tpu.matmul %679, %341, %cst_177 {dimension_numbers = #tpu.dot_dimension_numbers<[1], [0], [0], [1], [0, 0, 1, 1], [], []>} : vector<2x8xf32>, vector<8x8xf32>, vector<2x8xf32> -> vector<2x8xf32>
    %681 = arith.mulf %680, %616 : vector<2x8xf32>
    %cst_178 = arith.constant dense<0.000000e+00> : vector<2xf32>
    %682 = vector.multi_reduction <add>, %681, %cst_178 [1] : vector<2x8xf32> to vector<2xf32>
    %683 = vector.shape_cast %682 : vector<2xf32> to vector<2x1xf32>
    %684 = arith.mulf %673, %679 : vector<2x8xf32>
    %cst_179 = arith.constant dense<0.000000e+00> : vector<2xf32>
    %685 = vector.multi_reduction <add>, %684, %cst_179 [1] : vector<2x8xf32> to vector<2xf32>
    %686 = vector.shape_cast %685 : vector<2xf32> to vector<2x1xf32>
    %687 = arith.addf %683, %686 : vector<2x1xf32>
    %688 = arith.mulf %687, %674 : vector<2x1xf32>
    %689 = arith.addf %626, %688 : vector<2x1xf32>
    %690 = vector.shape_cast %648 : vector<2x8xf32> to vector<2x1x8xf32>
    %691 = vector.shape_cast %341 : vector<8x8xf32> to vector<1x8x8xf32>
    %692 = vector.broadcast %690 : vector<2x1x8xf32> to vector<2x8x8xf32>
    %693 = vector.broadcast %691 : vector<1x8x8xf32> to vector<2x8x8xf32>
    %694 = arith.addf %692, %693 : vector<2x8x8xf32>
    %695 = vector.shape_cast %673 : vector<2x8xf32> to vector<2x8x1xf32>
    %696 = vector.broadcast %695 : vector<2x8x1xf32> to vector<2x8x8xf32>
    %697 = arith.addf %694, %696 : vector<2x8x8xf32>
    %cst_180 = arith.constant dense<0xFF800000> : vector<2x8xf32>
    %698 = vector.multi_reduction <maximumf>, %697, %cst_180 [2] : vector<2x8x8xf32> to vector<2x8xf32>
    %699 = vector.shape_cast %698 : vector<2x8xf32> to vector<2x8x1xf32>
    %700 = vector.broadcast %699 : vector<2x8x1xf32> to vector<2x8x8xf32>
    %701 = arith.subf %697, %700 : vector<2x8x8xf32>
    %702 = math.exp %701 : vector<2x8x8xf32>
    %cst_181 = arith.constant dense<0.000000e+00> : vector<2x8xf32>
    %703 = vector.multi_reduction <add>, %702, %cst_181 [2] : vector<2x8x8xf32> to vector<2x8xf32>
    %704 = math.log %703 : vector<2x8xf32>
    %705 = vector.shape_cast %699 : vector<2x8x1xf32> to vector<2x8xf32>
    %706 = arith.addf %704, %705 : vector<2x8xf32>
    %cst_182 = arith.constant 0.000000e+00 : f32
    %707 = vector.broadcast %cst_182 : f32 to vector<2x1xf32>
    %708 = arith.cmpf ogt, %674, %707 : vector<2x1xf32>
    %709 = vector.shape_cast %708 : vector<2x1xi1> to vector<2x1xi1>
    %710 = vector.broadcast %709 : vector<2x1xi1> to vector<2x8xi1>
    %711 = arith.select %710, %706, %648 : vector<2x8xi1>, vector<2x8xf32>
    %712 = vector.shape_cast %668 : vector<2x8xf32> to vector<2x1x8xf32>
    %713 = vector.shape_cast %341 : vector<8x8xf32> to vector<1x8x8xf32>
    %714 = vector.broadcast %712 : vector<2x1x8xf32> to vector<2x8x8xf32>
    %715 = vector.broadcast %713 : vector<1x8x8xf32> to vector<2x8x8xf32>
    %716 = arith.addf %714, %715 : vector<2x8x8xf32>
    %717 = vector.shape_cast %673 : vector<2x8xf32> to vector<2x8x1xf32>
    %718 = vector.broadcast %717 : vector<2x8x1xf32> to vector<2x8x8xf32>
    %719 = arith.addf %716, %718 : vector<2x8x8xf32>
    %cst_183 = arith.constant dense<0xFF800000> : vector<2x8xf32>
    %720 = vector.multi_reduction <maximumf>, %719, %cst_183 [2] : vector<2x8x8xf32> to vector<2x8xf32>
    %721 = vector.shape_cast %720 : vector<2x8xf32> to vector<2x8x1xf32>
    %722 = vector.broadcast %721 : vector<2x8x1xf32> to vector<2x8x8xf32>
    %723 = arith.cmpf oge, %719, %722 : vector<2x8x8xf32>
    %c8_i32_184 = arith.constant 8 : i32
    %724 = vector.broadcast %c8_i32_184 : i32 to vector<2x8x8xi32>
    %725 = arith.select %723, %344, %724 : vector<2x8x8xi1>, vector<2x8x8xi32>
    %cst_185 = arith.constant dense<2147483647> : vector<2x8xi32>
    %726 = vector.multi_reduction <minsi>, %725, %cst_185 [2] : vector<2x8x8xi32> to vector<2x8xi32>
    %cst_186 = arith.constant 0.000000e+00 : f32
    %727 = vector.broadcast %cst_186 : f32 to vector<2x1xf32>
    %728 = arith.cmpf ogt, %674, %727 : vector<2x1xf32>
    %729 = vector.shape_cast %728 : vector<2x1xi1> to vector<2x1xi1>
    %730 = vector.broadcast %729 : vector<2x1xi1> to vector<2x8xi1>
    %731 = arith.select %730, %720, %668 : vector<2x8xi1>, vector<2x8xf32>
    %cst_187 = arith.constant 0.000000e+00 : f32
    %732 = vector.broadcast %cst_187 : f32 to vector<2x1xf32>
    %733 = arith.cmpf ogt, %674, %732 : vector<2x1xf32>
    %734 = arith.select %733, %675, %671 : vector<2x1xi1>, vector<2x1xi32>
    %735 = vector.extract_strided_slice %338 {offsets = [0, 7, 0], sizes = [2, 1, 8], strides = [1, 1, 1]} : vector<2x8x8xf32> to vector<2x1x8xf32>
    %736 = vector.shape_cast %735 : vector<2x1x8xf32> to vector<2x8xf32>
    %737 = vector.extract_strided_slice %2 {offsets = [0, 7], sizes = [2, 1], strides = [1, 1]} : vector<2x8xf32> to vector<2x1xf32>
    %738 = vector.extract_strided_slice %3 {offsets = [0, 7], sizes = [2, 1], strides = [1, 1]} : vector<2x8xi32> to vector<2x1xi32>
    %739 = vector.broadcast %738 : vector<2x1xi32> to vector<2x8xi32>
    %740 = arith.cmpi eq, %342, %739 : vector<2x8xi32>
    %741 = arith.extui %740 : vector<2x8xi1> to vector<2x8xi32>
    %742 = arith.sitofp %741 : vector<2x8xi32> to vector<2x8xf32>
    %cst_188 = arith.constant dense<0.000000e+00> : vector<2x8xf32>
    %743 = tpu.matmul %742, %341, %cst_188 {dimension_numbers = #tpu.dot_dimension_numbers<[1], [0], [0], [1], [0, 0, 1, 1], [], []>} : vector<2x8xf32>, vector<8x8xf32>, vector<2x8xf32> -> vector<2x8xf32>
    %744 = arith.mulf %743, %679 : vector<2x8xf32>
    %cst_189 = arith.constant dense<0.000000e+00> : vector<2xf32>
    %745 = vector.multi_reduction <add>, %744, %cst_189 [1] : vector<2x8xf32> to vector<2xf32>
    %746 = vector.shape_cast %745 : vector<2xf32> to vector<2x1xf32>
    %747 = arith.mulf %736, %742 : vector<2x8xf32>
    %cst_190 = arith.constant dense<0.000000e+00> : vector<2xf32>
    %748 = vector.multi_reduction <add>, %747, %cst_190 [1] : vector<2x8xf32> to vector<2xf32>
    %749 = vector.shape_cast %748 : vector<2xf32> to vector<2x1xf32>
    %750 = arith.addf %746, %749 : vector<2x1xf32>
    %751 = arith.mulf %750, %737 : vector<2x1xf32>
    %752 = arith.addf %689, %751 : vector<2x1xf32>
    %753 = vector.shape_cast %711 : vector<2x8xf32> to vector<2x1x8xf32>
    %754 = vector.shape_cast %341 : vector<8x8xf32> to vector<1x8x8xf32>
    %755 = vector.broadcast %753 : vector<2x1x8xf32> to vector<2x8x8xf32>
    %756 = vector.broadcast %754 : vector<1x8x8xf32> to vector<2x8x8xf32>
    %757 = arith.addf %755, %756 : vector<2x8x8xf32>
    %758 = vector.shape_cast %736 : vector<2x8xf32> to vector<2x8x1xf32>
    %759 = vector.broadcast %758 : vector<2x8x1xf32> to vector<2x8x8xf32>
    %760 = arith.addf %757, %759 : vector<2x8x8xf32>
    %cst_191 = arith.constant dense<0xFF800000> : vector<2x8xf32>
    %761 = vector.multi_reduction <maximumf>, %760, %cst_191 [2] : vector<2x8x8xf32> to vector<2x8xf32>
    %762 = vector.shape_cast %761 : vector<2x8xf32> to vector<2x8x1xf32>
    %763 = vector.broadcast %762 : vector<2x8x1xf32> to vector<2x8x8xf32>
    %764 = arith.subf %760, %763 : vector<2x8x8xf32>
    %765 = math.exp %764 : vector<2x8x8xf32>
    %cst_192 = arith.constant dense<0.000000e+00> : vector<2x8xf32>
    %766 = vector.multi_reduction <add>, %765, %cst_192 [2] : vector<2x8x8xf32> to vector<2x8xf32>
    %767 = math.log %766 : vector<2x8xf32>
    %768 = vector.shape_cast %762 : vector<2x8x1xf32> to vector<2x8xf32>
    %769 = arith.addf %767, %768 : vector<2x8xf32>
    %cst_193 = arith.constant 0.000000e+00 : f32
    %770 = vector.broadcast %cst_193 : f32 to vector<2x1xf32>
    %771 = arith.cmpf ogt, %737, %770 : vector<2x1xf32>
    %772 = vector.shape_cast %771 : vector<2x1xi1> to vector<2x1xi1>
    %773 = vector.broadcast %772 : vector<2x1xi1> to vector<2x8xi1>
    %774 = arith.select %773, %769, %711 : vector<2x8xi1>, vector<2x8xf32>
    %775 = vector.shape_cast %731 : vector<2x8xf32> to vector<2x1x8xf32>
    %776 = vector.shape_cast %341 : vector<8x8xf32> to vector<1x8x8xf32>
    %777 = vector.broadcast %775 : vector<2x1x8xf32> to vector<2x8x8xf32>
    %778 = vector.broadcast %776 : vector<1x8x8xf32> to vector<2x8x8xf32>
    %779 = arith.addf %777, %778 : vector<2x8x8xf32>
    %780 = vector.shape_cast %736 : vector<2x8xf32> to vector<2x8x1xf32>
    %781 = vector.broadcast %780 : vector<2x8x1xf32> to vector<2x8x8xf32>
    %782 = arith.addf %779, %781 : vector<2x8x8xf32>
    %cst_194 = arith.constant dense<0xFF800000> : vector<2x8xf32>
    %783 = vector.multi_reduction <maximumf>, %782, %cst_194 [2] : vector<2x8x8xf32> to vector<2x8xf32>
    %784 = vector.shape_cast %783 : vector<2x8xf32> to vector<2x8x1xf32>
    %785 = vector.broadcast %784 : vector<2x8x1xf32> to vector<2x8x8xf32>
    %786 = arith.cmpf oge, %782, %785 : vector<2x8x8xf32>
    %c8_i32_195 = arith.constant 8 : i32
    %787 = vector.broadcast %c8_i32_195 : i32 to vector<2x8x8xi32>
    %788 = arith.select %786, %344, %787 : vector<2x8x8xi1>, vector<2x8x8xi32>
    %cst_196 = arith.constant dense<2147483647> : vector<2x8xi32>
    %789 = vector.multi_reduction <minsi>, %788, %cst_196 [2] : vector<2x8x8xi32> to vector<2x8xi32>
    %cst_197 = arith.constant 0.000000e+00 : f32
    %790 = vector.broadcast %cst_197 : f32 to vector<2x1xf32>
    %791 = arith.cmpf ogt, %737, %790 : vector<2x1xf32>
    %792 = vector.shape_cast %791 : vector<2x1xi1> to vector<2x1xi1>
    %793 = vector.broadcast %792 : vector<2x1xi1> to vector<2x8xi1>
    %794 = arith.select %793, %783, %731 : vector<2x8xi1>, vector<2x8xf32>
    %cst_198 = arith.constant 0.000000e+00 : f32
    %795 = vector.broadcast %cst_198 : f32 to vector<2x1xf32>
    %796 = arith.cmpf ogt, %737, %795 : vector<2x1xf32>
    %797 = arith.select %796, %738, %734 : vector<2x1xi1>, vector<2x1xi32>
    %798 = vector.broadcast %340 : vector<1x8xf32> to vector<2x8xf32>
    %799 = arith.addf %774, %798 : vector<2x8xf32>
    %cst_199 = arith.constant dense<0xFF800000> : vector<2xf32>
    %800 = vector.multi_reduction <maximumf>, %799, %cst_199 [1] : vector<2x8xf32> to vector<2xf32>
    %801 = vector.shape_cast %800 : vector<2xf32> to vector<2x1xf32>
    %802 = vector.broadcast %801 : vector<2x1xf32> to vector<2x8xf32>
    %803 = arith.subf %799, %802 : vector<2x8xf32>
    %804 = math.exp %803 : vector<2x8xf32>
    %cst_200 = arith.constant dense<0.000000e+00> : vector<2xf32>
    %805 = vector.multi_reduction <add>, %804, %cst_200 [1] : vector<2x8xf32> to vector<2xf32>
    %806 = vector.shape_cast %805 : vector<2xf32> to vector<2x1xf32>
    %807 = math.log %806 : vector<2x1xf32>
    %808 = arith.addf %807, %801 : vector<2x1xf32>
    %809 = vector.broadcast %797 : vector<2x1xi32> to vector<2x8xi32>
    %810 = arith.cmpi eq, %342, %809 : vector<2x8xi32>
    %811 = arith.extui %810 : vector<2x8xi1> to vector<2x8xi32>
    %812 = arith.sitofp %811 : vector<2x8xi32> to vector<2x8xf32>
    %813 = vector.broadcast %340 : vector<1x8xf32> to vector<2x8xf32>
    %814 = arith.mulf %813, %812 : vector<2x8xf32>
    %cst_201 = arith.constant dense<0.000000e+00> : vector<2xf32>
    %815 = vector.multi_reduction <add>, %814, %cst_201 [1] : vector<2x8xf32> to vector<2xf32>
    %816 = vector.shape_cast %815 : vector<2xf32> to vector<2x1xf32>
    %817 = arith.addf %752, %816 : vector<2x1xf32>
    %818 = arith.subf %817, %808 : vector<2x1xf32>
    %819 = vector.broadcast %340 : vector<1x8xf32> to vector<2x8xf32>
    %820 = arith.addf %794, %819 : vector<2x8xf32>
    %cst_202 = arith.constant dense<0xFF800000> : vector<2xf32>
    %821 = vector.multi_reduction <maximumf>, %820, %cst_202 [1] : vector<2x8xf32> to vector<2xf32>
    %822 = vector.shape_cast %821 : vector<2xf32> to vector<2x1xf32>
    %823 = vector.broadcast %822 : vector<2x1xf32> to vector<2x8xf32>
    %824 = arith.cmpf oge, %820, %823 : vector<2x8xf32>
    %c8_i32_203 = arith.constant 8 : i32
    %825 = vector.broadcast %c8_i32_203 : i32 to vector<2x8xi32>
    %826 = arith.select %824, %342, %825 : vector<2x8xi1>, vector<2x8xi32>
    %cst_204 = arith.constant dense<2147483647> : vector<2xi32>
    %827 = vector.multi_reduction <minsi>, %826, %cst_204 [1] : vector<2x8xi32> to vector<2xi32>
    %828 = vector.shape_cast %827 : vector<2xi32> to vector<2x1xi32>
    %cst_205 = arith.constant dense<0.000000e+00> : vector<2xf32>
    %829 = vector.multi_reduction <add>, %2, %cst_205 [1] : vector<2x8xf32> to vector<2xf32>
    %830 = vector.shape_cast %829 : vector<2xf32> to vector<2x1xf32>
    %831 = arith.fptosi %830 : vector<2x1xf32> to vector<2x1xi32>
    %c1_i32 = arith.constant 1 : i32
    %832 = vector.broadcast %c1_i32 : i32 to vector<2x1xi32>
    %833 = arith.subi %831, %832 : vector<2x1xi32>
    %c0_i32 = arith.constant 0 : i32
    %834 = vector.broadcast %c0_i32 : i32 to vector<2x1xi32>
    %c0_i32_206 = arith.constant 0 : i32
    %835 = vector.broadcast %c0_i32_206 : i32 to vector<2x8xi32>
    %c7_i32 = arith.constant 7 : i32
    %836 = vector.broadcast %c7_i32 : i32 to vector<2x1xi32>
    %837 = arith.cmpi eq, %833, %836 : vector<2x1xi32>
    %838 = arith.select %837, %828, %834 : vector<2x1xi1>, vector<2x1xi32>
    %c7_i32_207 = arith.constant 7 : i32
    %839 = vector.broadcast %c7_i32_207 : i32 to vector<2x1xi32>
    %840 = arith.cmpi sge, %833, %839 : vector<2x1xi32>
    %c7_i32_208 = arith.constant 7 : i32
    %841 = vector.broadcast %c7_i32_208 : i32 to vector<2x8xi32>
    %842 = arith.cmpi eq, %343, %841 : vector<2x8xi32>
    %843 = vector.broadcast %840 : vector<2x1xi1> to vector<2x8xi1>
    %844 = arith.andi %843, %842 : vector<2x8xi1>
    %845 = vector.shape_cast %838 : vector<2x1xi32> to vector<2x1xi32>
    %846 = vector.broadcast %845 : vector<2x1xi32> to vector<2x8xi32>
    %847 = arith.select %844, %846, %835 : vector<2x8xi1>, vector<2x8xi32>
    %848 = vector.broadcast %838 : vector<2x1xi32> to vector<2x8xi32>
    %849 = arith.cmpi eq, %342, %848 : vector<2x8xi32>
    %c0_i32_209 = arith.constant 0 : i32
    %850 = vector.broadcast %c0_i32_209 : i32 to vector<2x8xi32>
    %851 = arith.select %849, %789, %850 : vector<2x8xi1>, vector<2x8xi32>
    %cst_210 = arith.constant dense<0> : vector<2xi32>
    %852 = vector.multi_reduction <add>, %851, %cst_210 [1] : vector<2x8xi32> to vector<2xi32>
    %853 = vector.shape_cast %852 : vector<2xi32> to vector<2x1xi32>
    %854 = arith.select %840, %853, %838 : vector<2x1xi1>, vector<2x1xi32>
    %c6_i32 = arith.constant 6 : i32
    %855 = vector.broadcast %c6_i32 : i32 to vector<2x1xi32>
    %856 = arith.cmpi eq, %833, %855 : vector<2x1xi32>
    %857 = arith.select %856, %828, %854 : vector<2x1xi1>, vector<2x1xi32>
    %c6_i32_211 = arith.constant 6 : i32
    %858 = vector.broadcast %c6_i32_211 : i32 to vector<2x1xi32>
    %859 = arith.cmpi sge, %833, %858 : vector<2x1xi32>
    %c6_i32_212 = arith.constant 6 : i32
    %860 = vector.broadcast %c6_i32_212 : i32 to vector<2x8xi32>
    %861 = arith.cmpi eq, %343, %860 : vector<2x8xi32>
    %862 = vector.broadcast %859 : vector<2x1xi1> to vector<2x8xi1>
    %863 = arith.andi %862, %861 : vector<2x8xi1>
    %864 = vector.shape_cast %857 : vector<2x1xi32> to vector<2x1xi32>
    %865 = vector.broadcast %864 : vector<2x1xi32> to vector<2x8xi32>
    %866 = arith.select %863, %865, %847 : vector<2x8xi1>, vector<2x8xi32>
    %867 = vector.broadcast %857 : vector<2x1xi32> to vector<2x8xi32>
    %868 = arith.cmpi eq, %342, %867 : vector<2x8xi32>
    %c0_i32_213 = arith.constant 0 : i32
    %869 = vector.broadcast %c0_i32_213 : i32 to vector<2x8xi32>
    %870 = arith.select %868, %726, %869 : vector<2x8xi1>, vector<2x8xi32>
    %cst_214 = arith.constant dense<0> : vector<2xi32>
    %871 = vector.multi_reduction <add>, %870, %cst_214 [1] : vector<2x8xi32> to vector<2xi32>
    %872 = vector.shape_cast %871 : vector<2xi32> to vector<2x1xi32>
    %873 = arith.select %859, %872, %857 : vector<2x1xi1>, vector<2x1xi32>
    %c5_i32 = arith.constant 5 : i32
    %874 = vector.broadcast %c5_i32 : i32 to vector<2x1xi32>
    %875 = arith.cmpi eq, %833, %874 : vector<2x1xi32>
    %876 = arith.select %875, %828, %873 : vector<2x1xi1>, vector<2x1xi32>
    %c5_i32_215 = arith.constant 5 : i32
    %877 = vector.broadcast %c5_i32_215 : i32 to vector<2x1xi32>
    %878 = arith.cmpi sge, %833, %877 : vector<2x1xi32>
    %c5_i32_216 = arith.constant 5 : i32
    %879 = vector.broadcast %c5_i32_216 : i32 to vector<2x8xi32>
    %880 = arith.cmpi eq, %343, %879 : vector<2x8xi32>
    %881 = vector.broadcast %878 : vector<2x1xi1> to vector<2x8xi1>
    %882 = arith.andi %881, %880 : vector<2x8xi1>
    %883 = vector.shape_cast %876 : vector<2x1xi32> to vector<2x1xi32>
    %884 = vector.broadcast %883 : vector<2x1xi32> to vector<2x8xi32>
    %885 = arith.select %882, %884, %866 : vector<2x8xi1>, vector<2x8xi32>
    %886 = vector.broadcast %876 : vector<2x1xi32> to vector<2x8xi32>
    %887 = arith.cmpi eq, %342, %886 : vector<2x8xi32>
    %c0_i32_217 = arith.constant 0 : i32
    %888 = vector.broadcast %c0_i32_217 : i32 to vector<2x8xi32>
    %889 = arith.select %887, %663, %888 : vector<2x8xi1>, vector<2x8xi32>
    %cst_218 = arith.constant dense<0> : vector<2xi32>
    %890 = vector.multi_reduction <add>, %889, %cst_218 [1] : vector<2x8xi32> to vector<2xi32>
    %891 = vector.shape_cast %890 : vector<2xi32> to vector<2x1xi32>
    %892 = arith.select %878, %891, %876 : vector<2x1xi1>, vector<2x1xi32>
    %c4_i32 = arith.constant 4 : i32
    %893 = vector.broadcast %c4_i32 : i32 to vector<2x1xi32>
    %894 = arith.cmpi eq, %833, %893 : vector<2x1xi32>
    %895 = arith.select %894, %828, %892 : vector<2x1xi1>, vector<2x1xi32>
    %c4_i32_219 = arith.constant 4 : i32
    %896 = vector.broadcast %c4_i32_219 : i32 to vector<2x1xi32>
    %897 = arith.cmpi sge, %833, %896 : vector<2x1xi32>
    %c4_i32_220 = arith.constant 4 : i32
    %898 = vector.broadcast %c4_i32_220 : i32 to vector<2x8xi32>
    %899 = arith.cmpi eq, %343, %898 : vector<2x8xi32>
    %900 = vector.broadcast %897 : vector<2x1xi1> to vector<2x8xi1>
    %901 = arith.andi %900, %899 : vector<2x8xi1>
    %902 = vector.shape_cast %895 : vector<2x1xi32> to vector<2x1xi32>
    %903 = vector.broadcast %902 : vector<2x1xi32> to vector<2x8xi32>
    %904 = arith.select %901, %903, %885 : vector<2x8xi1>, vector<2x8xi32>
    %905 = vector.broadcast %895 : vector<2x1xi32> to vector<2x8xi32>
    %906 = arith.cmpi eq, %342, %905 : vector<2x8xi32>
    %c0_i32_221 = arith.constant 0 : i32
    %907 = vector.broadcast %c0_i32_221 : i32 to vector<2x8xi32>
    %908 = arith.select %906, %600, %907 : vector<2x8xi1>, vector<2x8xi32>
    %cst_222 = arith.constant dense<0> : vector<2xi32>
    %909 = vector.multi_reduction <add>, %908, %cst_222 [1] : vector<2x8xi32> to vector<2xi32>
    %910 = vector.shape_cast %909 : vector<2xi32> to vector<2x1xi32>
    %911 = arith.select %897, %910, %895 : vector<2x1xi1>, vector<2x1xi32>
    %c3_i32 = arith.constant 3 : i32
    %912 = vector.broadcast %c3_i32 : i32 to vector<2x1xi32>
    %913 = arith.cmpi eq, %833, %912 : vector<2x1xi32>
    %914 = arith.select %913, %828, %911 : vector<2x1xi1>, vector<2x1xi32>
    %c3_i32_223 = arith.constant 3 : i32
    %915 = vector.broadcast %c3_i32_223 : i32 to vector<2x1xi32>
    %916 = arith.cmpi sge, %833, %915 : vector<2x1xi32>
    %c3_i32_224 = arith.constant 3 : i32
    %917 = vector.broadcast %c3_i32_224 : i32 to vector<2x8xi32>
    %918 = arith.cmpi eq, %343, %917 : vector<2x8xi32>
    %919 = vector.broadcast %916 : vector<2x1xi1> to vector<2x8xi1>
    %920 = arith.andi %919, %918 : vector<2x8xi1>
    %921 = vector.shape_cast %914 : vector<2x1xi32> to vector<2x1xi32>
    %922 = vector.broadcast %921 : vector<2x1xi32> to vector<2x8xi32>
    %923 = arith.select %920, %922, %904 : vector<2x8xi1>, vector<2x8xi32>
    %924 = vector.broadcast %914 : vector<2x1xi32> to vector<2x8xi32>
    %925 = arith.cmpi eq, %342, %924 : vector<2x8xi32>
    %c0_i32_225 = arith.constant 0 : i32
    %926 = vector.broadcast %c0_i32_225 : i32 to vector<2x8xi32>
    %927 = arith.select %925, %537, %926 : vector<2x8xi1>, vector<2x8xi32>
    %cst_226 = arith.constant dense<0> : vector<2xi32>
    %928 = vector.multi_reduction <add>, %927, %cst_226 [1] : vector<2x8xi32> to vector<2xi32>
    %929 = vector.shape_cast %928 : vector<2xi32> to vector<2x1xi32>
    %930 = arith.select %916, %929, %914 : vector<2x1xi1>, vector<2x1xi32>
    %c2_i32 = arith.constant 2 : i32
    %931 = vector.broadcast %c2_i32 : i32 to vector<2x1xi32>
    %932 = arith.cmpi eq, %833, %931 : vector<2x1xi32>
    %933 = arith.select %932, %828, %930 : vector<2x1xi1>, vector<2x1xi32>
    %c2_i32_227 = arith.constant 2 : i32
    %934 = vector.broadcast %c2_i32_227 : i32 to vector<2x1xi32>
    %935 = arith.cmpi sge, %833, %934 : vector<2x1xi32>
    %c2_i32_228 = arith.constant 2 : i32
    %936 = vector.broadcast %c2_i32_228 : i32 to vector<2x8xi32>
    %937 = arith.cmpi eq, %343, %936 : vector<2x8xi32>
    %938 = vector.broadcast %935 : vector<2x1xi1> to vector<2x8xi1>
    %939 = arith.andi %938, %937 : vector<2x8xi1>
    %940 = vector.shape_cast %933 : vector<2x1xi32> to vector<2x1xi32>
    %941 = vector.broadcast %940 : vector<2x1xi32> to vector<2x8xi32>
    %942 = arith.select %939, %941, %923 : vector<2x8xi1>, vector<2x8xi32>
    %943 = vector.broadcast %933 : vector<2x1xi32> to vector<2x8xi32>
    %944 = arith.cmpi eq, %342, %943 : vector<2x8xi32>
    %c0_i32_229 = arith.constant 0 : i32
    %945 = vector.broadcast %c0_i32_229 : i32 to vector<2x8xi32>
    %946 = arith.select %944, %474, %945 : vector<2x8xi1>, vector<2x8xi32>
    %cst_230 = arith.constant dense<0> : vector<2xi32>
    %947 = vector.multi_reduction <add>, %946, %cst_230 [1] : vector<2x8xi32> to vector<2xi32>
    %948 = vector.shape_cast %947 : vector<2xi32> to vector<2x1xi32>
    %949 = arith.select %935, %948, %933 : vector<2x1xi1>, vector<2x1xi32>
    %c1_i32_231 = arith.constant 1 : i32
    %950 = vector.broadcast %c1_i32_231 : i32 to vector<2x1xi32>
    %951 = arith.cmpi eq, %833, %950 : vector<2x1xi32>
    %952 = arith.select %951, %828, %949 : vector<2x1xi1>, vector<2x1xi32>
    %c1_i32_232 = arith.constant 1 : i32
    %953 = vector.broadcast %c1_i32_232 : i32 to vector<2x1xi32>
    %954 = arith.cmpi sge, %833, %953 : vector<2x1xi32>
    %c1_i32_233 = arith.constant 1 : i32
    %955 = vector.broadcast %c1_i32_233 : i32 to vector<2x8xi32>
    %956 = arith.cmpi eq, %343, %955 : vector<2x8xi32>
    %957 = vector.broadcast %954 : vector<2x1xi1> to vector<2x8xi1>
    %958 = arith.andi %957, %956 : vector<2x8xi1>
    %959 = vector.shape_cast %952 : vector<2x1xi32> to vector<2x1xi32>
    %960 = vector.broadcast %959 : vector<2x1xi32> to vector<2x8xi32>
    %961 = arith.select %958, %960, %942 : vector<2x8xi1>, vector<2x8xi32>
    %962 = vector.broadcast %952 : vector<2x1xi32> to vector<2x8xi32>
    %963 = arith.cmpi eq, %342, %962 : vector<2x8xi32>
    %c0_i32_234 = arith.constant 0 : i32
    %964 = vector.broadcast %c0_i32_234 : i32 to vector<2x8xi32>
    %965 = arith.select %963, %411, %964 : vector<2x8xi1>, vector<2x8xi32>
    %cst_235 = arith.constant dense<0> : vector<2xi32>
    %966 = vector.multi_reduction <add>, %965, %cst_235 [1] : vector<2x8xi32> to vector<2xi32>
    %967 = vector.shape_cast %966 : vector<2xi32> to vector<2x1xi32>
    %968 = arith.select %954, %967, %952 : vector<2x1xi1>, vector<2x1xi32>
    %c0_i32_236 = arith.constant 0 : i32
    %969 = vector.broadcast %c0_i32_236 : i32 to vector<2x1xi32>
    %970 = arith.cmpi eq, %833, %969 : vector<2x1xi32>
    %971 = arith.select %970, %828, %968 : vector<2x1xi1>, vector<2x1xi32>
    %c0_i32_237 = arith.constant 0 : i32
    %972 = vector.broadcast %c0_i32_237 : i32 to vector<2x1xi32>
    %973 = arith.cmpi sge, %833, %972 : vector<2x1xi32>
    %c0_i32_238 = arith.constant 0 : i32
    %974 = vector.broadcast %c0_i32_238 : i32 to vector<2x8xi32>
    %975 = arith.cmpi eq, %343, %974 : vector<2x8xi32>
    %976 = vector.broadcast %973 : vector<2x1xi1> to vector<2x8xi1>
    %977 = arith.andi %976, %975 : vector<2x8xi1>
    %978 = vector.shape_cast %971 : vector<2x1xi32> to vector<2x1xi32>
    %979 = vector.broadcast %978 : vector<2x1xi32> to vector<2x8xi32>
    %980 = arith.select %977, %979, %961 : vector<2x8xi1>, vector<2x8xi32>
    %cst_239 = arith.constant 0.000000e+00 : f32
    %981 = vector.broadcast %cst_239 : f32 to vector<2x3xf32>
    %982 = arith.sitofp %980 : vector<2x8xi32> to vector<2x8xf32>
    %cst_240 = arith.constant 0.000000e+00 : f32
    %983 = vector.broadcast %cst_240 : f32 to vector<2x112xf32>
    %984 = tpu.concatenate %325, %818, %981, %982, %983 in 1 : vector<2x4xf32>, vector<2x1xf32>, vector<2x3xf32>, vector<2x8xf32>, vector<2x112xf32> -> vector<2x128xf32>
    %cst_241 = arith.constant 0.000000e+00 : f32
    %985 = vector.broadcast %cst_241 : f32 to vector<6x128xf32>
    %986 = tpu.concatenate %984, %985 in 0 : vector<2x128xf32>, vector<6x128xf32> -> vector<8x128xf32>
    %c0_242 = arith.constant 0 : index
    %c0_243 = arith.constant 0 : index
    %987 = vector.load %arg8[%c0_242, %c0_243] : memref<8x128xf32, #tpu.memory_space<vmem>>, vector<8x128xf32>
    tpu.vector_store %arg8[%c0_242, %c0_243], %986 {strides = array<i32>} : memref<8x128xf32, #tpu.memory_space<vmem>>, vector<8x128xf32>,
    return
  }
}

</mosaic_0001>

<bundles_post_ra>
// kernel: bert_crf_forward.1
= control target key start
LH: loop header
LB: loop body
LE: loop exit
PB: predicated region body
PF: predicated region fallthrough
CT: control target
= control target key end

     0   :  { %v33_v0 = vlaneseq  ;;  %vm7778_vm0 = vcmask 1041408   ;;  %v7768_v21 = vmov 0.0   ;;  %s6048_s25 = smov 64   ;;  %vm83_vm5 = vcmask 523264   ;;  %s6049_s12 = smov 96   ;;  %s7758_s1 = inlined_call_operand.vmem [shape: s32[2,8], index: 1, kind: input, shape index: {}]   ;;  %s7759_s0 = inlined_call_operand.vmem [shape: s32[2,8], index: 0, kind: input, shape index: {}]   ;;  %s7760_s5 = inlined_call_operand.vmem [shape: f32[202,32], index: 5, kind: input, shape index: {}]   ;;  %s7761_s4 = inlined_call_operand.vmem [shape: f32[32,460], index: 4, kind: input, shape index: {}]   ;;  %s7762_s6 = inlined_call_operand.vmem [shape: f32[1,844], index: 6, kind: input, shape index: {}]   ;;  %s7763_s2 = inlined_call_operand.vmem [shape: f32[2,8], index: 2, kind: input, shape index: {}]   ;;  %s7764_s7 = inlined_call_operand.vmem [shape: f32[10,8], index: 7, kind: input, shape index: {}]   ;;  %s7765_s3 = inlined_call_operand.vmem [shape: s32[2,8], index: 3, kind: input, shape index: {}]   ;;  %s7766_s8 = inlined_call_operand.vmem [shape: f32[8,128], index: 8, kind: output, shape index: {}]  }
   0x1   :  { %v30_v2 = vld [vmem:[%s7758_s1] sm:$0x3]  ;;  %v93_v7 = vld [vmem:[%s7760_s5 + $0x38] sm:$0xff]  ;;  %v92_v10 = vld [vmem:[%s7760_s5 + $0x30] sm:$0xff]  ;;  %vm96_vm6 = vcmask 539648   ;;  %vm183_vm7 = vcmask 261120  }
   0x2   :  { %v6122_v1 = vshrl.u32 %v33_v0, 7  ;;  %v29_v3 = vld [vmem:[%s7759_s0] sm:$0x3]  ;;  %v91_v13 = vld [vmem:[%s7760_s5 + $0x28] sm:$0xff]  ;;  %v89_v15 = vld [vmem:[%s7760_s5 + $0x18] sm:$0xff]  ;;  %v6169_v19 = vand.u32 127, %v33_v0 }
   0x3   :  { %v94_v6 = vld [vmem:[%s7760_s5 + $0x40] sm:$0x3]  ;;  %v88_v16 = vld [vmem:[%s7760_s5 + $0x10] sm:$0xff]  ;;  %v87_v17 = vld [vmem:[%s7760_s5 + $0x8] sm:$0xff]  ;;  %vm6050_vm8 = vmmov 0   ;;  %vm7779_vm9 = vcmask 130048  }
   0x4   :  { %v6131_v4 = vsub.s32 0, %v6122_v1  ;;  %v6134_v5 = vsub.s32 1, %v6122_v1  ;;  %5582 = vmatprep.subr.msk.mxu0 %vm7778_vm0, %v94_v6  ;;  %v90_v14 = vld [vmem:[%s7760_s5 + $0x20] sm:$0xff]  ;;  %vm519_vm10 = vcmask 64512   ;;  %s6052_s19 = smov 80   ;;  %s6053_s20 = smov 112  }
   0x5   :  { %5583 = vmatpush3.msk.msra.mxu0 %vm7778_vm0, %v94_v6  ;;  %v86_v18 = vld [vmem:[%s7760_s5] sm:$0xff]  ;;  %s6054_s21 = smov 48   ;;  %s6055_s22 = smov 32   ;;  %vm2653_vm11 = vcmask 1041409  }
   0x6   :  { %v58_v8 = vrot.slane %v30_v2, %v6131_v4  ;;  %v38_v9 = vrot.slane %v29_v3, %v6131_v4  ;;  %5584 = vmatprep.subr.mxu0 %v93_v7  ;;  %v65_v11 = vrot.slane %v30_v2, %v6134_v5  ;;  %v45_v12 = vrot.slane %v29_v3, %v6134_v5  ;;  %v95_v35 = vld [vmem:[%s7760_s5 + $0x42] sm:$0xff]  ;;  %v5375_v54 = vld [vmem:[%s7762_s6] ss:$0 sm:$0xff]  ;;  %s6056_s26 = smov 16   ;;  %s6058_s11 = smov 60  }
   0x7   :  { %5585 = vmatpush3.msra.mxu0 %v93_v7  ;;  %v6193_v52 = vld [vmem:[%s7761_s4 + $0x60] sm:$0xff]  ;;  %s6067_s27 = smov 1   ;;  %s6071_s9 = smov 123  }
   0x8   :  { %60 = vbcast.lane.b32.xlu0 %v58_v8, 256  ;;  %40 = vbcast.lane.b32.xlu1 %v38_v9, 256  ;;  %v6198_v53 = vld [vmem:[%s7761_s4 + $0x40] sm:$0xff]  ;;  %s6072_s10 = smov 125   ;;  %s6075_s0 = smov 8  }
   0x9   :  { %5586 = vmatprep.subr.mxu0 %v92_v10  ;;  %5603 = vmatprep.subr.mxu1 %v6193_v52  ;;  %v6211_v55 = vld [vmem:[%s7761_s4 + $0x20] sm:$0xff] }
   0xa   :  { %5587 = vmatpush3.msra.mxu0 %v92_v10  ;;  %5604 = vmatpush3.msra.mxu1 %v6193_v52  ;;  %v6216_v56 = vld [vmem:[%s7761_s4] sm:$0xff] }
   0xb   :  { %5588 = vmatprep.subr.mxu0 %v91_v13  ;;  %5605 = vmatprep.subr.mxu1 %v6198_v53  ;;  %v253_v57 = vld [vmem:[%s7762_s6] sm:$0x3] }
   0xc   :  { %67 = vbcast.lane.b32.xlu0 %v65_v11, 256  ;;  %47 = vbcast.lane.b32.xlu1 %v45_v12, 256  ;;  %v258_v58 = vrot.slane %v253_v57, %v6131_v4  ;;  %v262_v59 = vrot.slane %v253_v57, %v6134_v5 }
   0xd   :  { %5589 = vmatpush3.msra.mxu0 %v91_v13  ;;  %5606 = vmatpush3.msra.mxu1 %v6198_v53 }
   0xe   :  { %5590 = vmatprep.subr.mxu0 %v90_v14  ;;  %5607 = vmatprep.subr.mxu1 %v6211_v55 }
   0xf   :  { %5591 = vmatpush3.msra.mxu0 %v90_v14  ;;  %5608 = vmatpush3.msra.mxu1 %v6211_v55 }
  0x10   :  { %5592 = vmatprep.subr.mxu0 %v89_v15  ;;  %5609 = vmatprep.subr.mxu1 %v6216_v56 }
  0x11   :  { %5593 = vmatpush3.msra.mxu0 %v89_v15  ;;  %5610 = vmatpush3.msra.mxu1 %v6216_v56 }
  0x12   :  { %5594 = vmatprep.subr.mxu0 %v88_v16  ;;  %5614 = vmatprep.subr.mxu1 %v7768_v21 }
  0x13   :  { %5595 = vmatpush3.msra.mxu0 %v88_v16 }
  0x14   :  { %5596 = vmatprep.subr.mxu0 %v87_v17 }
  0x15   :  { %5597 = vmatpush3.msra.mxu0 %v87_v17 }
  0x16   :  { %5598 = vmatprep.subr.mxu0 %v86_v18 }
  0x17   :  { %5599 = vmatpush3.msra.mxu0 %v86_v18 }
  0x18   :  { %5629 = vmatprep.subr.mxu0 %v7768_v21 }
  0x7a   :  { %v61_v20 = vpop.permute.xlu0 %60  ;;  %v41_v26 = vpop.permute.xlu1 %40 }
  0x7b   :  { %vm69_vm1 = vcmp.eq.s32.totalorder %v6169_v19, %v61_v20  ;;  %vm49_vm4 = vcmp.eq.s32.totalorder %v6169_v19, %v41_v26 }
  0x7c   :  { %v5370_v23 = vsel %vm69_vm1, 1.0, %v7768_v21  ;;  %v5368_v32 = vsel %vm49_vm4, 1.0, %v7768_v21 }
  0x7e   :  { %v68_v22 = vpop.permute.xlu0 %67  ;;  %v48_v27 = vpop.permute.xlu1 %47 }
  0x7f   :  { %vm70_vm2 = vcmp.eq.s32.totalorder %v6169_v19, %v68_v22  ;;  %vm50_vm3 = vcmp.eq.s32.totalorder %v6169_v19, %v48_v27  ;;  %v31_v27 = vld [vmem:[%s7763_s2] sm:$0x3] }
  0x80   :  { %v5371_v24 = vsel %vm70_vm2, 1.0, %v7768_v21  ;;  %v5369_v29 = vsel %vm50_vm3, 1.0, %v7768_v21 }
  0x81   :  { %v5898_v25 = vpack.i.bf16 %v5371_v24, %v5370_v23 }
  0x83   :  { %5899 = vrot.lane.b32.xlu0 %v5898_v25, %s6048_s25  ;;  %v6051_v25 = vmov 1966171168  }
  0x84   :  { %v228_v26 = vunpack.c.l.s4 %v6051_v25 }
  0xf5   :  { %v5900_v28 = vpop.permute.xlu0 %5899 }
  0xf6   :  { %v5902_v30 = vunpack.i.h.bf16 %v5900_v28  ;;  %v5901_v31 = vunpack.i.l.bf16 %v5900_v28  ;;  %v229_v28 = vunpack.c.0.s8 %v228_v26 }
  0xf8   :  { %v84_v33 = vsel %vm83_vm5, %v5368_v32, %v5901_v31  ;;  %v85_v34 = vsel %vm83_vm5, %v5369_v29, %v5902_v30  ;;  %v224_v29 = vsub.f32 1.0, %v31_v27  ;;  %v6267_v30 = vsub.s32 %v229_v28, %v6122_v1 }
  0xf9   :  { %5600 = vmatprep.mubr.msk.f32.mxu0 %vm96_vm6, %v84_v33 }
  0xfa   :  { %5601 = vmatmul.mubr.msk.f32.vlgmr.msra.gmra.mxu0 %vm96_vm6, %v85_v34  ;;  %v225_v31 = vmul.f32 -1e+09, %v224_v29 }
  0xfb   :  { %5631 = vmatprep.mubr.msk.f32.mxu0 %vm6050_vm8, %v7768_v21 }
  0xfc   :  { %v233_v32 = vrot.slane %v225_v31, %v6267_v30 }
  0xfe   :  { %v241_v33 = vrot.slane %v233_v32, %v6267_v30  ;;  %v234_v34 = vcombine.high %v233_v32, %v233_v32 }
 0x1ba   :  { %v5602_v36 = vpop.f32.mrf.mxu0 }
 0x1bb   :  { %v179_v37 = vadd.f32 %v5602_v36, %v95_v35  ;;  %v248_v36 = vrot.slane %v234_v34, %v6267_v30 }
 0x1bc   :  { %v173_v38 = vpop.f32.mrf.mxu0 }
 0x1bd   :  { %v174_v39 = vadd.f32 %v173_v38, %v95_v35  ;;  %v187_v40 = vsel %vm183_vm7, %v179_v37, 0.0  ;;  %v6272_v35 = vrot.slane %v241_v33, %v6131_v4 }
 0x1be   :  { %188 = vadd.xlane.f32.xlu0 %v187_v40 }
 0x1bf   :  { %v184_v41 = vsel %vm183_vm7, %v174_v39, 0.0 }
 0x1c0   :  { %185 = vadd.xlane.f32.xlu1 %v184_v41  ;;  %v6277_v41 = vrot.slane %v248_v36, %v6131_v4 }
 0x247   :  { %v189_v42 = vpop.xlane.xlu0 %188 }
 0x248   :  { %v192_v43 = vmul.f32 0.03125, %v189_v42 }
 0x249   :  { %v186_v44 = vpop.xlane.xlu1 %185 }
 0x24a   :  { %v194_v45 = vsub.f32 %v179_v37, %v192_v43  ;;  %v191_v46 = vmul.f32 0.03125, %v186_v44 }
 0x24c   :  { %v193_v47 = vsub.f32 %v174_v39, %v191_v46  ;;  %v196_v48 = vmul.f32 %v194_v45, %v194_v45 }
 0x24e   :  { %v200_v49 = vsel %vm183_vm7, %v196_v48, 0.0  ;;  %v195_v50 = vmul.f32 %v193_v47, %v193_v47 }
 0x24f   :  { %201 = vadd.xlane.f32.xlu1 %v200_v49 }
 0x250   :  { %v197_v51 = vsel %vm183_vm7, %v195_v50, 0.0 }
 0x251   :  { %198 = vadd.xlane.f32.xlu0 %v197_v51 }
 0x260   :  { %263 = vrot.lane.b32.xlu1 %v258_v58, %s6048_s25 }
 0x264   :  { %265 = vrot.lane.b32.xlu1 %v262_v59, %s6048_s25 }
 0x267   :  { %219 = vrot.lane.b32.xlu0 %v5375_v54, %s6049_s12 }
 0x2d8   :  { %v202_v60 = vpop.xlane.xlu1 %201 }
 0x2d9   :  { %v204_v61 = vmul.f32 0.03125, %v202_v60 }
 0x2da   :  { %v199_v62 = vpop.xlane.xlu0 %198 }
 0x2db   :  { %v206_v63 = vadd.f32 1e-12, %v204_v61  ;;  %v203_v0 = vmul.f32 0.03125, %v199_v62 }
 0x2dc   :  { %v264_v14 = vpop.permute.xlu1 %263 }
 0x2dd   :  { %5919 = vrsqrt.f32 %v206_v63  ;;  %v205_v2 = vadd.f32 1e-12, %v203_v0 }
 0x2de   :  { %v220_v10 = vpop.permute.xlu0 %219 }
 0x2df   :  { %5921 = vrsqrt.f32 %v205_v2 }
 0x2e0   :  { %v266_v15 = vpop.permute.xlu1 %265 }
 0x2e1   :  { %v267_v16 = vsel %vm83_vm5, %v264_v14, %v266_v15 }
 0x2ea   :  { %v5920_v3 = vpop.eup %5919 }
 0x2eb   :  { %v210_v6 = vmul.f32 %v5920_v3, %v194_v45 }
 0x2ec   :  { %v5922_v7 = vpop.eup %5921 }
 0x2ed   :  { %v209_v8 = vmul.f32 %v5922_v7, %v193_v47  ;;  %v218_v9 = vmul.f32 %v5375_v54, %v210_v6 }
 0x2ef   :  { %v217_v11 = vmul.f32 %v5375_v54, %v209_v8  ;;  %v6232_v13 = vadd.f32 %v220_v10, %v218_v9 }
 0x2f1   :  { %v6230_v12 = vadd.f32 %v220_v10, %v217_v11 }
 0x2f3   :  { %5611 = vmatprep.mubr.msk.f32.mxu1 %vm183_vm7, %v6230_v12 }
 0x2f4   :  { %5612 = vmatmul.mubr.msk.f32.vlgmr.msra.gmra.mxu1 %vm183_vm7, %v6232_v13 }
 0x2f5   :  { %5616 = vmatprep.mubr.msk.f32.mxu1 %vm6050_vm8, %v7768_v21 }
 0x3b4   :  { %v5613_v17 = vpop.f32.mrf.mxu1 }
 0x3b5   :  { %v6243_v18 = vadd.f32 %v5613_v17, %v267_v16 }
 0x3b6   :  { %v341_v20 = vpop.f32.mrf.mxu1 }
 0x3b7   :  { %v6245_v22 = vadd.f32 %v341_v20, %v267_v16  ;;  %429 = vrot.lane.b32.xlu1 %v6243_v18, %s6049_s12 }
 0x3b9   :  { %351 = vrot.lane.b32.xlu0 %v6245_v22, %s6049_s12 }
 0x429   :  { %v430_v24 = vpop.permute.xlu1 %429 }
 0x42b   :  { %v352_v23 = vpop.permute.xlu0 %351 }
 0x42c   :  { %5615 = vmatpush3.xpose.msk.msra.mxu1 %vm7779_vm9, %v352_v23 }
 0x42d   :  { %5619 = vmatprep.subr.mxu1 %v7768_v21 }
 0x42f   :  { %5617 = vmatmul.mubr.msk.f32.vlgmr.msra.gmra.mxu1 %vm7779_vm9, %v6245_v22 }
 0x430   :  { %5620 = vmatpush3.xpose.msk.msra.mxu1 %vm7779_vm9, %v430_v24  ;;  %5621 = vmatprep.mubr.msk.f32.mxu1 %vm6050_vm8, %v7768_v21 }
 0x431   :  { %5624 = vmatprep.subr.mxu1 %v7768_v21 }
 0x433   :  { %5622 = vmatmul.mubr.msk.f32.vlgmr.msra.gmra.mxu1 %vm7779_vm9, %v6243_v18 }
 0x434   :  { %5626 = vmatprep.mubr.msk.f32.mxu1 %vm6050_vm8, %v7768_v21 }
 0x4ef   :  { %v424_v37 = vpop.f32.mrf.mxu1 }
 0x4f0   :  { %v505_v38 = vmul.f32 0.25, %v424_v37 }
 0x4f1   :  { %v5618_v39 = vpop.f32.mrf.mxu1 }
 0x4f2   :  { %v517_v40 = vadd.f32 %v6272_v35, %v505_v38 }
 0x4f3   :  { %v501_v42 = vpop.f32.mrf.mxu1 }
 0x4f4   :  { %v506_v43 = vmul.f32 0.25, %v501_v42  ;;  %v520_v44 = vsel %vm519_vm10, %v517_v40, -inf }
 0x4f5   :  { %521 = vmax.xlane.f32.xlu0 %v520_v44  ;;  %v5623_v45 = vpop.f32.mrf.mxu1 }
 0x4f6   :  { %v518_v46 = vadd.f32 %v6277_v41, %v506_v43 }
 0x4f8   :  { %v523_v47 = vsel %vm519_vm10, %v518_v46, -inf }
 0x4f9   :  { %524 = vmax.xlane.f32.xlu1 %v523_v47 }
 0x50a   :  { %542 = vrot.lane.b32.xlu1 %v6245_v22, %s6048_s25 }
 0x50b   :  { %618 = vrot.lane.b32.xlu0 %v6243_v18, %s6048_s25 }
 0x50e   :  { %696 = vrot.lane.b32.xlu1 %v6245_v22, %s6052_s19 }
 0x512   :  { %774 = vrot.lane.b32.xlu1 %v6243_v18, %s6052_s19 }
 0x516   :  { %772 = vrot.lane.b32.xlu1 %v6243_v18, %s6053_s20 }
 0x57e   :  { %v522_v48 = vpop.xlane.xlu0 %521 }
 0x57f   :  { %v526_v49 = vsub.f32 %v517_v40, %v522_v48 }
 0x581   :  { %v528_v50 = vmul.f32 1.442695, %v526_v49 }
 0x582   :  { %v619_v51 = vpop.permute.xlu0 %618  ;;  %v525_v54 = vpop.xlane.xlu1 %524 }
 0x583   :  { %5923 = vpow2.f32 %v528_v50  ;;  %v527_v57 = vsub.f32 %v518_v46, %v525_v54  ;;  %5630 = vmatpush3.msra.mxu0 %v619_v51  ;;  %v5390_v54 = vld [vmem:[%s7762_s6 + $0x1] ss:$0 sm:$0xff] }
 0x584   :  { %5639 = vmatprep.subr.mxu0 %v7768_v21 }
 0x585   :  { %v530_v58 = vmul.f32 1.442695, %v527_v57 }
 0x586   :  { %v543_v59 = vpop.permute.xlu1 %542 }
 0x587   :  { %5925 = vpow2.f32 %v530_v58  ;;  %5625 = vmatpush3.msra.mxu1 %v543_v59 }
 0x588   :  { %5634 = vmatprep.subr.mxu1 %v7768_v21 }
 0x58a   :  { %v697_v3 = vpop.permute.xlu1 %696 }
 0x58e   :  { %v775_v9 = vpop.permute.xlu1 %774 }
 0x590   :  { %v5924_v60 = vpop.eup %5923 }
 0x591   :  { %v532_v61 = vsel %vm519_vm10, %v5924_v60, 0.0 }
 0x592   :  { %533 = vadd.xlane.f32.xlu0 %v532_v61  ;;  %v773_v14 = vpop.permute.xlu1 %772 }
 0x594   :  { %v5926_v62 = vpop.eup %5925 }
 0x595   :  { %v535_v63 = vsel %vm519_vm10, %v5926_v62, 0.0 }
 0x596   :  { %536 = vadd.xlane.f32.xlu0 %v535_v63 }
 0x5ac   :  { %694 = vrot.lane.b32.xlu0 %v6245_v22, %s6053_s20 }
 0x61b   :  { %v534_v0 = vpop.xlane.xlu0 %533 }
 0x61c   :  { %5927 = vrcp.f32 %v534_v0 }
 0x61f   :  { %v537_v2 = vpop.xlane.xlu0 %536 }
 0x620   :  { %5929 = vrcp.f32 %v537_v2 }
 0x623   :  { %v695_v11 = vpop.permute.xlu0 %694 }
 0x629   :  { %v5928_v6 = vpop.eup %5927 }
 0x62a   :  { %v540_v7 = vmul.f32 %v5928_v6, %v5924_v60 }
 0x62c   :  { %5627 = vmatmul.mubr.msk.f32.vlgmr.msra.gmra.mxu1 %vm519_vm10, %v540_v7 }
 0x62d   :  { %v5930_v8 = vpop.eup %5929  ;;  %5635 = vmatpush3.xpose.msk.msra.mxu1 %vm7779_vm9, %v697_v3  ;;  %5636 = vmatprep.mubr.msk.f32.mxu1 %vm6050_vm8, %v7768_v21 }
 0x62e   :  { %v541_v10 = vmul.f32 %v5930_v8, %v5926_v62  ;;  %5644 = vmatprep.subr.mxu1 %v7768_v21 }
 0x630   :  { %5632 = vmatmul.mubr.msk.f32.vlgmr.msra.gmra.mxu0 %vm519_vm10, %v541_v10  ;;  %5637 = vmatmul.mubr.msk.f32.vlgmr.msra.gmra.mxu1 %vm7779_vm9, %v695_v11 }
 0x631   :  { %5640 = vmatpush3.xpose.msk.msra.mxu0 %vm7779_vm9, %v775_v9  ;;  %5641 = vmatprep.mubr.msk.f32.mxu0 %vm6050_vm8, %v7768_v21 }
 0x632   :  { %5649 = vmatprep.subr.mxu0 %v7768_v21  ;;  %5646 = vmatprep.mubr.msk.f32.mxu1 %vm6050_vm8, %v7768_v21 }
 0x634   :  { %5642 = vmatmul.mubr.msk.f32.vlgmr.msra.gmra.mxu0 %vm7779_vm9, %v773_v14 }
 0x635   :  { %5651 = vmatprep.mubr.msk.f32.mxu0 %vm6050_vm8, %v7768_v21 }
 0x6ec   :  { %v6314_v15 = vpop.f32.mrf.mxu1 }
 0x6ee   :  { %v5628_v16 = vpop.f32.mrf.mxu1 }
 0x6f0   :  { %v6316_v17 = vpop.f32.mrf.mxu0  ;;  %v768_v20 = vpop.f32.mrf.mxu1 }
 0x6f1   :  { %v850_v23 = vmul.f32 0.25, %v768_v20 }
 0x6f2   :  { %v5633_v24 = vpop.f32.mrf.mxu0  ;;  %v5638_v25 = vpop.f32.mrf.mxu1 }
 0x6f3   :  { %v852_v26 = vadd.f32 %v850_v23, %v6272_v35 }
 0x6f4   :  { %v846_v27 = vpop.f32.mrf.mxu0 }
 0x6f5   :  { %v851_v28 = vmul.f32 0.25, %v846_v27  ;;  %v854_v29 = vsel %vm519_vm10, %v852_v26, -inf }
 0x6f6   :  { %v5643_v31 = vpop.f32.mrf.mxu0  ;;  %855 = vmax.xlane.f32.xlu0 %v854_v29  ;;  %v6375_v29 = vld [vmem:[%s7761_s4 + $0x28] sm:$0xff] }
 0x6f7   :  { %v853_v32 = vadd.f32 %v851_v28, %v6277_v41  ;;  %v6368_v28 = vld [vmem:[%s7761_s4 + $0x48] sm:$0xff] }
 0x6f8   :  { %v6381_v31 = vld [vmem:[%s7761_s4 + $0x8] sm:$0xff] }
 0x6f9   :  { %v857_v33 = vsel %vm519_vm10, %v853_v32, -inf }
 0x6fa   :  { %858 = vmax.xlane.f32.xlu1 %v857_v33 }
 0x70b   :  { %876 = vrot.lane.b32.xlu1 %v6245_v22, %s6054_s21 }
 0x70f   :  { %1058 = vrot.lane.b32.xlu1 %v6193_v52, %s6055_s22 }
 0x713   :  { %1056 = vrot.lane.b32.xlu1 %v6198_v53, %s6055_s22 }
 0x77f   :  { %v856_v34 = vpop.xlane.xlu0 %855 }
 0x780   :  { %v860_v36 = vsub.f32 %v852_v26, %v856_v34 }
 0x782   :  { %v862_v37 = vmul.f32 1.442695, %v860_v36 }
 0x783   :  { %v859_v38 = vpop.xlane.xlu1 %858 }
 0x784   :  { %5931 = vpow2.f32 %v862_v37  ;;  %v861_v39 = vsub.f32 %v853_v32, %v859_v38 }
 0x786   :  { %v864_v40 = vmul.f32 1.442695, %v861_v39 }
 0x787   :  { %v877_v42 = vpop.permute.xlu1 %876 }
 0x788   :  { %5933 = vpow2.f32 %v864_v40  ;;  %5645 = vmatpush3.msra.mxu1 %v877_v42 }
 0x791   :  { %v5932_v43 = vpop.eup %5931 }
 0x792   :  { %v866_v44 = vsel %vm519_vm10, %v5932_v43, 0.0 }
 0x793   :  { %867 = vadd.xlane.f32.xlu0 %v866_v44 }
 0x795   :  { %v5934_v45 = vpop.eup %5933 }
 0x796   :  { %v869_v46 = vsel %vm519_vm10, %v5934_v45, 0.0 }
 0x797   :  { %870 = vadd.xlane.f32.xlu0 %v869_v46 }
 0x7ad   :  { %952 = vrot.lane.b32.xlu0 %v6243_v18, %s6054_s21 }
 0x7b1   :  { %1054 = vrot.lane.b32.xlu0 %v6211_v55, %s6055_s22  ;;  %v1059_v55 = vpop.permute.xlu1 %1058 }
 0x7b2   :  { %5654 = vmatprep.subr.mxu1 %v1059_v55 }
 0x7b5   :  { %1052 = vrot.lane.b32.xlu0 %v6216_v56, %s6055_s22  ;;  %v1057_v53 = vpop.permute.xlu1 %1056 }
 0x7b9   :  { %1064 = vrot.lane.b32.xlu0 %v5390_v54, %s6049_s12 }
 0x81c   :  { %v868_v22 = vpop.xlane.xlu0 %867 }
 0x81d   :  { %5935 = vrcp.f32 %v868_v22 }
 0x820   :  { %v871_v47 = vpop.xlane.xlu0 %870 }
 0x821   :  { %5937 = vrcp.f32 %v871_v47 }
 0x824   :  { %v953_v48 = vpop.permute.xlu0 %952 }
 0x825   :  { %5650 = vmatpush3.msra.mxu0 %v953_v48 }
 0x828   :  { %v1055_v51 = vpop.permute.xlu0 %1054 }
 0x82a   :  { %v5936_v18 = vpop.eup %5935 }
 0x82b   :  { %v874_v49 = vmul.f32 %v5936_v18, %v5932_v43  ;;  %v6394_v18 = vld [vmem:[%s7762_s6 + $0x2] ss:$0 sm:$0xff] }
 0x82c   :  { %v1053_v56 = vpop.permute.xlu0 %1052 }
 0x82d   :  { %5647 = vmatmul.mubr.msk.f32.vlgmr.msra.gmra.mxu1 %vm519_vm10, %v874_v49  ;;  %v1303_v49 = vld [vmem:[%s7760_s5 + $0x82] sm:$0xff] }
 0x82e   :  { %v5938_v52 = vpop.eup %5937  ;;  %5655 = vmatpush3.msra.mxu1 %v1059_v55  ;;  %v1300_v55 = vld [vmem:[%s7760_s5 + $0x6a] sm:$0xff] }
 0x82f   :  { %v875_v50 = vmul.f32 %v5938_v52, %v5934_v45  ;;  %5656 = vmatprep.subr.mxu1 %v1057_v53  ;;  %v1302_v52 = vld [vmem:[%s7760_s5 + $0x7a] sm:$0xff] }
 0x830   :  { %5657 = vmatpush3.msra.mxu1 %v1057_v53  ;;  %v1065_v2 = vpop.permute.xlu0 %1064  ;;  %v1299_v53 = vld [vmem:[%s7760_s5 + $0x62] sm:$0xff] }
 0x831   :  { %5652 = vmatmul.mubr.msk.f32.vlgmr.msra.gmra.mxu0 %vm519_vm10, %v875_v50  ;;  %5658 = vmatprep.subr.mxu1 %v1055_v51  ;;  %v1301_v50 = vld [vmem:[%s7760_s5 + $0x72] sm:$0xff] }
 0x832   :  { %5659 = vmatpush3.msra.mxu1 %v1055_v51  ;;  %v1298_v51 = vld [vmem:[%s7760_s5 + $0x5a] sm:$0xff] }
 0x833   :  { %5660 = vmatprep.subr.mxu1 %v1053_v56 }
 0x834   :  { %5661 = vmatpush3.msra.mxu1 %v1053_v56  ;;  %v1297_v56 = vld [vmem:[%s7760_s5 + $0x52] sm:$0xff] }
 0x835   :  { %5676 = vmatprep.subr.mxu1 %v1303_v49 }
 0x8ed   :  { %v948_v57 = vpop.f32.mrf.mxu1 }
 0x8ee   :  { %1030 = vrot.lane.b32.xlu1 %v948_v57, %s6056_s26 }
 0x8ef   :  { %v5648_v58 = vpop.f32.mrf.mxu1 }
 0x8f1   :  { %v1024_v59 = vpop.f32.mrf.mxu0 }
 0x8f2   :  { %1032 = vrot.lane.b32.xlu1 %v1024_v59, %s6056_s26 }
 0x8f3   :  { %v5653_v60 = vpop.f32.mrf.mxu0 }
 0x960   :  { %v1031_v61 = vpop.permute.xlu1 %1030 }
 0x961   :  { %v1036_v62 = vsel %vm7779_vm9, %v6314_v15, %v1031_v61 }
 0x962   :  { %5662 = vmatprep.mubr.msk.f32.mxu1 %vm183_vm7, %v1036_v62 }
 0x964   :  { %v1033_v63 = vpop.permute.xlu1 %1032 }
 0x965   :  { %v1037_v0 = vsel %vm7779_vm9, %v6316_v17, %v1033_v63 }
 0x966   :  { %5663 = vmatmul.mubr.msk.f32.vlgmr.msra.gmra.mxu1 %vm183_vm7, %v1037_v0 }
 0x967   :  { %5677 = vmatpush3.msra.mxu1 %v1303_v49  ;;  %v6462_v49 = vld [vmem:[%s7761_s4 + $0x30] sm:$0xff] }
 0x968   :  { %5678 = vmatprep.subr.mxu1 %v1302_v52 }
 0x969   :  { %5679 = vmatpush3.msra.mxu1 %v1302_v52 }
 0x96a   :  { %5680 = vmatprep.subr.mxu1 %v1301_v50 }
 0x96b   :  { %5681 = vmatpush3.msra.mxu1 %v1301_v50  ;;  %v5398_v50 = vld [vmem:[%s7762_s6 + $0x3] ss:$0 sm:$0xff] }
 0x96c   :  { %5682 = vmatprep.subr.mxu1 %v1300_v55 }
 0x96d   :  { %5683 = vmatpush3.msra.mxu1 %v1300_v55  ;;  %v6474_v55 = vld [vmem:[%s7761_s4 + $0x10] sm:$0xff] }
 0x96e   :  { %5684 = vmatprep.subr.mxu1 %v1299_v53 }
 0x96f   :  { %5685 = vmatpush3.msra.mxu1 %v1299_v53 }
 0x970   :  { %5686 = vmatprep.subr.mxu1 %v1298_v51 }
 0x971   :  { %5687 = vmatpush3.msra.mxu1 %v1298_v51 }
 0x972   :  { %5688 = vmatprep.subr.mxu1 %v1297_v56 }
 0x973   :  { %5689 = vmatpush3.msra.mxu1 %v1297_v56 }
 0xa26   :  { %v5664_v3 = vpop.f32.mrf.mxu1 }
 0xa27   :  { %v1145_v6 = vadd.f32 %v5664_v3, %v1065_v2 }
 0xa28   :  { %v1139_v7 = vpop.f32.mrf.mxu1 }
 0xa29   :  { %v1140_v8 = vadd.f32 %v1139_v7, %v1065_v2  ;;  %v1149_v9 = vadd.f32 %v1145_v6, %v6232_v13 }
 0xa2b   :  { %v1153_v10 = vsel %vm183_vm7, %v1149_v9, 0.0  ;;  %v1148_v11 = vadd.f32 %v1140_v8, %v6230_v12  ;;  %v6359_v12 = vld [vmem:[%s7761_s4 + $0x68] sm:$0xff] }
 0xa2c   :  { %1154 = vadd.xlane.f32.xlu0 %v1153_v10  ;;  %5665 = vmatprep.subr.mxu0 %v6359_v12 }
 0xa2d   :  { %v1150_v14 = vsel %vm183_vm7, %v1148_v11, 0.0  ;;  %5666 = vmatpush3.msra.mxu0 %v6359_v12 }
 0xa2e   :  { %1151 = vadd.xlane.f32.xlu1 %v1150_v14  ;;  %5667 = vmatprep.subr.mxu0 %v6368_v28 }
 0xa2f   :  { %5668 = vmatpush3.msra.mxu0 %v6368_v28 }
 0xa30   :  { %5669 = vmatprep.subr.mxu0 %v6375_v29 }
 0xa31   :  { %5670 = vmatpush3.msra.mxu0 %v6375_v29 }
 0xa32   :  { %5671 = vmatprep.subr.mxu0 %v6381_v31 }
 0xa33   :  { %5672 = vmatpush3.msra.mxu0 %v6381_v31 }
 0xab5   :  { %v1155_v15 = vpop.xlane.xlu0 %1154 }
 0xab6   :  { %v1157_v16 = vmul.f32 0.03125, %v1155_v15 }
 0xab7   :  { %v1152_v17 = vpop.xlane.xlu1 %1151 }
 0xab8   :  { %v1159_v20 = vsub.f32 %v1149_v9, %v1157_v16  ;;  %v1156_v23 = vmul.f32 0.03125, %v1152_v17 }
 0xaba   :  { %v1158_v24 = vsub.f32 %v1148_v11, %v1156_v23  ;;  %v1161_v25 = vmul.f32 %v1159_v20, %v1159_v20 }
 0xabc   :  { %v1165_v26 = vsel %vm183_vm7, %v1161_v25, 0.0  ;;  %v1160_v27 = vmul.f32 %v1158_v24, %v1158_v24 }
 0xabd   :  { %1166 = vadd.xlane.f32.xlu1 %v1165_v26 }
 0xabe   :  { %v1162_v13 = vsel %vm183_vm7, %v1160_v27, 0.0 }
 0xabf   :  { %1163 = vadd.xlane.f32.xlu0 %v1162_v13 }
 0xace   :  { %1181 = vrot.lane.b32.xlu1 %v5390_v54, %s6055_s22 }
 0xad2   :  { %1304 = vrot.lane.b32.xlu1 %v6394_v18, %s6048_s25 }
 0xad5   :  { %1176 = vrot.lane.b32.xlu0 %v5390_v54, %s6048_s25  ;;  %v1296_v54 = vld [vmem:[%s7760_s5 + $0x4a] sm:$0xff] }
 0xad6   :  { %5690 = vmatprep.subr.mxu1 %v1296_v54 }
 0xad7   :  { %5691 = vmatpush3.msra.mxu1 %v1296_v54 }
 0xad8   :  { %5716 = vmatprep.subr.mxu1 %v7768_v21 }
 0xb46   :  { %v1167_v32 = vpop.xlane.xlu1 %1166 }
 0xb47   :  { %v1169_v33 = vmul.f32 0.03125, %v1167_v32 }
 0xb48   :  { %v1164_v34 = vpop.xlane.xlu0 %1163 }
 0xb49   :  { %v1171_v36 = vadd.f32 1e-12, %v1169_v33  ;;  %v1168_v37 = vmul.f32 0.03125, %v1164_v34 }
 0xb4a   :  { %v1182_v22 = vpop.permute.xlu1 %1181 }
 0xb4b   :  { %5939 = vrsqrt.f32 %v1171_v36  ;;  %v1170_v38 = vadd.f32 1e-12, %v1168_v37  ;;  %v6437_v37 = vld [vmem:[%s7761_s4 + $0x70] sm:$0xff] }
 0xb4c   :  { %v1177_v40 = vpop.permute.xlu0 %1176 }
 0xb4d   :  { %5941 = vrsqrt.f32 %v1170_v38  ;;  %v6444_v38 = vld [vmem:[%s7761_s4 + $0x50] sm:$0xff] }
 0xb58   :  { %v5940_v39 = vpop.eup %5939 }
 0xb59   :  { %v1175_v42 = vmul.f32 %v5940_v39, %v1159_v20 }
 0xb5a   :  { %v5942_v43 = vpop.eup %5941 }
 0xb5b   :  { %v1174_v44 = vmul.f32 %v5942_v43, %v1158_v24  ;;  %v1180_v45 = vmul.f32 %v1177_v40, %v1175_v42  ;;  %v1305_v24 = vpop.permute.xlu1 %1304 }
 0xb5d   :  { %v1179_v46 = vmul.f32 %v1177_v40, %v1174_v44  ;;  %v1185_v48 = vadd.f32 %v1182_v22, %v1180_v45 }
 0xb5f   :  { %v6386_v47 = vadd.f32 %v1182_v22, %v1179_v46 }
 0xb61   :  { %5673 = vmatprep.mubr.msk.f32.mxu0 %vm183_vm7, %v6386_v47 }
 0xb62   :  { %5674 = vmatmul.mubr.msk.f32.vlgmr.msra.gmra.mxu0 %vm183_vm7, %v1185_v48 }
 0xc22   :  { %v5675_v57 = vpop.f32.mrf.mxu0 }
 0xc23   :  { %v1275_v58 = vadd.f32 %v5675_v57, %v6394_v18 }
 0xc24   :  { %v1269_v59 = vpop.f32.mrf.mxu0 }
 0xc25   :  { %v1281_v60 = vmul.f32 0.044715, %v1275_v58  ;;  %v1270_v61 = vadd.f32 %v6394_v18, %v1269_v59  ;;  %v1279_v17 = vmul.f32 0.5, %v1275_v58 }
 0xc27   :  { %v1283_v62 = vmul.f32 %v1281_v60, %v1275_v58  ;;  %v1280_v63 = vmul.f32 0.044715, %v1270_v61  ;;  %v1278_v15 = vmul.f32 0.5, %v1270_v61 }
 0xc29   :  { %v1285_v0 = vmul.f32 %v1283_v62, %v1275_v58  ;;  %v1282_v2 = vmul.f32 %v1280_v63, %v1270_v61 }
 0xc2b   :  { %v1287_v3 = vadd.f32 %v1285_v0, %v1275_v58  ;;  %v1284_v6 = vmul.f32 %v1282_v2, %v1270_v61 }
 0xc2d   :  { %v1289_v7 = vmul.f32 0.7978846, %v1287_v3  ;;  %v1286_v8 = vadd.f32 %v1284_v6, %v1270_v61 }
 0xc2f   :  { %5943 = vtanh.f32 %v1289_v7  ;;  %v1288_v9 = vmul.f32 0.7978846, %v1286_v8 }
 0xc31   :  { %5945 = vtanh.f32 %v1288_v9 }
 0xc3c   :  { %v5944_v10 = vpop.eup %5943 }
 0xc3d   :  { %v1293_v14 = vadd.f32 1.0, %v5944_v10 }
 0xc3e   :  { %v5946_v11 = vpop.eup %5945 }
 0xc3f   :  { %v1292_v16 = vadd.f32 1.0, %v5946_v11  ;;  %v1295_v23 = vmul.f32 %v1293_v14, %v1279_v17 }
 0xc41   :  { %v1294_v20 = vmul.f32 %v1292_v16, %v1278_v15 }
 0xc43   :  { %5692 = vmatprep.mubr.msk.f32.mxu1 %vm83_vm5, %v1294_v20 }
 0xc44   :  { %5693 = vmatmul.mubr.msk.f32.vlgmr.msra.gmra.mxu1 %vm83_vm5, %v1295_v23 }
 0xc45   :  { %5718 = vmatprep.mubr.msk.f32.mxu1 %vm6050_vm8, %v7768_v21 }
 0xd04   :  { %v5694_v25 = vpop.f32.mrf.mxu1 }
 0xd05   :  { %v1385_v26 = vadd.f32 %v5694_v25, %v1305_v24 }
 0xd06   :  { %v1379_v27 = vpop.f32.mrf.mxu1 }
 0xd07   :  { %v1380_v13 = vadd.f32 %v1379_v27, %v1305_v24  ;;  %v1389_v32 = vadd.f32 %v1385_v26, %v1185_v48 }
 0xd09   :  { %v1394_v33 = vsel %vm183_vm7, %v1389_v32, 0.0  ;;  %v1388_v34 = vadd.f32 %v1380_v13, %v6386_v47 }
 0xd0a   :  { %1395 = vadd.xlane.f32.xlu1 %v1394_v33 }
 0xd0b   :  { %v1391_v36 = vsel %vm183_vm7, %v1388_v34, 0.0 }
 0xd0c   :  { %1392 = vadd.xlane.f32.xlu0 %v1391_v36 }
 0xd1b   :  { %1458 = vrot.lane.b32.xlu1 %v6359_v12, %s6048_s25 }
 0xd1f   :  { %1454 = vrot.lane.b32.xlu1 %v6368_v28, %s6048_s25 }
 0xd22   :  { %1460 = vrot.lane.b32.xlu0 %v6437_v37, %s6048_s25 }
 0xd23   :  { %1456 = vrot.lane.b32.xlu1 %v6444_v38, %s6048_s25 }
 0xd26   :  { %1417 = vrot.lane.b32.xlu0 %v6394_v18, %s6055_s22 }
 0xd27   :  { %1450 = vrot.lane.b32.xlu1 %v6375_v29, %s6048_s25 }
 0xd2b   :  { %1446 = vrot.lane.b32.xlu1 %v6381_v31, %s6048_s25 }
 0xd2f   :  { %1470 = vrot.lane.b32.xlu1 %v5398_v50, %s6049_s12 }
 0xd93   :  { %v1396_v12 = vpop.xlane.xlu1 %1395 }
 0xd94   :  { %v1398_v28 = vmul.f32 0.03125, %v1396_v12 }
 0xd95   :  { %v1393_v39 = vpop.xlane.xlu0 %1392 }
 0xd96   :  { %v1400_v40 = vsub.f32 %v1389_v32, %v1398_v28  ;;  %v1397_v42 = vmul.f32 0.03125, %v1393_v39 }
 0xd97   :  { %v1459_v43 = vpop.permute.xlu1 %1458 }
 0xd98   :  { %v1399_v44 = vsub.f32 %v1388_v34, %v1397_v42  ;;  %v1402_v45 = vmul.f32 %v1400_v40, %v1400_v40 }
 0xd99   :  { %v1461_v46 = vpop.permute.xlu0 %1460 }
 0xd9a   :  { %v1406_v22 = vsel %vm183_vm7, %v1402_v45, 0.0  ;;  %v1401_v47 = vmul.f32 %v1399_v44, %v1399_v44  ;;  %v1465_v48 = vsel %vm83_vm5, %v1459_v43, %v1461_v46 }
 0xd9b   :  { %1407 = vadd.xlane.f32.xlu0 %v1406_v22  ;;  %5695 = vmatprep.subr.mxu0 %v1465_v48  ;;  %v1455_v31 = vpop.permute.xlu1 %1454 }
 0xd9c   :  { %5696 = vmatpush3.msra.mxu0 %v1465_v48  ;;  %v1403_v29 = vsel %vm183_vm7, %v1401_v47, 0.0 }
 0xd9d   :  { %v1418_v53 = vpop.permute.xlu0 %1417 }
 0xd9f   :  { %1404 = vadd.xlane.f32.xlu0 %v1403_v29  ;;  %v1457_v18 = vpop.permute.xlu1 %1456 }
 0xda0   :  { %v1464_v52 = vsel %vm83_vm5, %v1455_v31, %v1457_v18 }
 0xda1   :  { %5697 = vmatprep.subr.mxu0 %v1464_v52 }
 0xda2   :  { %5698 = vmatpush3.msra.mxu0 %v1464_v52 }
 0xda3   :  { %v1451_v58 = vpop.permute.xlu1 %1450 }
 0xda7   :  { %v1447_v63 = vpop.permute.xlu1 %1446 }
 0xdab   :  { %v1471_v15 = vpop.permute.xlu1 %1470 }
 0xdb5   :  { %1452 = vrot.lane.b32.xlu0 %v6462_v49, %s6048_s25 }
 0xdb9   :  { %1448 = vrot.lane.b32.xlu0 %v6474_v55, %s6048_s25 }
 0xe24   :  { %v1408_v51 = vpop.xlane.xlu0 %1407 }
 0xe25   :  { %v1410_v56 = vmul.f32 0.03125, %v1408_v51 }
 0xe27   :  { %v1412_v54 = vadd.f32 1e-12, %v1410_v56 }
 0xe28   :  { %v1405_v57 = vpop.xlane.xlu0 %1404 }
 0xe29   :  { %5947 = vrsqrt.f32 %v1412_v54  ;;  %v1409_v59 = vmul.f32 0.03125, %v1405_v57 }
 0xe2b   :  { %v1411_v60 = vadd.f32 1e-12, %v1409_v59 }
 0xe2c   :  { %v1453_v61 = vpop.permute.xlu0 %1452 }
 0xe2d   :  { %5949 = vrsqrt.f32 %v1411_v60  ;;  %v1463_v62 = vsel %vm83_vm5, %v1451_v58, %v1453_v61 }
 0xe2e   :  { %5699 = vmatprep.subr.mxu0 %v1463_v62 }
 0xe2f   :  { %5700 = vmatpush3.msra.mxu0 %v1463_v62 }
 0xe30   :  { %v1449_v0 = vpop.permute.xlu0 %1448 }
 0xe31   :  { %v1462_v2 = vsel %vm83_vm5, %v1447_v63, %v1449_v0 }
 0xe32   :  { %5701 = vmatprep.subr.mxu0 %v1462_v2 }
 0xe33   :  { %5702 = vmatpush3.msra.mxu0 %v1462_v2 }
 0xe34   :  { %5706 = vmatprep.subr.mxu0 %v7768_v21 }
 0xe36   :  { %v5948_v3 = vpop.eup %5947 }
 0xe37   :  { %v1416_v6 = vmul.f32 %v5948_v3, %v1400_v40 }
 0xe39   :  { %v1421_v9 = vmul.f32 %v1418_v53, %v1416_v6 }
 0xe3a   :  { %v5950_v7 = vpop.eup %5949 }
 0xe3b   :  { %v1415_v8 = vmul.f32 %v5950_v7, %v1399_v44  ;;  %v6483_v14 = vadd.f32 %v5398_v50, %v1421_v9 }
 0xe3d   :  { %v1420_v10 = vmul.f32 %v1418_v53, %v1415_v8 }
 0xe3f   :  { %v6481_v11 = vadd.f32 %v5398_v50, %v1420_v10 }
 0xe41   :  { %5703 = vmatprep.mubr.msk.f32.mxu0 %vm183_vm7, %v6481_v11 }
 0xe42   :  { %5704 = vmatmul.mubr.msk.f32.vlgmr.msra.gmra.mxu0 %vm183_vm7, %v6483_v14 }
 0xe43   :  { %5708 = vmatprep.mubr.msk.f32.mxu0 %vm6050_vm8, %v7768_v21 }
 0xf02   :  { %v5705_v16 = vpop.f32.mrf.mxu0 }
 0xf03   :  { %v6491_v17 = vadd.f32 %v5705_v16, %v1471_v15 }
 0xf04   :  { %v1545_v20 = vpop.f32.mrf.mxu0 }
 0xf05   :  { %v6493_v23 = vadd.f32 %v1545_v20, %v1471_v15  ;;  %1632 = vrot.lane.b32.xlu1 %v6491_v17, %s6049_s12 }
 0xf07   :  { %1555 = vrot.lane.b32.xlu0 %v6493_v23, %s6049_s12 }
 0xf77   :  { %v1633_v25 = vpop.permute.xlu1 %1632 }
 0xf79   :  { %v1556_v24 = vpop.permute.xlu0 %1555 }
 0xf7a   :  { %5707 = vmatpush3.xpose.msk.msra.mxu0 %vm7779_vm9, %v1556_v24 }
 0xf7b   :  { %5711 = vmatprep.subr.mxu0 %v7768_v21 }
 0xf7d   :  { %5709 = vmatmul.mubr.msk.f32.vlgmr.msra.gmra.mxu0 %vm7779_vm9, %v6493_v23 }
 0xf7e   :  { %5712 = vmatpush3.xpose.msk.msra.mxu0 %vm7779_vm9, %v1633_v25  ;;  %5713 = vmatprep.mubr.msk.f32.mxu0 %vm6050_vm8, %v7768_v21 }
 0xf7f   :  { %5721 = vmatprep.subr.mxu0 %v7768_v21 }
 0xf81   :  { %5714 = vmatmul.mubr.msk.f32.vlgmr.msra.gmra.mxu0 %vm7779_vm9, %v6491_v17 }
 0xf82   :  { %5723 = vmatprep.mubr.msk.f32.mxu0 %vm6050_vm8, %v7768_v21 }
0x103d   :  { %v1627_v26 = vpop.f32.mrf.mxu0 }
0x103e   :  { %v1708_v27 = vmul.f32 0.25, %v1627_v26 }
0x103f   :  { %v5710_v13 = vpop.f32.mrf.mxu0 }
0x1040   :  { %v1710_v32 = vadd.f32 %v1708_v27, %v6272_v35 }
0x1041   :  { %v1704_v33 = vpop.f32.mrf.mxu0 }
0x1042   :  { %v1709_v34 = vmul.f32 0.25, %v1704_v33  ;;  %v1712_v36 = vsel %vm519_vm10, %v1710_v32, -inf }
0x1043   :  { %1713 = vmax.xlane.f32.xlu0 %v1712_v36  ;;  %v5715_v12 = vpop.f32.mrf.mxu0 }
0x1044   :  { %v1711_v28 = vadd.f32 %v1709_v34, %v6277_v41 }
0x1046   :  { %v1715_v39 = vsel %vm519_vm10, %v1711_v28, -inf }
0x1047   :  { %1716 = vmax.xlane.f32.xlu1 %v1715_v39 }
0x1058   :  { %1734 = vrot.lane.b32.xlu1 %v6493_v23, %s6048_s25 }
0x1059   :  { %1810 = vrot.lane.b32.xlu0 %v6491_v17, %s6048_s25 }
0x105c   :  { %1888 = vrot.lane.b32.xlu1 %v6493_v23, %s6052_s19 }
0x1060   :  { %1966 = vrot.lane.b32.xlu1 %v6491_v17, %s6052_s19 }
0x1064   :  { %1964 = vrot.lane.b32.xlu1 %v6491_v17, %s6053_s20 }
0x10cc   :  { %v1714_v40 = vpop.xlane.xlu0 %1713 }
0x10cd   :  { %v1718_v42 = vsub.f32 %v1710_v32, %v1714_v40 }
0x10cf   :  { %v1720_v43 = vmul.f32 1.442695, %v1718_v42 }
0x10d0   :  { %v1811_v44 = vpop.permute.xlu0 %1810  ;;  %v1717_v45 = vpop.xlane.xlu1 %1716 }
0x10d1   :  { %5951 = vpow2.f32 %v1720_v43  ;;  %v1719_v46 = vsub.f32 %v1711_v28, %v1717_v45  ;;  %5722 = vmatpush3.msra.mxu0 %v1811_v44 }
0x10d2   :  { %5731 = vmatprep.subr.mxu0 %v7768_v21 }
0x10d3   :  { %v1722_v22 = vmul.f32 1.442695, %v1719_v46 }
0x10d4   :  { %v1735_v47 = vpop.permute.xlu1 %1734 }
0x10d5   :  { %5953 = vpow2.f32 %v1722_v22  ;;  %5717 = vmatpush3.msra.mxu1 %v1735_v47 }
0x10d6   :  { %5726 = vmatprep.subr.mxu1 %v7768_v21 }
0x10d8   :  { %v1889_v53 = vpop.permute.xlu1 %1888 }
0x10dc   :  { %v1967_v57 = vpop.permute.xlu1 %1966 }
0x10de   :  { %v5952_v48 = vpop.eup %5951 }
0x10df   :  { %v1724_v29 = vsel %vm519_vm10, %v5952_v48, 0.0 }
0x10e0   :  { %1725 = vadd.xlane.f32.xlu0 %v1724_v29  ;;  %v1965_v60 = vpop.permute.xlu1 %1964 }
0x10e2   :  { %v5954_v31 = vpop.eup %5953 }
0x10e3   :  { %v1727_v18 = vsel %vm519_vm10, %v5954_v31, 0.0 }
0x10e4   :  { %1728 = vadd.xlane.f32.xlu0 %v1727_v18 }
0x10fa   :  { %1886 = vrot.lane.b32.xlu0 %v6493_v23, %s6053_s20 }
0x1169   :  { %v1726_v52 = vpop.xlane.xlu0 %1725 }
0x116a   :  { %5955 = vrcp.f32 %v1726_v52 }
0x116d   :  { %v1729_v50 = vpop.xlane.xlu0 %1728 }
0x116e   :  { %5957 = vrcp.f32 %v1729_v50 }
0x1171   :  { %v1887_v59 = vpop.permute.xlu0 %1886 }
0x1177   :  { %v5956_v51 = vpop.eup %5955 }
0x1178   :  { %v1732_v56 = vmul.f32 %v5956_v51, %v5952_v48 }
0x117a   :  { %5719 = vmatmul.mubr.msk.f32.vlgmr.msra.gmra.mxu1 %vm519_vm10, %v1732_v56 }
0x117b   :  { %v5958_v54 = vpop.eup %5957  ;;  %5727 = vmatpush3.xpose.msk.msra.mxu1 %vm7779_vm9, %v1889_v53  ;;  %5728 = vmatprep.mubr.msk.f32.mxu1 %vm6050_vm8, %v7768_v21  ;;  %v5413_v53 = vld [vmem:[%s7762_s6 + $0x4] ss:$0 sm:$0xff] }
0x117c   :  { %v1733_v58 = vmul.f32 %v5958_v54, %v5954_v31  ;;  %5736 = vmatprep.subr.mxu1 %v7768_v21 }
0x117e   :  { %5724 = vmatmul.mubr.msk.f32.vlgmr.msra.gmra.mxu0 %vm519_vm10, %v1733_v58  ;;  %5729 = vmatmul.mubr.msk.f32.vlgmr.msra.gmra.mxu1 %vm7779_vm9, %v1887_v59 }
0x117f   :  { %5732 = vmatpush3.xpose.msk.msra.mxu0 %vm7779_vm9, %v1967_v57  ;;  %5733 = vmatprep.mubr.msk.f32.mxu0 %vm6050_vm8, %v7768_v21 }
0x1180   :  { %5741 = vmatprep.subr.mxu0 %v7768_v21  ;;  %5738 = vmatprep.mubr.msk.f32.mxu1 %vm6050_vm8, %v7768_v21 }
0x1182   :  { %5734 = vmatmul.mubr.msk.f32.vlgmr.msra.gmra.mxu0 %vm7779_vm9, %v1965_v60 }
0x1183   :  { %5743 = vmatprep.mubr.msk.f32.mxu0 %vm6050_vm8, %v7768_v21 }
0x123a   :  { %v6547_v61 = vpop.f32.mrf.mxu1 }
0x123c   :  { %v5720_v62 = vpop.f32.mrf.mxu1 }
0x123e   :  { %v6549_v63 = vpop.f32.mrf.mxu0  ;;  %v1960_v0 = vpop.f32.mrf.mxu1 }
0x123f   :  { %v2042_v2 = vmul.f32 0.25, %v1960_v0 }
0x1240   :  { %v5725_v3 = vpop.f32.mrf.mxu0  ;;  %v5730_v6 = vpop.f32.mrf.mxu1 }
0x1241   :  { %v2044_v7 = vadd.f32 %v2042_v2, %v6272_v35 }
0x1242   :  { %v2038_v8 = vpop.f32.mrf.mxu0 }
0x1243   :  { %v2043_v9 = vmul.f32 0.25, %v2038_v8  ;;  %v2046_v10 = vsel %vm519_vm10, %v2044_v7, -inf }
0x1244   :  { %2047 = vmax.xlane.f32.xlu0 %v2046_v10  ;;  %v5735_v15 = vpop.f32.mrf.mxu0 }
0x1245   :  { %v2045_v16 = vadd.f32 %v2043_v9, %v6277_v41 }
0x1247   :  { %v2049_v20 = vsel %vm519_vm10, %v2045_v16, -inf }
0x1248   :  { %2050 = vmax.xlane.f32.xlu1 %v2049_v20 }
0x1259   :  { %2068 = vrot.lane.b32.xlu1 %v6493_v23, %s6054_s21 }
0x125d   :  { %2251 = vrot.lane.b32.xlu1 %v6437_v37, %s6049_s12 }
0x1261   :  { %2249 = vrot.lane.b32.xlu1 %v6444_v38, %s6049_s12 }
0x12cd   :  { %v2048_v35 = vpop.xlane.xlu0 %2047 }
0x12ce   :  { %v2052_v24 = vsub.f32 %v2044_v7, %v2048_v35 }
0x12d0   :  { %v2054_v25 = vmul.f32 1.442695, %v2052_v24 }
0x12d1   :  { %v2051_v26 = vpop.xlane.xlu1 %2050 }
0x12d2   :  { %5959 = vpow2.f32 %v2054_v25  ;;  %v2053_v27 = vsub.f32 %v2045_v16, %v2051_v26 }
0x12d4   :  { %v2056_v13 = vmul.f32 1.442695, %v2053_v27 }
0x12d5   :  { %v2069_v41 = vpop.permute.xlu1 %2068 }
0x12d6   :  { %5961 = vpow2.f32 %v2056_v13  ;;  %5737 = vmatpush3.msra.mxu1 %v2069_v41 }
0x12df   :  { %v5960_v32 = vpop.eup %5959 }
0x12e0   :  { %v2058_v33 = vsel %vm519_vm10, %v5960_v32, 0.0 }
0x12e1   :  { %2059 = vadd.xlane.f32.xlu0 %v2058_v33 }
0x12e3   :  { %v5962_v23 = vpop.eup %5961 }
0x12e4   :  { %v2061_v34 = vsel %vm519_vm10, %v5962_v23, 0.0 }
0x12e5   :  { %2062 = vadd.xlane.f32.xlu0 %v2061_v34 }
0x12fb   :  { %2144 = vrot.lane.b32.xlu0 %v6491_v17, %s6054_s21  ;;  %v2252_v17 = vpop.permute.xlu1 %2251  ;;  %s6068_s21 = smov 127  }
0x12fc   :  { %5746 = vmatprep.subr.mxu1 %v2252_v17 }
0x12ff   :  { %2247 = vrot.lane.b32.xlu0 %v6462_v49, %s6049_s12  ;;  %v2250_v44 = vpop.permute.xlu1 %2249 }
0x1303   :  { %2245 = vrot.lane.b32.xlu0 %v6474_v55, %s6049_s12 }
0x136a   :  { %v2060_v36 = vpop.xlane.xlu0 %2059 }
0x136b   :  { %5963 = vrcp.f32 %v2060_v36 }
0x136e   :  { %v2063_v12 = vpop.xlane.xlu0 %2062 }
0x136f   :  { %5965 = vrcp.f32 %v2063_v12 }
0x1372   :  { %v2145_v28 = vpop.permute.xlu0 %2144 }
0x1373   :  { %5742 = vmatpush3.msra.mxu0 %v2145_v28 }
0x1376   :  { %v2248_v45 = vpop.permute.xlu0 %2247 }
0x1378   :  { %v5964_v39 = vpop.eup %5963 }
0x1379   :  { %v2066_v40 = vmul.f32 %v5964_v39, %v5960_v32  ;;  %v2510_v39 = vld [vmem:[%s7760_s5 + $0xc2] sm:$0xff] }
0x137a   :  { %v2246_v46 = vpop.permute.xlu0 %2245 }
0x137b   :  { %5739 = vmatmul.mubr.msk.f32.vlgmr.msra.gmra.mxu1 %vm519_vm10, %v2066_v40  ;;  %v2509_v40 = vld [vmem:[%s7760_s5 + $0xba] sm:$0xff] }
0x137c   :  { %v5966_v42 = vpop.eup %5965  ;;  %5747 = vmatpush3.msra.mxu1 %v2252_v17  ;;  %v2506_v17 = vld [vmem:[%s7760_s5 + $0xa2] sm:$0xff] }
0x137d   :  { %v2067_v43 = vmul.f32 %v5966_v42, %v5962_v23  ;;  %5748 = vmatprep.subr.mxu1 %v2250_v44  ;;  %v2508_v42 = vld [vmem:[%s7760_s5 + $0xb2] sm:$0xff] }
0x137e   :  { %5749 = vmatpush3.msra.mxu1 %v2250_v44  ;;  %v2505_v44 = vld [vmem:[%s7760_s5 + $0x9a] sm:$0xff] }
0x137f   :  { %5744 = vmatmul.mubr.msk.f32.vlgmr.msra.gmra.mxu0 %vm519_vm10, %v2067_v43  ;;  %5750 = vmatprep.subr.mxu1 %v2248_v45  ;;  %v2507_v43 = vld [vmem:[%s7760_s5 + $0xaa] sm:$0xff] }
0x1380   :  { %5751 = vmatpush3.msra.mxu1 %v2248_v45  ;;  %v2504_v45 = vld [vmem:[%s7760_s5 + $0x92] sm:$0xff] }
0x1381   :  { %5752 = vmatprep.subr.mxu1 %v2246_v46 }
0x1382   :  { %5753 = vmatpush3.msra.mxu1 %v2246_v46  ;;  %v2503_v46 = vld [vmem:[%s7760_s5 + $0x8a] sm:$0xff] }
0x1383   :  { %5768 = vmatprep.subr.mxu1 %v2510_v39 }
0x143b   :  { %v2140_v22 = vpop.f32.mrf.mxu1 }
0x143c   :  { %2222 = vrot.lane.b32.xlu1 %v2140_v22, %s6056_s26  ;;  %v6643_v22 = vld [vmem:[%s7762_s6 + $0x5] ss:$0 sm:$0xff] }
0x143d   :  { %v5740_v47 = vpop.f32.mrf.mxu1 }
0x143f   :  { %v2216_v48 = vpop.f32.mrf.mxu0 }
0x1440   :  { %2224 = vrot.lane.b32.xlu1 %v2216_v48, %s6056_s26 }
0x1441   :  { %v5745_v29 = vpop.f32.mrf.mxu0 }
0x14ae   :  { %v2223_v31 = vpop.permute.xlu1 %2222 }
0x14af   :  { %v2228_v18 = vsel %vm7779_vm9, %v6547_v61, %v2223_v31 }
0x14b0   :  { %5754 = vmatprep.mubr.msk.f32.mxu1 %vm183_vm7, %v2228_v18 }
0x14b2   :  { %v2225_v52 = vpop.permute.xlu1 %2224 }
0x14b3   :  { %v2229_v50 = vsel %vm7779_vm9, %v6549_v63, %v2225_v52  ;;  %vm5276_vm9 = vcmp.eq.s32.totalorder %v6169_v19, 2 }
0x14b4   :  { %5755 = vmatmul.mubr.msk.f32.vlgmr.msra.gmra.mxu1 %vm183_vm7, %v2229_v50 }
0x14b5   :  { %5769 = vmatpush3.msra.mxu1 %v2510_v39 }
0x14b6   :  { %5770 = vmatprep.subr.mxu1 %v2509_v40 }
0x14b7   :  { %5771 = vmatpush3.msra.mxu1 %v2509_v40 }
0x14b8   :  { %5772 = vmatprep.subr.mxu1 %v2508_v42 }
0x14b9   :  { %5773 = vmatpush3.msra.mxu1 %v2508_v42 }
0x14ba   :  { %5774 = vmatprep.subr.mxu1 %v2507_v43 }
0x14bb   :  { %5775 = vmatpush3.msra.mxu1 %v2507_v43 }
0x14bc   :  { %5776 = vmatprep.subr.mxu1 %v2506_v17 }
0x14bd   :  { %5777 = vmatpush3.msra.mxu1 %v2506_v17 }
0x14be   :  { %5778 = vmatprep.subr.mxu1 %v2505_v44 }
0x14bf   :  { %5779 = vmatpush3.msra.mxu1 %v2505_v44 }
0x14c0   :  { %5780 = vmatprep.subr.mxu1 %v2504_v45 }
0x14c1   :  { %5781 = vmatpush3.msra.mxu1 %v2504_v45 }
0x14c2   :  { %5782 = vmatprep.subr.mxu1 %v2503_v46 }
0x14c3   :  { %5783 = vmatpush3.msra.mxu1 %v2503_v46 }
0x1574   :  { %v5756_v51 = vpop.f32.mrf.mxu1 }
0x1575   :  { %v2335_v56 = vadd.f32 %v5756_v51, %v5413_v53 }
0x1576   :  { %v2329_v54 = vpop.f32.mrf.mxu1 }
0x1577   :  { %v2330_v57 = vadd.f32 %v5413_v53, %v2329_v54  ;;  %v2339_v58 = vadd.f32 %v2335_v56, %v6483_v14 }
0x1579   :  { %v2343_v59 = vsel %vm183_vm7, %v2339_v58, 0.0  ;;  %v2338_v60 = vadd.f32 %v2330_v57, %v6481_v11 }
0x157a   :  { %2344 = vadd.xlane.f32.xlu1 %v2343_v59 }
0x157b   :  { %v2340_v61 = vsel %vm183_vm7, %v2338_v60, 0.0 }
0x157c   :  { %2341 = vadd.xlane.f32.xlu0 %v2340_v61 }
0x158b   :  { %2392 = vrot.lane.b32.xlu1 %v6437_v37, %s6048_s25 }
0x158f   :  { %2366 = vrot.lane.b32.xlu1 %v5413_v53, %s6049_s12 }
0x1593   :  { %2388 = vrot.lane.b32.xlu1 %v6462_v49, %s6048_s25  ;;  %v2376_v49 = vld [vmem:[%s7762_s6 + $0x4] sm:$0x3] }
0x1594   :  { %v2381_v9 = vrot.slane %v2376_v49, %v6131_v4 }
0x1597   :  { %2386 = vrot.lane.b32.xlu1 %v6474_v55, %s6048_s25  ;;  %v2385_v55 = vrot.slane %v2376_v49, %v6134_v5 }
0x159b   :  { %2400 = vrot.lane.b32.xlu1 %v2385_v55, %s6055_s22 }
0x1603   :  { %v2345_v14 = vpop.xlane.xlu1 %2344 }
0x1604   :  { %v2347_v62 = vmul.f32 0.03125, %v2345_v14 }
0x1605   :  { %v2342_v63 = vpop.xlane.xlu0 %2341 }
0x1606   :  { %v2349_v0 = vsub.f32 %v2339_v58, %v2347_v62  ;;  %v2346_v11 = vmul.f32 0.03125, %v2342_v63 }
0x1607   :  { %v2393_v8 = vpop.permute.xlu1 %2392 }
0x1608   :  { %v2348_v2 = vsub.f32 %v2338_v60, %v2346_v11  ;;  %v2351_v3 = vmul.f32 %v2349_v0, %v2349_v0  ;;  %5757 = vmatprep.subr.mxu0 %v2393_v8 }
0x1609   :  { %5758 = vmatpush3.msra.mxu0 %v2393_v8 }
0x160a   :  { %v2355_v6 = vsel %vm183_vm7, %v2351_v3, 0.0  ;;  %v2350_v7 = vmul.f32 %v2348_v2, %v2348_v2 }
0x160b   :  { %2356 = vadd.xlane.f32.xlu0 %v2355_v6  ;;  %v2367_v10 = vpop.permute.xlu1 %2366 }
0x160c   :  { %v2352_v37 = vsel %vm183_vm7, %v2350_v7, 0.0 }
0x160f   :  { %2353 = vadd.xlane.f32.xlu0 %v2352_v37 }
0x1625   :  { %2390 = vrot.lane.b32.xlu0 %v6444_v38, %s6048_s25  ;;  %v2389_v38 = vpop.permute.xlu1 %2388 }
0x1629   :  { %2371 = vrot.lane.b32.xlu0 %v5413_v53, %s6048_s25  ;;  %v2387_v27 = vpop.permute.xlu1 %2386 }
0x162d   :  { %2398 = vrot.lane.b32.xlu0 %v2381_v9, %s6055_s22  ;;  %v2401_v47 = vpop.permute.xlu1 %2400 }
0x1631   :  { %2517 = vrot.lane.b32.xlu0 %v6643_v22, %s6049_s12 }
0x1694   :  { %v2357_v15 = vpop.xlane.xlu0 %2356 }
0x1695   :  { %v2359_v16 = vmul.f32 0.03125, %v2357_v15 }
0x1697   :  { %v2361_v20 = vadd.f32 1e-12, %v2359_v16 }
0x1698   :  { %v2354_v35 = vpop.xlane.xlu0 %2353 }
0x1699   :  { %5967 = vrsqrt.f32 %v2361_v20  ;;  %v2358_v24 = vmul.f32 0.03125, %v2354_v35  ;;  %v2642_v35 = vld [vmem:[%s7761_s4 + $0x78] sm:$0xff] }
0x169b   :  { %v2360_v25 = vadd.f32 1e-12, %v2358_v24  ;;  %v2640_v24 = vld [vmem:[%s7761_s4 + $0x38] sm:$0xff] }
0x169c   :  { %v2391_v26 = vpop.permute.xlu0 %2390 }
0x169d   :  { %5969 = vrsqrt.f32 %v2360_v25  ;;  %5759 = vmatprep.subr.mxu0 %v2391_v26  ;;  %v2639_v25 = vld [vmem:[%s7761_s4 + $0x18] sm:$0xff] }
0x169e   :  { %5760 = vmatpush3.msra.mxu0 %v2391_v26 }
0x169f   :  { %5761 = vmatprep.subr.mxu0 %v2389_v38 }
0x16a0   :  { %5762 = vmatpush3.msra.mxu0 %v2389_v38  ;;  %v2372_v36 = vpop.permute.xlu0 %2371  ;;  %v2641_v38 = vld [vmem:[%s7761_s4 + $0x58] sm:$0xff]  ;;  %s6057_s4 = smov 92  }
0x16a1   :  { %5763 = vmatprep.subr.mxu0 %v2387_v27 }
0x16a2   :  { %5764 = vmatpush3.msra.mxu0 %v2387_v27 }
0x16a3   :  { %5787 = vmatprep.subr.mxu0 %v7768_v21 }
0x16a4   :  { %v2399_v48 = vpop.permute.xlu0 %2398 }
0x16a5   :  { %v2402_v29 = vsel %vm183_vm7, %v2399_v48, %v2401_v47 }
0x16a6   :  { %v5968_v13 = vpop.eup %5967 }
0x16a7   :  { %v2365_v41 = vmul.f32 %v5968_v13, %v2349_v0 }
0x16a8   :  { %v2518_v37 = vpop.permute.xlu0 %2517 }
0x16a9   :  { %v2370_v23 = vmul.f32 %v2367_v10, %v2365_v41 }
0x16aa   :  { %v5970_v32 = vpop.eup %5969 }
0x16ab   :  { %v2364_v33 = vmul.f32 %v5970_v32, %v2348_v2  ;;  %v6608_v28 = vadd.f32 %v2372_v36, %v2370_v23 }
0x16ad   :  { %v2369_v34 = vmul.f32 %v2367_v10, %v2364_v33 }
0x16af   :  { %v6606_v12 = vadd.f32 %v2372_v36, %v2369_v34 }
0x16b1   :  { %5765 = vmatprep.mubr.msk.f32.mxu0 %vm183_vm7, %v6606_v12 }
0x16b2   :  { %5766 = vmatmul.mubr.msk.f32.vlgmr.msra.gmra.mxu0 %vm183_vm7, %v6608_v28 }
0x16b3   :  { %5795 = vmatprep.mubr.msk.f32.mxu0 %vm6050_vm8, %v7768_v21  ;;  %5788 = vmatpush3.msra.mxu0 %v2642_v35 }
0x16b4   :  { %5789 = vmatprep.subr.mxu0 %v7768_v21 }
0x16b5   :  { %5790 = vmatpush3.msra.mxu0 %v2641_v38 }
0x16b6   :  { %5791 = vmatprep.subr.mxu0 %v7768_v21 }
0x16b7   :  { %5792 = vmatpush3.msra.mxu0 %v2640_v24 }
0x16b8   :  { %5793 = vmatprep.subr.mxu0 %v7768_v21 }
0x16b9   :  { %5794 = vmatpush3.msra.mxu0 %v2639_v25 }
0x16ba   :  { %5798 = vmatprep.subr.mxu0 %v7768_v21 }
0x1772   :  { %v5767_v31 = vpop.f32.mrf.mxu0 }
0x1773   :  { %v2482_v18 = vadd.f32 %v5767_v31, %v2402_v29 }
0x1774   :  { %v2476_v52 = vpop.f32.mrf.mxu0 }
0x1775   :  { %v2488_v50 = vmul.f32 0.044715, %v2482_v18  ;;  %v2477_v53 = vadd.f32 %v2476_v52, %v2402_v29  ;;  %v2486_v3 = vmul.f32 0.5, %v2482_v18 }
0x1777   :  { %v2490_v51 = vmul.f32 %v2488_v50, %v2482_v18  ;;  %v2487_v56 = vmul.f32 0.044715, %v2477_v53  ;;  %v2485_v11 = vmul.f32 0.5, %v2477_v53 }
0x1779   :  { %v2492_v54 = vmul.f32 %v2490_v51, %v2482_v18  ;;  %v2489_v57 = vmul.f32 %v2487_v56, %v2477_v53 }
0x177b   :  { %v2494_v58 = vadd.f32 %v2492_v54, %v2482_v18  ;;  %v2491_v59 = vmul.f32 %v2489_v57, %v2477_v53 }
0x177d   :  { %v2496_v60 = vmul.f32 0.7978846, %v2494_v58  ;;  %v2493_v61 = vadd.f32 %v2491_v59, %v2477_v53 }
0x177f   :  { %5971 = vtanh.f32 %v2496_v60  ;;  %v2495_v14 = vmul.f32 0.7978846, %v2493_v61 }
0x1781   :  { %5973 = vtanh.f32 %v2495_v14 }
0x178c   :  { %v5972_v62 = vpop.eup %5971 }
0x178d   :  { %v2500_v0 = vadd.f32 1.0, %v5972_v62 }
0x178e   :  { %v5974_v63 = vpop.eup %5973 }
0x178f   :  { %v2499_v2 = vadd.f32 1.0, %v5974_v63  ;;  %v2502_v7 = vmul.f32 %v2500_v0, %v2486_v3 }
0x1791   :  { %v2501_v6 = vmul.f32 %v2499_v2, %v2485_v11 }
0x1793   :  { %5784 = vmatprep.mubr.msk.f32.mxu1 %vm83_vm5, %v2501_v6 }
0x1794   :  { %5785 = vmatmul.mubr.msk.f32.vlgmr.msra.gmra.mxu1 %vm83_vm5, %v2502_v7 }
0x1854   :  { %v5786_v8 = vpop.f32.mrf.mxu1 }
0x1855   :  { %v2598_v49 = vadd.f32 %v5786_v8, %v2518_v37 }
0x1856   :  { %v2592_v55 = vpop.f32.mrf.mxu1 }
0x1857   :  { %v2593_v9 = vadd.f32 %v2592_v55, %v2518_v37  ;;  %v2602_v10 = vadd.f32 %v2598_v49, %v6608_v28  ;;  %v5421_v28 = vld [vmem:[%s7762_s6 + $0x6] ss:$0 sm:$0xff] }
0x1859   :  { %v2606_v15 = vsel %vm183_vm7, %v2602_v10, 0.0  ;;  %v2601_v16 = vadd.f32 %v2593_v9, %v6606_v12 }
0x185a   :  { %2607 = vadd.xlane.f32.xlu1 %v2606_v15 }
0x185b   :  { %v2603_v20 = vsel %vm183_vm7, %v2601_v16, 0.0 }
0x185c   :  { %2604 = vadd.xlane.f32.xlu0 %v2603_v20 }
0x18e3   :  { %v2608_v26 = vpop.xlane.xlu1 %2607 }
0x18e4   :  { %v2610_v27 = vmul.f32 0.03125, %v2608_v26 }
0x18e5   :  { %v2605_v13 = vpop.xlane.xlu0 %2604 }
0x18e6   :  { %v2612_v41 = vsub.f32 %v2602_v10, %v2610_v27  ;;  %v2609_v32 = vmul.f32 0.03125, %v2605_v13 }
0x18e8   :  { %v2611_v33 = vsub.f32 %v2601_v16, %v2609_v32  ;;  %v2614_v23 = vmul.f32 %v2612_v41, %v2612_v41  ;;  %v6704_v16 = vld [vmem:[%s7764_s7 + $0x2] sm:$0xff] }
0x18ea   :  { %v2618_v34 = vsel %vm183_vm7, %v2614_v23, 0.0  ;;  %v2613_v36 = vmul.f32 %v2611_v33, %v2611_v33 }
0x18eb   :  { %2619 = vadd.xlane.f32.xlu0 %v2618_v34 }
0x18ec   :  { %v2615_v12 = vsel %vm183_vm7, %v2613_v36, 0.0 }
0x18ed   :  { %2616 = vadd.xlane.f32.xlu1 %v2615_v12 }
0x18fe   :  { %2634 = vrot.lane.b32.xlu1 %v6643_v22, %s6055_s22  ;;  %s6076_s22 = smov 4  }
0x1901   :  { %2629 = vrot.lane.b32.xlu0 %v6643_v22, %s6048_s25 }
0x1902   :  { %2826 = vrot.lane.b32.xlu1 %v2642_v35, %s6057_s4 }
0x1905   :  { %2824 = vrot.lane.b32.xlu0 %v2641_v38, %s6057_s4 }
0x1906   :  { %2822 = vrot.lane.b32.xlu1 %v2640_v24, %s6057_s4 }
0x1909   :  { %2820 = vrot.lane.b32.xlu0 %v2639_v25, %s6057_s4 }
0x190a   :  { %2738 = vrot.lane.b32.xlu1 %v2642_v35, %s6049_s12 }
0x190d   :  { %2736 = vrot.lane.b32.xlu0 %v2641_v38, %s6049_s12 }
0x190e   :  { %2734 = vrot.lane.b32.xlu1 %v2640_v24, %s6049_s12 }
0x1911   :  { %2732 = vrot.lane.b32.xlu0 %v2639_v25, %s6049_s12 }
0x1912   :  { %2922 = vrot.lane.b32.xlu1 %v2642_v35, %s6058_s11 }
0x1915   :  { %2920 = vrot.lane.b32.xlu0 %v2641_v38, %s6058_s11 }
0x1916   :  { %2832 = vrot.lane.b32.xlu1 %v5421_v28, %s6057_s4  ;;  %s6073_s4 = smov 121  }
0x1919   :  { %2918 = vrot.lane.b32.xlu0 %v2640_v24, %s6058_s11 }
0x191a   :  { %2916 = vrot.lane.b32.xlu1 %v2639_v25, %s6058_s11 }
0x191d   :  { %2928 = vrot.lane.b32.xlu0 %v5421_v28, %s6058_s11  ;;  %s6074_s11 = smov 122  }
0x1974   :  { %v2620_v39 = vpop.xlane.xlu0 %2619 }
0x1975   :  { %v2622_v40 = vmul.f32 0.03125, %v2620_v39 }
0x1976   :  { %v2617_v42 = vpop.xlane.xlu1 %2616 }
0x1977   :  { %v2624_v43 = vadd.f32 1e-12, %v2622_v40  ;;  %v2621_v17 = vmul.f32 0.03125, %v2617_v42 }
0x1978   :  { %v2630_v44 = vpop.permute.xlu0 %2629 }
0x1979   :  { %5975 = vrsqrt.f32 %v2624_v43  ;;  %v2623_v45 = vadd.f32 1e-12, %v2621_v17 }
0x197a   :  { %v2635_v46 = vpop.permute.xlu1 %2634 }
0x197b   :  { %5977 = vrsqrt.f32 %v2623_v45 }
0x197c   :  { %v2825_v22 = vpop.permute.xlu0 %2824 }
0x197e   :  { %v2827_v47 = vpop.permute.xlu1 %2826 }
0x197f   :  { %5809 = vmatprep.subr.mxu1 %v2827_v47 }
0x1980   :  { %5810 = vmatpush3.msra.mxu1 %v2827_v47  ;;  %v2821_v29 = vpop.permute.xlu0 %2820 }
0x1981   :  { %5811 = vmatprep.subr.mxu1 %v2825_v22 }
0x1982   :  { %v2823_v48 = vpop.permute.xlu1 %2822  ;;  %5812 = vmatpush3.msra.mxu1 %v2825_v22 }
0x1983   :  { %5813 = vmatprep.subr.mxu1 %v2823_v48 }
0x1984   :  { %5814 = vmatpush3.msra.mxu1 %v2823_v48  ;;  %v2737_v61 = vpop.permute.xlu0 %2736  ;;  %v6059_v48 = vmov 1  }
0x1985   :  { %5815 = vmatprep.subr.mxu1 %v2821_v29  ;;  %5903 = vset.pattern.permute.xlu0 %v6059_v48 }
0x1986   :  { %v5976_v31 = vpop.eup %5975  ;;  %5816 = vmatpush3.msra.mxu1 %v2821_v29  ;;  %v2739_v59 = vpop.permute.xlu1 %2738 }
0x1987   :  { %v2628_v18 = vmul.f32 %v5976_v31, %v2612_v41  ;;  %5831 = vmatprep.subr.mxu1 %v7768_v21 }
0x1988   :  { %v5978_v52 = vpop.eup %5977  ;;  %v2733_v14 = vpop.permute.xlu0 %2732 }
0x1989   :  { %v2627_v50 = vmul.f32 %v5978_v52, %v2611_v33  ;;  %v2633_v53 = vmul.f32 %v2630_v44, %v2628_v18  ;;  %v5429_v33 = vld [vmem:[%s7764_s7] ss:$0 sm:$0xff] }
0x198a   :  { %v2735_v60 = vpop.permute.xlu1 %2734 }
0x198b   :  { %v2632_v51 = vmul.f32 %v2630_v44, %v2627_v50  ;;  %v2638_v56 = vadd.f32 %v2635_v46, %v2633_v53 }
0x198c   :  { %v2921_v37 = vpop.permute.xlu0 %2920 }
0x198d   :  { %v2637_v54 = vadd.f32 %v2635_v46, %v2632_v51  ;;  %v2652_v57 = vrot.slane %v2638_v56, 7 }
0x198e   :  { %v2923_v62 = vpop.permute.xlu1 %2922 }
0x198f   :  { %5817 = vmatprep.mubr.msk.f32.mxu1 %vm183_vm7, %v2637_v54  ;;  %v2654_v58 = vsel %vm2653_vm11, %v2652_v57, %v2637_v54 }
0x1990   :  { %5796 = vmatmul.mubr.msk.f32.vlgmr.msra.gmra.mxu0 %vm183_vm7, %v2654_v58  ;;  %5818 = vmatmul.mubr.msk.f32.vlgmr.msra.gmra.mxu1 %vm183_vm7, %v2638_v56  ;;  %v2919_v55 = vpop.permute.xlu0 %2918  ;;  %v3433_v58 = vsub.s32 2, %v6122_v1 }
0x1991   :  { %5799 = vmatpush3.msra.mxu0 %v2739_v59  ;;  %5806 = vmatprep.mubr.msk.f32.mxu0 %vm6050_vm8, %v7768_v21 }
0x1992   :  { %5800 = vmatprep.subr.mxu0 %v7768_v21  ;;  %5833 = vmatprep.mubr.msk.f32.mxu1 %vm6050_vm8, %v7768_v21  ;;  %v2833_v6 = vpop.permute.xlu1 %2832 }
0x1993   :  { %5801 = vmatpush3.msra.mxu0 %v2737_v61  ;;  %5832 = vmatpush3.msra.mxu1 %v6704_v16 }
0x1994   :  { %5802 = vmatprep.subr.mxu0 %v7768_v21  ;;  %5841 = vmatprep.subr.mxu1 %v7768_v21  ;;  %v2929_v38 = vpop.permute.xlu0 %2928 }
0x1995   :  { %5803 = vmatpush3.msra.mxu0 %v2735_v60  ;;  %v6760_v60 = vld [vmem:[%s7763_s2] sm:$0x3] }
0x1996   :  { %5804 = vmatprep.subr.mxu0 %v7768_v21  ;;  %v2917_v10 = vpop.permute.xlu1 %2916  ;;  %vm3219_vm12 = vcmp.gt.f32.partialorder %v6760_v60, 0.0 }
0x1997   :  { %5805 = vmatpush3.msra.mxu0 %v2733_v14  ;;  %v7767_v14 = vmov 0  }
0x1998   :  { %5820 = vmatprep.subr.mxu0 %v2923_v62 }
0x1a50   :  { %v2723_v63 = vpop.f32.mrf.mxu0  ;;  %v5819_v2 = vpop.f32.mrf.mxu1 }
0x1a51   :  { %v2724_v0 = vadd.f32 %v5421_v28, %v2723_v63  ;;  %v2911_v9 = vadd.f32 %v5819_v2, %v2833_v6  ;;  %v6061_v63 = vmov 2   ;;  %v6773_v2 = vsub.s32 %v6169_v19, %v6122_v1 }
0x1a52   :  { %v5797_v11 = vpop.f32.mrf.mxu0  ;;  %v2905_v3 = vpop.f32.mrf.mxu1  ;;  %5904 = vset.pattern.permute.xlu1 %v6061_v63 }
0x1a53   :  { %5979 = vtanh.f32 %v2724_v0  ;;  %v2906_v7 = vadd.f32 %v2905_v3, %v2833_v6  ;;  %v2915_v15 = vmax.f32 %v2911_v9, 0.0 }
0x1a55   :  { %v2914_v49 = vmax.f32 %v2906_v7, 0.0 }
0x1a60   :  { %v5980_v8 = vpop.eup %5979 }
0x1a61   :  { %5807 = vmatmul.mubr.msk.f32.vlgmr.msra.gmra.mxu0 %vm183_vm7, %v5980_v8 }
0x1a62   :  { %5821 = vmatpush3.msra.mxu0 %v2923_v62  ;;  %5828 = vmatprep.mubr.msk.f32.mxu0 %vm183_vm7, %v2914_v49  ;;  %v6767_v62 = vsel %vm3219_vm12, 1, %v7767_v14 }
0x1a63   :  { %5822 = vmatprep.subr.mxu0 %v2921_v37 }
0x1a64   :  { %5823 = vmatpush3.msra.mxu0 %v2921_v37 }
0x1a65   :  { %5824 = vmatprep.subr.mxu0 %v2919_v55 }
0x1a66   :  { %5825 = vmatpush3.msra.mxu0 %v2919_v55 }
0x1a67   :  { %5826 = vmatprep.subr.mxu0 %v2917_v10 }
0x1a68   :  { %5827 = vmatpush3.msra.mxu0 %v2917_v10 }
0x1a69   :  { %5829 = vmatmul.mubr.msk.f32.vlgmr.msra.gmra.mxu0 %vm183_vm7, %v2915_v15  ;;  %5836 = vmatprep.subr.mxu0 %v7768_v21 }
0x1a6a   :  { %5838 = vmatprep.mubr.msk.f32.mxu0 %vm6050_vm8, %v7768_v21  ;;  %5837 = vmatpush3.msra.mxu0 %v6704_v16 }
0x1a6b   :  { %5846 = vmatprep.subr.mxu0 %v7768_v21 }
0x1b21   :  { %v6710_v20 = vpop.f32.mrf.mxu0 }
0x1b22   :  { %7780 = vst [vmem:[#allocation2_spill] sm:$0xff] %v6710_v20 }
0x1b23   :  { %v5808_v35 = vpop.f32.mrf.mxu0 }
0x1b29   :  { %v5830_v24 = vpop.f32.mrf.mxu0 }
0x1b2a   :  { %v6712_v25 = vadd.f32 %v5830_v24, %v2929_v38 }
0x1b2b   :  { %v3003_v26 = vpop.f32.mrf.mxu0 }
0x1b2c   :  { %v6714_v27 = vadd.f32 %v3003_v26, %v2929_v38  ;;  %v3189_v13 = vrot.slane %v6712_v25, %v6134_v5  ;;  %v3027_v32 = vrot.slane %v6712_v25, 7  ;;  %v3441_v61 = vrot.slane %v6712_v25, %v3433_v58 }
0x1b2e   :  { %3191 = vbcast.lane.b32.xlu0 %v3189_v13, 256  ;;  %v3182_v41 = vrot.slane %v6714_v27, %v6134_v5  ;;  %v3028_v23 = vsel %vm2653_vm11, %v3027_v32, %v6714_v27  ;;  %v3434_v59 = vrot.slane %v6714_v27, %v3433_v58 }
0x1b2f   :  { %v6726_v34 = vadd.f32 %v5429_v33, %v3028_v23 }
0x1b30   :  { %3184 = vbcast.lane.b32.xlu1 %v3182_v41, 256 }
0x1b31   :  { %7781 = vst [vmem:[#allocation3_spill] sm:$0xff] %v6726_v34  ;;  %v3151_v36 = vrot.slane %v6726_v34, %v6267_v30 }
0x1b33   :  { %v3152_v12 = vcombine.high %v3151_v36, %v3151_v36  ;;  %v3159_v5 = vrot.slane %v3151_v36, %v6267_v30 }
0x1b35   :  { %v3166_v28 = vrot.slane %v3152_v12, %v6267_v30  ;;  %v3170_v40 = vrot.slane %v3159_v5, %v6131_v4 }
0x1b37   :  { %v3174_v39 = vrot.slane %v3166_v28, %v6131_v4  ;;  %v3177_v44 = vadd.f32 %v3170_v40, %v6704_v16 }
0x1b39   :  { %v3178_v42 = vadd.f32 %v3174_v39, %v6704_v16 }
0x1ba0   :  { %v3192_v43 = vpop.permute.xlu0 %3191 }
0x1ba1   :  { %v6735_v17 = vadd.f32 %v3192_v43, %v3178_v42 }
0x1ba2   :  { %v3185_v45 = vpop.permute.xlu1 %3184 }
0x1ba3   :  { %v6738_v46 = vadd.f32 %v3185_v45, %v3177_v44  ;;  %v3198_v22 = vsel %vm519_vm10, %v6735_v17, -inf }
0x1ba4   :  { %3199 = vmax.xlane.f32.xlu0 %v3198_v22 }
0x1ba5   :  { %v3195_v47 = vsel %vm519_vm10, %v6738_v46, -inf }
0x1ba6   :  { %3196 = vmax.xlane.f32.xlu1 %v3195_v47 }
0x1c2d   :  { %v6745_v29 = vpop.xlane.xlu0 %3199 }
0x1c2e   :  { %v3202_v31 = vsub.f32 %v6735_v17, %v6745_v29  ;;  %v3281_v6 = vrot.slane %v6745_v29, %v6773_v2 }
0x1c2f   :  { %v6749_v18 = vpop.xlane.xlu1 %3196 }
0x1c30   :  { %v3205_v52 = vmul.f32 1.442695, %v3202_v31  ;;  %v3201_v50 = vsub.f32 %v6738_v46, %v6749_v18  ;;  %v3277_v3 = vrot.slane %v6749_v18, %v6773_v2 }
0x1c32   :  { %5981 = vpow2.f32 %v3205_v52  ;;  %v3203_v53 = vmul.f32 1.442695, %v3201_v50  ;;  %v3282_v37 = vsel %vm2653_vm11, %v3281_v6, %v3277_v3  ;;  %v7774_v3 = vmov 3  }
0x1c34   :  { %5983 = vpow2.f32 %v3203_v53 }
0x1c3f   :  { %v5982_v51 = vpop.eup %5981 }
0x1c40   :  { %v3210_v56 = vsel %vm519_vm10, %v5982_v51, 0.0 }
0x1c41   :  { %v5984_v54 = vpop.eup %5983  ;;  %3211 = vadd.xlane.f32.xlu1 %v3210_v56  ;;  %v3726_v56 = vsub.s32 3, %v6122_v1 }
0x1c42   :  { %v3207_v57 = vsel %vm519_vm10, %v5984_v54, 0.0 }
0x1c43   :  { %3208 = vadd.xlane.f32.xlu0 %v3207_v57  ;;  %v3727_v54 = vrot.slane %v6714_v27, %v3726_v56 }
0x1c52   :  { %3436 = vbcast.lane.b32.xlu1 %v3434_v59, 256 }
0x1c56   :  { %3443 = vbcast.lane.b32.xlu1 %v3441_v61, 256 }
0x1c59   :  { %3222 = vperm.xlu0 %5903, %v6767_v62  }
0x1c5d   :  { %5905 = vset.pattern.permute.xlu0 %v7774_v3 }
0x1cca   :  { %v3212_v0 = vpop.xlane.xlu1 %3211 }
0x1ccb   :  { %5985 = vlog2.f32 %v3212_v0 }
0x1ccc   :  { %v3209_v11 = vpop.xlane.xlu0 %3208 }
0x1ccd   :  { %5987 = vlog2.f32 %v3209_v11  ;;  %v3734_v11 = vrot.slane %v6712_v25, %v3726_v56 }
0x1cce   :  { %v3437_v38 = vpop.permute.xlu1 %3436 }
0x1cd2   :  { %v3444_v39 = vpop.permute.xlu1 %3443 }
0x1cd4   :  { %v3223_v7 = vpop.permute.xlu0 %3222 }
0x1cd5   :  { %vm3224_vm13 = vcmp.eq.s32.totalorder %v3223_v7, 1 }
0x1cd6   :  { %v3284_v8 = vsel %vm3224_vm13, %v3282_v37, %v6726_v34 }
0x1cd7   :  { %v3495_v49 = vrot.slane %v3284_v8, %v6267_v30 }
0x1cd8   :  { %v5986_v55 = vpop.eup %5985 }
0x1cd9   :  { %v3216_v9 = vmul.f32 0.6931472, %v5986_v55  ;;  %v3496_v10 = vcombine.high %v3495_v49, %v3495_v49  ;;  %v3503_v15 = vrot.slane %v3495_v49, %v6267_v30 }
0x1cda   :  { %v5988_v35 = vpop.eup %5987 }
0x1cdb   :  { %v3218_v24 = vadd.f32 %v3216_v9, %v6745_v29  ;;  %v3214_v26 = vmul.f32 0.6931472, %v5988_v35  ;;  %v3510_v13 = vrot.slane %v3496_v10, %v6267_v30  ;;  %v3514_v41 = vrot.slane %v3503_v15, %v6131_v4 }
0x1cdd   :  { %v3217_v32 = vadd.f32 %v3214_v26, %v6749_v18  ;;  %v3521_v33 = vadd.f32 %v3514_v41, %v6704_v16  ;;  %v3518_v23 = vrot.slane %v3510_v13, %v6131_v4  ;;  %v3234_v36 = vrot.slane %v3218_v24, %v6773_v2 }
0x1cdf   :  { %v3230_v12 = vrot.slane %v3217_v32, %v6773_v2  ;;  %v6792_v28 = vadd.f32 %v3521_v33, %v3437_v38  ;;  %v3522_v5 = vadd.f32 %v3518_v23, %v6704_v16 }
0x1ce1   :  { %v3235_v40 = vsel %vm2653_vm11, %v3234_v36, %v3230_v12  ;;  %v3525_v42 = vsel %vm519_vm10, %v6792_v28, -inf  ;;  %v6798_v43 = vadd.f32 %v3522_v5, %v3444_v39 }
0x1ce2   :  { %v6802_v44 = vsel %vm3224_vm13, %v3235_v40, %v6726_v34  ;;  %3526 = vmax.xlane.f32.xlu1 %v3525_v42  ;;  %vm3032_vm13 = vcmask 58368  }
0x1ce3   :  { %v3403_v45 = vrot.slane %v6802_v44, %v6267_v30  ;;  %v3528_v47 = vsel %vm519_vm10, %v6798_v43, -inf }
0x1ce5   :  { %v3404_v22 = vcombine.high %v3403_v45, %v3403_v45  ;;  %v3411_v57 = vrot.slane %v3403_v45, %v6267_v30 }
0x1ce6   :  { %3529 = vmax.xlane.f32.xlu1 %v3528_v47 }
0x1ce7   :  { %v3418_v31 = vrot.slane %v3404_v22, %v6267_v30  ;;  %v3422_v58 = vrot.slane %v3411_v57, %v6131_v4  ;;  %v7775_v57 = vmov 4  }
0x1ce9   :  { %v3426_v52 = vrot.slane %v3418_v31, %v6131_v4  ;;  %v3429_v59 = vadd.f32 %v3422_v58, %v6704_v16 }
0x1ceb   :  { %v3430_v50 = vadd.f32 %v3426_v52, %v6704_v16  ;;  %v3445_v61 = vadd.f32 %v3437_v38, %v3429_v59 }
0x1ced   :  { %v3446_v53 = vadd.f32 %v3444_v39, %v3430_v50  ;;  %v3447_v0 = vsel %vm519_vm10, %v3445_v61, -inf }
0x1cef   :  { %v3450_v51 = vsel %vm519_vm10, %v3446_v53, -inf }
0x1cf0   :  { %3451 = vmax.xlane.f32.xlu0 %v3450_v51 }
0x1cf7   :  { %3472 = vperm.xlu1 %5904, %v6767_v62  }
0x1cfb   :  { %5906 = vset.pattern.permute.xlu1 %v7775_v57 }
0x1d06   :  { %3729 = vbcast.lane.b32.xlu0 %v3727_v54, 256 }
0x1d1b   :  { %3448 = vmax.xlane.f32.xlu1 %v3447_v0 }
0x1d2c   :  { %3736 = vbcast.lane.b32.xlu1 %v3734_v11, 256 }
0x1d6b   :  { %v6821_v6 = vpop.xlane.xlu1 %3526 }
0x1d6c   :  { %v3570_v49 = vrot.slane %v6821_v6, %v6773_v2 }
0x1d6f   :  { %v6823_v7 = vpop.xlane.xlu1 %3529 }
0x1d70   :  { %v3574_v37 = vrot.slane %v6823_v7, %v6773_v2 }
0x1d72   :  { %v3575_v9 = vsel %vm2653_vm11, %v3574_v37, %v3570_v49 }
0x1d73   :  { %v6829_v55 = vpop.permute.xlu1 %3472 }
0x1d74   :  { %vm3474_vm14 = vcmp.eq.s32.totalorder %v6829_v55, 1 }
0x1d75   :  { %v3577_v10 = vsel %vm3474_vm14, %v3575_v9, %v3284_v8  ;;  %v4019_v8 = vsub.s32 4, %v6122_v1 }
0x1d76   :  { %v3788_v15 = vrot.slane %v3577_v10, %v6267_v30 }
0x1d77   :  { %v4020_v33 = vrot.slane %v6714_v27, %v4019_v8  ;;  %v4027_v54 = vrot.slane %v6712_v25, %v4019_v8 }
0x1d78   :  { %v3796_v35 = vrot.slane %v3788_v15, %v6267_v30  ;;  %v3789_v23 = vcombine.high %v3788_v15, %v3788_v15 }
0x1d79   :  { %v6837_v38 = vpop.xlane.xlu0 %3451 }
0x1d7a   :  { %v3807_v24 = vrot.slane %v3796_v35, %v6131_v4  ;;  %v3803_v36 = vrot.slane %v3789_v23, %v6267_v30  ;;  %v3454_v12 = vsub.f32 %v3446_v53, %v6837_v38 }
0x1d7c   :  { %v3814_v26 = vadd.f32 %v3807_v24, %v6704_v16  ;;  %v3811_v5 = vrot.slane %v3803_v36, %v6131_v4  ;;  %v3457_v42 = vmul.f32 1.442695, %v3454_v12 }
0x1d7d   :  { %v6841_v13 = vpop.permute.xlu0 %3729 }
0x1d7e   :  { %v6844_v41 = vadd.f32 %v3814_v26, %v6841_v13  ;;  %v3815_v22 = vadd.f32 %v3811_v5, %v6704_v16 }
0x1d80   :  { %v3818_v32 = vsel %vm519_vm10, %v6844_v41, -inf }
0x1d81   :  { %3819 = vmax.xlane.f32.xlu1 %v3818_v32 }
0x1d92   :  { %4022 = vbcast.lane.b32.xlu1 %v4020_v33, 256 }
0x1da4   :  { %v3449_v39 = vpop.xlane.xlu1 %3448 }
0x1da5   :  { %v3453_v40 = vsub.f32 %v3445_v61, %v3449_v39 }
0x1da7   :  { %v3455_v45 = vmul.f32 1.442695, %v3453_v40 }
0x1da8   :  { %v6854_v47 = vpop.permute.xlu1 %3736 }
0x1da9   :  { %5989 = vpow2.f32 %v3455_v45  ;;  %v6857_v31 = vadd.f32 %v3815_v22, %v6854_v47 }
0x1daa   :  { %5991 = vpow2.f32 %v3457_v42 }
0x1dab   :  { %v3821_v52 = vsel %vm519_vm10, %v6857_v31, -inf }
0x1dac   :  { %3822 = vmax.xlane.f32.xlu0 %v3821_v52 }
0x1db6   :  { %v5990_v50 = vpop.eup %5989 }
0x1db7   :  { %v3459_v53 = vsel %vm519_vm10, %v5990_v50, 0.0  ;;  %v5992_v51 = vpop.eup %5991 }
0x1db8   :  { %3460 = vadd.xlane.f32.xlu1 %v3459_v53  ;;  %v3462_v56 = vsel %vm519_vm10, %v5992_v51, 0.0 }
0x1dbc   :  { %3463 = vadd.xlane.f32.xlu1 %v3462_v56 }
0x1dc2   :  { %3765 = vperm.xlu0 %5905, %v6767_v62  }
0x1dcd   :  { %4029 = vbcast.lane.b32.xlu1 %v4027_v54, 256 }
0x1e0a   :  { %v6866_v58 = vpop.xlane.xlu1 %3819 }
0x1e0b   :  { %v3863_v0 = vrot.slane %v6866_v58, %v6773_v2 }
0x1e0e   :  { %v6874_v11 = vpop.permute.xlu1 %4022 }
0x1e35   :  { %v6868_v59 = vpop.xlane.xlu0 %3822 }
0x1e36   :  { %v3867_v61 = vrot.slane %v6868_v59, %v6773_v2 }
0x1e38   :  { %v3868_v49 = vsel %vm2653_vm11, %v3867_v61, %v3863_v0 }
0x1e3d   :  { %v6876_v37 = vpop.permute.xlu0 %3765 }
0x1e3e   :  { %vm3767_vm15 = vcmp.eq.s32.totalorder %v6876_v37, 1 }
0x1e3f   :  { %v3870_v9 = vsel %vm3767_vm15, %v3868_v49, %v3577_v10 }
0x1e40   :  { %v4081_v15 = vrot.slane %v3870_v9, %v6267_v30 }
0x1e41   :  { %v3461_v35 = vpop.xlane.xlu1 %3460 }
0x1e42   :  { %v4082_v24 = vcombine.high %v4081_v15, %v4081_v15  ;;  %v4089_v26 = vrot.slane %v4081_v15, %v6267_v30  ;;  %5993 = vlog2.f32 %v3461_v35 }
0x1e44   :  { %v4096_v32 = vrot.slane %v4082_v24, %v6267_v30  ;;  %v4100_v8 = vrot.slane %v4089_v26, %v6131_v4 }
0x1e45   :  { %v3464_v33 = vpop.xlane.xlu1 %3463 }
0x1e46   :  { %5995 = vlog2.f32 %v3464_v33  ;;  %v4104_v23 = vrot.slane %v4096_v32, %v6131_v4  ;;  %v4107_v36 = vadd.f32 %v4100_v8, %v6704_v16  ;;  %v4312_v33 = vsub.s32 5, %v6122_v1 }
0x1e48   :  { %v4108_v12 = vadd.f32 %v4104_v23, %v6704_v16  ;;  %v6890_v10 = vadd.f32 %v4107_v36, %v6874_v11  ;;  %v4313_v23 = vrot.slane %v6714_v27, %v4312_v33 }
0x1e49   :  { %v6892_v5 = vpop.permute.xlu1 %4029 }
0x1e4a   :  { %v6895_v40 = vadd.f32 %v4108_v12, %v6892_v5  ;;  %v4111_v42 = vsel %vm519_vm10, %v6890_v10, -inf }
0x1e4b   :  { %4112 = vmax.xlane.f32.xlu1 %v4111_v42  ;;  %v7773_v42 = vmov 5  }
0x1e4c   :  { %v4114_v45 = vsel %vm519_vm10, %v6895_v40, -inf }
0x1e4d   :  { %4115 = vmax.xlane.f32.xlu0 %v4114_v45 }
0x1e4f   :  { %v5994_v22 = vpop.eup %5993 }
0x1e50   :  { %v3466_v52 = vmul.f32 0.6931472, %v5994_v22 }
0x1e52   :  { %v3469_v53 = vadd.f32 %v3466_v52, %v3449_v39 }
0x1e53   :  { %v5996_v50 = vpop.eup %5995 }
0x1e54   :  { %v3468_v51 = vmul.f32 0.6931472, %v5996_v50  ;;  %v3480_v54 = vrot.slane %v3469_v53, %v6773_v2 }
0x1e56   :  { %v3470_v56 = vadd.f32 %v3468_v51, %v6837_v38 }
0x1e58   :  { %v3484_v61 = vrot.slane %v3470_v56, %v6773_v2 }
0x1e5a   :  { %v3485_v0 = vsel %vm2653_vm11, %v3484_v61, %v3480_v54 }
0x1e5b   :  { %v6908_v49 = vsel %vm3474_vm14, %v3485_v0, %v6802_v44 }
0x1e5c   :  { %4058 = vperm.xlu1 %5906, %v6767_v62   ;;  %v3696_v15 = vrot.slane %v6908_v49, %v6267_v30 }
0x1e5e   :  { %v3704_v39 = vrot.slane %v3696_v15, %v6267_v30  ;;  %v3697_v32 = vcombine.high %v3696_v15, %v3696_v15 }
0x1e60   :  { %v3715_v38 = vrot.slane %v3704_v39, %v6131_v4  ;;  %v3711_v44 = vrot.slane %v3697_v32, %v6267_v30  ;;  %5907 = vset.pattern.permute.xlu1 %v7773_v42 }
0x1e62   :  { %v3722_v35 = vadd.f32 %v3715_v38, %v6704_v16  ;;  %v3719_v55 = vrot.slane %v3711_v44, %v6131_v4 }
0x1e64   :  { %v3738_v24 = vadd.f32 %v6841_v13, %v3722_v35  ;;  %v3723_v8 = vadd.f32 %v3719_v55, %v6704_v16  ;;  %v4320_v13 = vrot.slane %v6712_v25, %v4312_v33 }
0x1e66   :  { %v3740_v26 = vsel %vm519_vm10, %v3738_v24, -inf  ;;  %v3739_v36 = vadd.f32 %v6854_v47, %v3723_v8 }
0x1e67   :  { %3741 = vmax.xlane.f32.xlu0 %v3740_v26 }
0x1e68   :  { %v3743_v12 = vsel %vm519_vm10, %v3739_v36, -inf }
0x1e7d   :  { %4315 = vbcast.lane.b32.xlu0 %v4313_v23, 256  ;;  %v4605_v23 = vsub.s32 6, %v6122_v1 }
0x1e80   :  { %3744 = vmax.xlane.f32.xlu1 %v3743_v12  ;;  %v4606_v12 = vrot.slane %v6714_v27, %v4605_v23 }
0x1e81   :  { %4322 = vbcast.lane.b32.xlu0 %v4320_v13, 256 }
0x1ed4   :  { %v6927_v45 = vpop.xlane.xlu1 %4112 }
0x1ed5   :  { %v4156_v47 = vrot.slane %v6927_v45, %v6773_v2 }
0x1ed6   :  { %v6929_v22 = vpop.xlane.xlu0 %4115 }
0x1ed7   :  { %v4160_v52 = vrot.slane %v6929_v22, %v6773_v2 }
0x1ed8   :  { %v6933_v50 = vpop.permute.xlu1 %4058 }
0x1ed9   :  { %vm4060_vm1 = vcmp.eq.s32.totalorder %v6933_v50, 1  ;;  %v4161_v53 = vsel %vm2653_vm11, %v4160_v52, %v4156_v47 }
0x1eda   :  { %v4163_v51 = vsel %vm4060_vm1, %v4161_v53, %v3870_v9 }
0x1edb   :  { %v4374_v56 = vrot.slane %v4163_v51, %v6267_v30 }
0x1edd   :  { %v4375_v54 = vcombine.high %v4374_v56, %v4374_v56  ;;  %v4382_v61 = vrot.slane %v4374_v56, %v6267_v30 }
0x1edf   :  { %v4389_v0 = vrot.slane %v4375_v54, %v6267_v30  ;;  %v4393_v15 = vrot.slane %v4382_v61, %v6131_v4 }
0x1ee1   :  { %v4400_v38 = vadd.f32 %v4393_v15, %v6704_v16  ;;  %v4397_v35 = vrot.slane %v4389_v0, %v6131_v4 }
0x1ee3   :  { %v4401_v44 = vadd.f32 %v4397_v35, %v6704_v16  ;;  %v7772_v35 = vmov 6  }
0x1ef0   :  { %v6945_v39 = vpop.xlane.xlu0 %3741 }
0x1ef1   :  { %v3746_v47 = vsub.f32 %v3738_v24, %v6945_v39 }
0x1ef3   :  { %v3748_v56 = vmul.f32 1.442695, %v3746_v47 }
0x1ef4   :  { %v6949_v26 = vpop.permute.xlu0 %4315 }
0x1ef5   :  { %v6952_v32 = vadd.f32 %v4400_v38, %v6949_v26  ;;  %v4613_v38 = vrot.slane %v6712_v25, %v4605_v23 }
0x1ef7   :  { %v4404_v9 = vsel %vm519_vm10, %v6952_v32, -inf }
0x1ef8   :  { %4405 = vmax.xlane.f32.xlu0 %v4404_v9  ;;  %v6957_v55 = vpop.permute.xlu0 %4322 }
0x1ef9   :  { %v6960_v8 = vadd.f32 %v4401_v44, %v6957_v55 }
0x1efb   :  { %v4407_v33 = vsel %vm519_vm10, %v6960_v8, -inf }
0x1efc   :  { %4408 = vmax.xlane.f32.xlu1 %v4407_v33 }
0x1f09   :  { %v3745_v13 = vpop.xlane.xlu1 %3744 }
0x1f0a   :  { %v3747_v52 = vsub.f32 %v3739_v36, %v3745_v13 }
0x1f0c   :  { %v3750_v53 = vmul.f32 1.442695, %v3747_v52 }
0x1f0d   :  { %4351 = vperm.xlu1 %5907, %v6767_v62  }
0x1f0e   :  { %4608 = vbcast.lane.b32.xlu0 %v4606_v12, 256  ;;  %5997 = vpow2.f32 %v3750_v53 }
0x1f0f   :  { %5999 = vpow2.f32 %v3748_v56 }
0x1f11   :  { %5908 = vset.pattern.permute.xlu1 %v7772_v35 }
0x1f1b   :  { %v5998_v54 = vpop.eup %5997 }
0x1f1c   :  { %v3755_v61 = vsel %vm519_vm10, %v5998_v54, 0.0  ;;  %v6000_v0 = vpop.eup %5999 }
0x1f1d   :  { %v3752_v15 = vsel %vm519_vm10, %v6000_v0, 0.0 }
0x1f2d   :  { %3756 = vadd.xlane.f32.xlu0 %v3755_v61 }
0x1f31   :  { %3753 = vadd.xlane.f32.xlu1 %v3752_v15 }
0x1f43   :  { %4615 = vbcast.lane.b32.xlu0 %v4613_v38, 256 }
0x1f81   :  { %v6972_v36 = vpop.xlane.xlu0 %4405 }
0x1f82   :  { %v4449_v44 = vrot.slane %v6972_v36, %v6773_v2 }
0x1f85   :  { %v6974_v24 = vpop.xlane.xlu1 %4408  ;;  %v6990_v54 = vpop.permute.xlu0 %4608 }
0x1f86   :  { %v4453_v9 = vrot.slane %v6974_v24, %v6773_v2 }
0x1f88   :  { %v4454_v23 = vsel %vm2653_vm11, %v4453_v9, %v4449_v44 }
0x1f89   :  { %v6980_v33 = vpop.permute.xlu1 %4351 }
0x1f8a   :  { %vm4353_vm2 = vcmp.eq.s32.totalorder %v6980_v33, 1  ;;  %v7285_v33 = vld [vmem:[%s7764_s7 + $0x2] sm:$0xff] }
0x1f8b   :  { %v4456_v12 = vsel %vm4353_vm2, %v4454_v23, %v4163_v51 }
0x1f8c   :  { %v4667_v52 = vrot.slane %v4456_v12, %v6267_v30 }
0x1f8e   :  { %v4675_v47 = vrot.slane %v4667_v52, %v6267_v30  ;;  %v4668_v15 = vcombine.high %v4667_v52, %v4667_v52 }
0x1f90   :  { %v4686_v53 = vrot.slane %v4675_v47, %v6131_v4  ;;  %v4682_v51 = vrot.slane %v4668_v15, %v6267_v30 }
0x1f92   :  { %v4693_v56 = vadd.f32 %v4686_v53, %v6704_v16  ;;  %v4690_v38 = vrot.slane %v4682_v51, %v6131_v4 }
0x1f94   :  { %v6993_v61 = vadd.f32 %v4693_v56, %v6990_v54  ;;  %v4694_v44 = vadd.f32 %v4690_v38, %v6704_v16 }
0x1f96   :  { %v4697_v0 = vsel %vm519_vm10, %v6993_v61, -inf }
0x1f97   :  { %4698 = vmax.xlane.f32.xlu0 %v4697_v0 }
0x1fb6   :  { %v3757_v9 = vpop.xlane.xlu0 %3756 }
0x1fb7   :  { %6001 = vlog2.f32 %v3757_v9 }
0x1fba   :  { %v3754_v23 = vpop.xlane.xlu1 %3753  ;;  %v7000_v47 = vpop.permute.xlu0 %4615 }
0x1fbb   :  { %6003 = vlog2.f32 %v3754_v23  ;;  %v7003_v53 = vadd.f32 %v4694_v44, %v7000_v47  ;;  %v4905_v44 = vsub.s32 7, %v6122_v1 }
0x1fbd   :  { %v4700_v56 = vsel %vm519_vm10, %v7003_v53, -inf }
0x1fbe   :  { %4701 = vmax.xlane.f32.xlu1 %v4700_v56 }
0x1fc4   :  { %v6002_v52 = vpop.eup %6001 }
0x1fc5   :  { %v3761_v0 = vmul.f32 0.6931472, %v6002_v52 }
0x1fc7   :  { %v3763_v14 = vadd.f32 %v3761_v0, %v3745_v13  ;;  %v4906_v13 = vrot.slane %v6714_v27, %v4905_v44 }
0x1fc8   :  { %v6004_v15 = vpop.eup %6003 }
0x1fc9   :  { %v3759_v51 = vmul.f32 0.6931472, %v6004_v15  ;;  %v3777_v38 = vrot.slane %v3763_v14, %v6773_v2 }
0x1fcb   :  { %v3762_v9 = vadd.f32 %v3759_v51, %v6945_v39  ;;  %v7770_v51 = vmov 7  }
0x1fcc   :  { %5909 = vset.pattern.permute.xlu0 %v7770_v51 }
0x1fcd   :  { %v3773_v21 = vrot.slane %v3762_v9, %v6773_v2 }
0x1fcf   :  { %v3778_v23 = vsel %vm2653_vm11, %v3777_v38, %v3773_v21  ;;  %4644 = vperm.xlu1 %5908, %v6767_v62   ;;  %v4913_v21 = vrot.slane %v6712_v25, %v4905_v44 }
0x1fd0   :  { %v7016_v56 = vsel %vm3767_vm15, %v3778_v23, %v6908_v49  ;;  %vm4411_vm15 = vcmp.ge.f32.partialorder %v6960_v8, %v6974_v24 }
0x1fd1   :  { %v3989_v39 = vrot.slane %v7016_v56, %v6267_v30 }
0x1fd3   :  { %4908 = vbcast.lane.b32.xlu1 %v4906_v13, 256  ;;  %v3997_v14 = vrot.slane %v3989_v39, %v6267_v30  ;;  %v3990_v0 = vcombine.high %v3989_v39, %v3989_v39 }
0x1fd4   :  { %5911 = vset.pattern.permute.xlu1 %v6061_v63 }
0x1fd5   :  { %v4008_v52 = vrot.slane %v3997_v14, %v6131_v4  ;;  %v4004_v15 = vrot.slane %v3990_v0, %v6267_v30 }
0x1fd7   :  { %4915 = vbcast.lane.b32.xlu1 %v4913_v21, 256  ;;  %v4015_v1 = vadd.f32 %v4008_v52, %v6704_v16  ;;  %v4012_v63 = vrot.slane %v4004_v15, %v6131_v4 }
0x1fd9   :  { %v4031_v37 = vadd.f32 %v6874_v11, %v4015_v1  ;;  %v4016_v9 = vadd.f32 %v4012_v63, %v6704_v16 }
0x1fdb   :  { %v4033_v49 = vsel %vm519_vm10, %v4031_v37, -inf  ;;  %v4032_v38 = vadd.f32 %v6892_v5, %v4016_v9 }
0x1fdc   :  { %4034 = vmax.xlane.f32.xlu0 %v4033_v49 }
0x1fdd   :  { %v4036_v23 = vsel %vm519_vm10, %v4032_v38, -inf }
0x1ffb   :  { %4037 = vmax.xlane.f32.xlu1 %v4036_v23 }
0x2020   :  { %v4699_v44 = vpop.xlane.xlu0 %4698 }
0x2021   :  { %v4742_v39 = vrot.slane %v4699_v44, %v6773_v2  ;;  %vm4703_vm4 = vcmp.ge.f32.partialorder %v6993_v61, %v4699_v44 }
0x2047   :  { %v7034_v11 = vpop.xlane.xlu1 %4701 }
0x2048   :  { %v4746_v13 = vrot.slane %v7034_v11, %v6773_v2  ;;  %vm4704_vm14 = vcmp.ge.f32.partialorder %v7003_v53, %v7034_v11 }
0x204a   :  { %v4747_v21 = vsel %vm2653_vm11, %v4746_v13, %v4742_v39 }
0x204b   :  { %v7039_v14 = vpop.permute.xlu1 %4644 }
0x204c   :  { %vm4646_vm3 = vcmp.eq.s32.totalorder %v7039_v14, 1 }
0x204d   :  { %v4749_v5 = vsel %vm4646_vm3, %v4747_v21, %v4456_v12 }
0x204e   :  { %v4967_v52 = vrot.slane %v4749_v5, %v6267_v30 }
0x204f   :  { %v7047_v0 = vpop.permute.xlu1 %4908 }
0x2050   :  { %v4968_v1 = vcombine.high %v4967_v52, %v4967_v52  ;;  %v4975_v49 = vrot.slane %v4967_v52, %v6267_v30 }
0x2052   :  { %v4982_v15 = vrot.slane %v4968_v1, %v6267_v30  ;;  %v4986_v63 = vrot.slane %v4975_v49, %v6131_v4 }
0x2053   :  { %v7055_v12 = vpop.permute.xlu1 %4915 }
0x2054   :  { %v4993_v9 = vadd.f32 %v4986_v63, %v6704_v16  ;;  %v4990_v23 = vrot.slane %v4982_v15, %v6131_v4 }
0x2056   :  { %v4995_v13 = vadd.f32 %v4993_v9, %v7047_v0  ;;  %v4994_v39 = vadd.f32 %v4990_v23, %v6704_v16 }
0x2058   :  { %v4996_v21 = vadd.f32 %v4994_v39, %v7055_v12  ;;  %v4997_v52 = vsel %vm519_vm10, %v4995_v13, -inf }
0x2059   :  { %4998 = vmax.xlane.f32.xlu0 %v4997_v52 }
0x205a   :  { %v5000_v51 = vsel %vm519_vm10, %v4996_v21, -inf }
0x205d   :  { %5001 = vmax.xlane.f32.xlu0 %v5000_v51 }
0x2065   :  { %v7060_v1 = vpop.xlane.xlu0 %4034 }
0x2066   :  { %v4039_v49 = vsub.f32 %v4031_v37, %v7060_v1 }
0x2068   :  { %v4041_v63 = vmul.f32 1.442695, %v4039_v49 }
0x206a   :  { %6005 = vpow2.f32 %v4041_v63 }
0x2073   :  { %4944 = vperm.xlu0 %5909, %v6767_v62   ;;  %v4705_v62 = vsel %vm4703_vm4, %v6169_v19, 8 }
0x2074   :  { %v4707_v63 = vsel %vm519_vm10, %v4705_v62, 2147483647 }
0x2077   :  { %v6006_v15 = vpop.eup %6005  ;;  %5910 = vset.pattern.permute.xlu0 %v6059_v48 }
0x2078   :  { %v4045_v9 = vsel %vm519_vm10, %v6006_v15, 0.0 }
0x2079   :  { %4046 = vadd.xlane.f32.xlu1 %v4045_v9 }
0x2084   :  { %v7066_v23 = vpop.xlane.xlu1 %4037 }
0x2085   :  { %v4040_v39 = vsub.f32 %v4032_v38, %v7066_v23 }
0x2087   :  { %v4043_v52 = vmul.f32 1.442695, %v4040_v39  ;;  %v4709_v39 = vshra.s32 %v4707_v63, 16 }
0x2089   :  { %6007 = vpow2.f32 %v4043_v52  ;;  %v4711_v44 = vcvt.s32.f32 %v4709_v39  ;;  %v4706_v39 = vsel %vm4704_vm14, %v6169_v19, 8 }
0x2096   :  { %v6008_v51 = vpop.eup %6007 }
0x2097   :  { %v4048_v35 = vsel %vm519_vm10, %v6008_v51, 0.0  ;;  %v5444_v51 = vld [vmem:[%s7764_s7 + $0x1] ss:$0 sm:$0xff] }
0x2098   :  { %4049 = vadd.xlane.f32.xlu1 %v4048_v35 }
0x20e2   :  { %v4999_v37 = vpop.xlane.xlu0 %4998 }
0x20e3   :  { %vm5003_vm5 = vcmp.ge.f32.partialorder %v4995_v13, %v4999_v37  ;;  %v5042_v52 = vrot.slane %v4999_v37, %v6773_v2 }
0x20e4   :  { %v5005_v48 = vsel %vm5003_vm5, %v6169_v19, 8 }
0x20e5   :  { %v5007_v49 = vsel %vm519_vm10, %v5005_v48, 2147483647 }
0x20e6   :  { %v5002_v15 = vpop.xlane.xlu0 %5001  ;;  %v5009_v38 = vshra.s32 %v5007_v49, 16 }
0x20e7   :  { %vm5004_vm6 = vcmp.ge.f32.partialorder %v4996_v21, %v5002_v15  ;;  %v5046_v35 = vrot.slane %v5002_v15, %v6773_v2 }
0x20e8   :  { %v5011_v9 = vcvt.s32.f32 %v5009_v38  ;;  %v5006_v61 = vsel %vm5004_vm6, %v6169_v19, 8  ;;  %vm4410_vm6 = vcmp.ge.f32.partialorder %v6952_v32, %v6972_v36  ;;  %v7130_v32 = vld [vmem:[%s7765_s3] sm:$0x3] }
0x20e9   :  { %v7084_v62 = vsel %vm519_vm10, %v5006_v61, 2147483647  ;;  %v5047_v21 = vsel %vm2653_vm11, %v5046_v35, %v5042_v52  ;;  %v4722_v61 = vsel %vm519_vm10, %v4706_v39, 2147483647  ;;  %v5008_v52 = vand.u32 65535, %v5007_v49 }
0x20ea   :  { %5012 = vmin.xlane.f32.xlu0 %v5011_v9  ;;  %v5024_v15 = vshra.s32 %v7084_v62, 16  ;;  %v4724_v53 = vshra.s32 %v4722_v61, 16 }
0x20ec   :  { %v7098_v35 = vcvt.s32.f32 %v5024_v15  ;;  %v4726_v11 = vcvt.s32.f32 %v4724_v53  ;;  %v5010_v15 = vcvt.s32.f32 %v5008_v52 }
0x20ee   :  { %4712 = vmin.xlane.f32.xlu0 %v4711_v44  ;;  %v7078_v13 = vpop.permute.xlu0 %4944 }
0x20ef   :  { %7782 = vst [vmem:[#allocation4_spill] sm:$0xff] %v7078_v13  ;;  %vm4946_vm7 = vcmp.eq.s32.totalorder %v7078_v13, 1 }
0x20f0   :  { %v5049_v48 = vsel %vm4946_vm7, %v5047_v21, %v4749_v5  ;;  %v5103_v5 = vsel %vm3032_vm13, %v6760_v60, 0.0 }
0x20f1   :  { %v7092_v37 = vadd.f32 %v5444_v51, %v5049_v48  ;;  %v4413_v51 = vsel %vm4411_vm15, %v6169_v19, 8  ;;  %v4708_v48 = vand.u32 65535, %v4707_v63  ;;  %vm4117_vm15 = vcmp.ge.f32.partialorder %v6890_v10, %v6927_v45 }
0x20f2   :  { %v4429_v39 = vsel %vm519_vm10, %v4413_v51, 2147483647  ;;  %v4723_v51 = vand.u32 65535, %v4722_v61  ;;  %v4119_v36 = vsel %vm4117_vm15, %v6169_v19, 8 }
0x20f3   :  { %v5083_v38 = vsel %vm3032_vm13, %v7092_v37, -inf  ;;  %v4710_v53 = vcvt.s32.f32 %v4708_v48  ;;  %v4431_v8 = vshra.s32 %v4429_v39, 16  ;;  %v7138_v61 = vsel %vm519_vm10, %v4119_v36, 2147483647 }
0x20f4   :  { %5084 = vmax.xlane.f32.xlu1 %v5083_v38 }
0x20f5   :  { %v4433_v3 = vcvt.s32.f32 %v4431_v8 }
0x20f8   :  { %5027 = vmin.xlane.f32.xlu1 %v7098_v35 }
0x20fc   :  { %5104 = vadd.xlane.f32.xlu1 %v5103_v5 }
0x2100   :  { %4727 = vmin.xlane.f32.xlu1 %v4726_v11 }
0x2102   :  { %v4047_v38 = vpop.xlane.xlu1 %4046 }
0x2121   :  { %v4050_v24 = vpop.xlane.xlu1 %4049 }
0x2122   :  { %6009 = vlog2.f32 %v4050_v24 }
0x2123   :  { %6011 = vlog2.f32 %v4047_v38 }
0x2173   :  { %v7107_v21 = vpop.xlane.xlu0 %5012 }
0x2174   :  { %vm5014_vm4 = vcmp.eq.f32.partialorder %v5011_v9, %v7107_v21  ;;  %v4412_v9 = vsel %vm4410_vm6, %v6169_v19, 8 }
0x2175   :  { %v7111_v42 = vsel %vm5014_vm4, %v5010_v15, inf  ;;  %v4414_v48 = vsel %vm519_vm10, %v4412_v9, 2147483647  ;;  %v4725_v15 = vcvt.s32.f32 %v4723_v51  ;;  %v6010_v51 = vpop.eup %6009 }
0x2176   :  { %v4415_v24 = vand.u32 65535, %v4414_v48 }
0x2177   :  { %v7113_v5 = vpop.xlane.xlu0 %4712 }
0x2178   :  { %vm4714_vm5 = vcmp.eq.f32.partialorder %v4711_v44, %v7113_v5 }
0x2179   :  { %v4715_v49 = vsel %vm4714_vm5, %v4710_v53, inf  ;;  %v4416_v53 = vshra.s32 %v4414_v48, 16 }
0x217a   :  { %4716 = vmin.xlane.f32.xlu1 %v4715_v49 }
0x217b   :  { %v4418_v49 = vcvt.s32.f32 %v4416_v53  ;;  %v4054_v53 = vmul.f32 0.6931472, %v6010_v51 }
0x217d   :  { %v5085_v57 = vpop.xlane.xlu1 %5084  ;;  %v4056_v20 = vadd.f32 %v4054_v53, %v7066_v23 }
0x217e   :  { %4434 = vmin.xlane.f32.xlu1 %v4433_v3  ;;  %vm5086_vm6 = vcmp.ge.f32.partialorder %v7092_v37, %v5085_v57 }
0x217f   :  { %v4070_v45 = vrot.slane %v4056_v20, %v6773_v2  ;;  %v4430_v20 = vand.u32 65535, %v4429_v39  ;;  %v5023_v39 = vand.u32 65535, %v7084_v62 }
0x2181   :  { %v7118_v63 = vpop.xlane.xlu1 %5027  ;;  %v4432_v50 = vcvt.s32.f32 %v4430_v20 }
0x2185   :  { %v7121_v52 = vpop.xlane.xlu1 %5104 }
0x2189   :  { %v7124_v44 = vpop.xlane.xlu1 %4727 }
0x218a   :  { %vm4729_vm14 = vcmp.eq.f32.partialorder %v4726_v11, %v7124_v44  ;;  %v4123_v11 = vshra.s32 %v7138_v61, 16 }
0x218b   :  { %v4730_v8 = vsel %vm4729_vm14, %v4725_v15, inf  ;;  %v6012_v15 = vpop.eup %6011  ;;  %vm4118_vm14 = vcmp.ge.f32.partialorder %v6895_v40, %v6929_v22  ;;  %v5019_v22 = vcvt.f32.s32 %v7107_v21 }
0x218c   :  { %4731 = vmin.xlane.f32.xlu0 %v4730_v8  ;;  %v7141_v9 = vcvt.s32.f32 %v4123_v11  ;;  %v4052_v8 = vmul.f32 0.6931472, %v6012_v15 }
0x218e   :  { %v4055_v10 = vadd.f32 %v4052_v8, %v7060_v1  ;;  %v4417_v1 = vcvt.s32.f32 %v4415_v24 }
0x2190   :  { %4419 = vmin.xlane.f32.xlu0 %v4418_v49  ;;  %v4066_v36 = vrot.slane %v4055_v10, %v6773_v2  ;;  %v5087_v10 = vsel %vm5086_vm6, %v6169_v19, 8  ;;  %vm3825_vm6 = vcmp.ge.f32.partialorder %v6857_v31, %v6868_v59 }
0x2192   :  { %v4071_v11 = vsel %vm2653_vm11, %v4070_v45, %v4066_v36 }
0x2193   :  { %v7156_v38 = vsel %vm4060_vm1, %v4071_v11, %v7016_v56  ;;  %vm5029_vm1 = vcmp.eq.f32.partialorder %v7098_v35, %v7118_v63 }
0x2194   :  { %v4282_v53 = vrot.slane %v7156_v38, %v6267_v30 }
0x2196   :  { %v4290_v48 = vrot.slane %v4282_v53, %v6267_v30  ;;  %v4283_v8 = vcombine.high %v4282_v53, %v4282_v53 }
0x2198   :  { %v4301_v45 = vrot.slane %v4290_v48, %v6131_v4  ;;  %v4297_v36 = vrot.slane %v4283_v8, %v6267_v30  ;;  %v4122_v48 = vand.u32 65535, %v7138_v61 }
0x219a   :  { %v4308_v11 = vadd.f32 %v4301_v45, %v6704_v16  ;;  %v4305_v24 = vrot.slane %v4297_v36, %v6131_v4 }
0x219c   :  { %v4309_v20 = vadd.f32 %v4305_v24, %v6704_v16  ;;  %v4120_v16 = vsel %vm4118_vm14, %v6169_v19, 8 }
0x21a6   :  { %3285 = vrot.lane.b32.xlu0 %v7130_v32, %s6067_s27 }
0x21c5   :  { %4126 = vmin.xlane.f32.xlu0 %v7141_v9 }
0x2203   :  { %v7148_v13 = vpop.xlane.xlu1 %4716 }
0x2207   :  { %v7158_v51 = vpop.xlane.xlu1 %4434 }
0x2208   :  { %vm4436_vm5 = vcmp.eq.f32.partialorder %v4433_v3, %v7158_v51  ;;  %v5025_v3 = vcvt.s32.f32 %v5023_v39 }
0x2209   :  { %v4437_v56 = vsel %vm4436_vm5, %v4432_v50, inf  ;;  %vm3824_vm5 = vcmp.ge.f32.partialorder %v6844_v41, %v6866_v58 }
0x220a   :  { %v5030_v37 = vsel %vm5029_vm1, %v5025_v3, inf  ;;  %v5034_v3 = vcvt.f32.s32 %v7118_v63 }
0x220c   :  { %v5035_v24 = vshll.u32 %v5034_v3, 16 }
0x2215   :  { %v7151_v34 = vpop.xlane.xlu0 %4731 }
0x2219   :  { %v7160_v23 = vpop.xlane.xlu0 %4419 }
0x221a   :  { %vm4421_vm4 = vcmp.eq.f32.partialorder %v4418_v49, %v7160_v23  ;;  %v5088_v49 = vsel %vm3032_vm13, %v5087_v10, 2147483647  ;;  %v4124_v10 = vcvt.s32.f32 %v4122_v48 }
0x221b   :  { %v4422_v15 = vsel %vm4421_vm4, %v4417_v1, inf  ;;  %v5090_v57 = vshra.s32 %v5088_v49, 16  ;;  %v4324_v1 = vadd.f32 %v6949_v26, %v4308_v11  ;;  %v4136_v26 = vsel %vm519_vm10, %v4120_v16, 2147483647 }
0x221c   :  { %4423 = vmin.xlane.f32.xlu1 %v4422_v15  ;;  %v5089_v11 = vand.u32 65535, %v5088_v49 }
0x221d   :  { %v5092_v62 = vcvt.s32.f32 %v5090_v57  ;;  %v4326_v15 = vsel %vm519_vm10, %v4324_v1, -inf  ;;  %v3286_v53 = vpop.permute.xlu0 %3285 }
0x221e   :  { %v3287_v50 = vsel %vm3219_vm12, %v7130_v32, %v3286_v53  ;;  %v5091_v53 = vcvt.s32.f32 %v5089_v11 }
0x2220   :  { %4438 = vmin.xlane.f32.xlu1 %v4437_v56  ;;  %v4138_v56 = vshra.s32 %v4136_v26, 16 }
0x2222   :  { %v4140_v8 = vcvt.s32.f32 %v4138_v56 }
0x2224   :  { %5016 = vmin.xlane.f32.xlu1 %v7111_v42  ;;  %v4325_v42 = vadd.f32 %v6957_v55, %v4309_v20 }
0x2226   :  { %v4329_v35 = vsel %vm519_vm10, %v4325_v42, -inf }
0x2228   :  { %5031 = vmin.xlane.f32.xlu1 %v5030_v37  ;;  %v5020_v37 = vshll.u32 %v5019_v22, 16  ;;  %v4137_v22 = vand.u32 65535, %v4136_v26 }
0x222a   :  { %v4139_v11 = vcvt.s32.f32 %v4137_v22  ;;  %v5866_v22 = vtrunc.f32 %v7121_v52 }
0x222c   :  { %5093 = vmin.xlane.f32.xlu1 %v5092_v62 }
0x2230   :  { %4327 = vmax.xlane.f32.xlu1 %v4326_v15 }
0x2234   :  { %4330 = vmax.xlane.f32.xlu1 %v4329_v35 }
0x2245   :  { %3578 = vrot.lane.b32.xlu1 %v3287_v50, %s6067_s27 }
0x224e   :  { %v7191_v55 = vpop.xlane.xlu0 %4126 }
0x224f   :  { %vm4128_vm15 = vcmp.eq.f32.partialorder %v7141_v9, %v7191_v55 }
0x2250   :  { %v4129_v39 = vsel %vm4128_vm15, %v4124_v10, inf }
0x2269   :  { %4141 = vmin.xlane.f32.xlu1 %v4140_v8 }
0x226d   :  { %4130 = vmin.xlane.f32.xlu1 %v4129_v39  ;;  %v3826_v39 = vsel %vm3824_vm5, %v6169_v19, 8 }
0x22a5   :  { %v7196_v45 = vpop.xlane.xlu1 %4423 }
0x22a9   :  { %v7198_v40 = vpop.xlane.xlu1 %4438 }
0x22ad   :  { %v5017_v36 = vpop.xlane.xlu1 %5016 }
0x22ae   :  { %v5018_v57 = vcvt.f32.s32 %v5017_v36 }
0x22b0   :  { %v5021_v20 = vadd.s32 %v5020_v37, %v5018_v57  ;;  %v3828_v57 = vsel %vm519_vm10, %v3826_v39, 2147483647  ;;  %v3827_v37 = vsel %vm3825_vm6, %v6169_v19, 8 }
0x22b1   :  { %v5032_v61 = vpop.xlane.xlu1 %5031 }
0x22b2   :  { %v5033_v9 = vcvt.f32.s32 %v5032_v61  ;;  %v5120_v50 = vrot.slane %v5021_v20, %v6773_v2 }
0x22b4   :  { %v5036_v15 = vadd.s32 %v5035_v24, %v5033_v9  ;;  %v3830_v24 = vshra.s32 %v3828_v57, 16 }
0x22b5   :  { %v7202_v35 = vpop.xlane.xlu1 %5093 }
0x22b6   :  { %v5124_v16 = vrot.slane %v5036_v15, %v6773_v2  ;;  %vm5095_vm4 = vcmp.eq.f32.partialorder %v5092_v62, %v7202_v35  ;;  %v3832_v20 = vcvt.s32.f32 %v3830_v24  ;;  %v5867_v24 = vcvt.f32.s32 %v5866_v22 }
0x22b7   :  { %v5096_v21 = vsel %vm5095_vm4, %v5091_v53, inf }
0x22b8   :  { %v7208_v63 = vsel %vm2653_vm11, %v5124_v16, %v5120_v50 }
0x22b9   :  { %v7210_v56 = vpop.xlane.xlu1 %4327 }
0x22ba   :  { %v4332_v62 = vsub.f32 %v4324_v1, %v7210_v56  ;;  %v3843_v1 = vsel %vm519_vm10, %v3827_v37, 2147483647 }
0x22bb   :  { %v3845_v31 = vshra.s32 %v3843_v1, 16  ;;  %v3844_v37 = vand.u32 65535, %v3843_v1 }
0x22bc   :  { %v4334_v36 = vmul.f32 1.442695, %v4332_v62 }
0x22bd   :  { %v7212_v49 = vpop.xlane.xlu1 %4330  ;;  %v3847_v59 = vcvt.s32.f32 %v3845_v31  ;;  %v7250_v31 = vadd.s32 4294967295, %v5867_v24 }
0x22be   :  { %v4333_v3 = vsub.f32 %v4325_v42, %v7212_v49  ;;  %6013 = vpow2.f32 %v4334_v36 }
0x22bf   :  { %vm5108_vm4 = vcmp.eq.s32.totalorder %v7250_v31, 7  ;;  %vm5110_vm6 = vcmp.ge.s32.totalorder %v7250_v31, 7 }
0x22c0   :  { %v4336_v41 = vmul.f32 1.442695, %v4333_v3 }
0x22c1   :  { %v3579_v48 = vpop.permute.xlu1 %3578 }
0x22c2   :  { %v3580_v10 = vsel %vm3219_vm12, %v7130_v32, %v3579_v48  ;;  %6015 = vpow2.f32 %v4336_v41 }
0x22c3   :  { %3871 = vrot.lane.b32.xlu0 %v3580_v10, %s6067_s27  ;;  %v3829_v10 = vand.u32 65535, %v3828_v57  ;;  %v5100_v57 = vcvt.f32.s32 %v7202_v35 }
0x22c5   :  { %v3831_v3 = vcvt.s32.f32 %v3829_v10 }
0x22cb   :  { %v6014_v42 = vpop.eup %6013 }
0x22cc   :  { %v4338_v26 = vsel %vm519_vm10, %v6014_v42, 0.0  ;;  %v5101_v42 = vshll.u32 %v5100_v57, 16 }
0x22cf   :  { %v6016_v9 = vpop.eup %6015 }
0x22f2   :  { %v4142_v61 = vpop.xlane.xlu1 %4141 }
0x22f3   :  { %vm4143_vm1 = vcmp.eq.f32.partialorder %v4140_v8, %v4142_v61  ;;  %v4341_v8 = vsel %vm519_vm10, %v6016_v9, 0.0  ;;  %v4148_v16 = vcvt.f32.s32 %v4142_v61  ;;  %v3846_v61 = vcvt.s32.f32 %v3844_v37 }
0x22f4   :  { %v4144_v58 = vsel %vm4143_vm1, %v4139_v11, inf  ;;  %vm5141_vm1 = vcmp.eq.s32.totalorder %v7250_v31, 6 }
0x22f5   :  { %4145 = vmin.xlane.f32.xlu1 %v4144_v58 }
0x22f6   :  { %v7234_v50 = vpop.xlane.xlu1 %4130 }
0x22f9   :  { %3833 = vmin.xlane.f32.xlu1 %v3832_v20 }
0x22fd   :  { %3848 = vmin.xlane.f32.xlu1 %v3847_v59 }
0x2301   :  { %5097 = vmin.xlane.f32.xlu1 %v5096_v21  ;;  %v4149_v21 = vshll.u32 %v4148_v16, 16 }
0x2305   :  { %4339 = vadd.xlane.f32.xlu1 %v4338_v26 }
0x2309   :  { %4342 = vadd.xlane.f32.xlu1 %v4341_v8 }
0x2335   :  { %v3872_v15 = vpop.permute.xlu0 %3871 }
0x2336   :  { %v3873_v53 = vsel %vm3219_vm12, %v7130_v32, %v3872_v15 }
0x2337   :  { %4164 = vrot.lane.b32.xlu1 %v3873_v53, %s6067_s27 }
0x237e   :  { %v4146_v48 = vpop.xlane.xlu1 %4145 }
0x237f   :  { %v4147_v62 = vcvt.f32.s32 %v4146_v48 }
0x2381   :  { %v7236_v39 = vadd.s32 %v4149_v21, %v4147_v62 }
0x2382   :  { %v7239_v36 = vpop.xlane.xlu1 %3833 }
0x2383   :  { %vm3835_vm14 = vcmp.eq.f32.partialorder %v3832_v20, %v7239_v36 }
0x2384   :  { %v7242_v11 = vsel %vm3835_vm14, %v3831_v3, inf }
0x2386   :  { %v7244_v41 = vpop.xlane.xlu1 %3848 }
0x2387   :  { %vm3850_vm15 = vcmp.eq.f32.partialorder %v3847_v59, %v7244_v41 }
0x2388   :  { %v7248_v58 = vsel %vm3850_vm15, %v3846_v61, inf  ;;  %v7783_v61 = vmov 4  }
0x238a   :  { %v5098_v52 = vpop.xlane.xlu1 %5097 }
0x238b   :  { %v5099_v26 = vcvt.f32.s32 %v5098_v52 }
0x238d   :  { %v7252_v1 = vadd.s32 %v5101_v42, %v5099_v26 }
0x238e   :  { %v4340_v20 = vpop.xlane.xlu1 %4339 }
0x238f   :  { %v7256_v9 = vsel %vm5108_vm4, %v7252_v1, 0  ;;  %6017 = vlog2.f32 %v4340_v20 }
0x2390   :  { %vm5116_vm5 = vcmp.eq.s32.totalorder %v6169_v19, %v7256_v9 }
0x2391   :  { %v5126_v35 = vsel %vm5116_vm5, %v7208_v63, 0 }
0x2392   :  { %v4343_v59 = vpop.xlane.xlu1 %4342  ;;  %v5127_v8 = vsel %vm3032_vm13, %v5126_v35, 0 }
0x2393   :  { %6019 = vlog2.f32 %v4343_v59  ;;  %v5129_v15 = vshrl.u32 %v5127_v8, 16  ;;  %v5128_v53 = vand.u32 65535, %v5127_v8 }
0x2395   :  { %v5131_v16 = vcvt.s32.f32 %v5129_v15  ;;  %v5130_v48 = vcvt.s32.f32 %v5128_v53 }
0x2397   :  { %5134 = vadd.xlane.f32.xlu0 %v5131_v16  ;;  %5132 = vadd.xlane.f32.xlu1 %v5130_v48 }
0x239c   :  { %v6018_v10 = vpop.eup %6017 }
0x239d   :  { %v4345_v22 = vmul.f32 0.6931472, %v6018_v10  ;;  %v7785_v10 = vmov 5  }
0x239f   :  { %v4348_v37 = vadd.f32 %v4345_v22, %v7210_v56 }
0x23a0   :  { %v6020_v21 = vpop.eup %6019 }
0x23a1   :  { %v4347_v62 = vmul.f32 0.6931472, %v6020_v21  ;;  %v4359_v24 = vrot.slane %v4348_v37, %v6773_v2  ;;  %v7786_v21 = vmov 6   ;;  %v4718_v37 = vcvt.f32.s32 %v7148_v13 }
0x23a3   :  { %v4349_v3 = vadd.f32 %v4347_v62, %v7212_v49  ;;  %v7784_v49 = vmov 3   ;;  %v4734_v62 = vcvt.f32.s32 %v7124_v44 }
0x23a5   :  { %v4363_v63 = vrot.slane %v4349_v3, %v6773_v2  ;;  %v4735_v3 = vshll.u32 %v4734_v62, 16 }
0x23a7   :  { %v4364_v57 = vsel %vm2653_vm11, %v4363_v63, %v4359_v24 }
0x23a8   :  { %3289 = vperm.xlu1 %5911, %v7130_v32   ;;  %v7273_v52 = vsel %vm4353_vm2, %v4364_v57, %v7156_v38 }
0x23a9   :  { %v4575_v56 = vrot.slane %v7273_v52, %v6267_v30  ;;  %v7298_v22 = vpop.permute.xlu1 %4164 }
0x23ab   :  { %v4576_v42 = vcombine.high %v4575_v56, %v4575_v56  ;;  %v4583_v26 = vrot.slane %v4575_v56, %v6267_v30 }
0x23ac   :  { %5913 = vset.pattern.permute.xlu1 %v7783_v61 }
0x23ad   :  { %3037 = vperm.xlu0 %5910, %v7130_v32   ;;  %v4590_v20 = vrot.slane %v4576_v42, %v6267_v30  ;;  %v4594_v35 = vrot.slane %v4583_v26, %v6131_v4 }
0x23af   :  { %v4598_v59 = vrot.slane %v4590_v20, %v6131_v4  ;;  %v4601_v38 = vadd.f32 %v7285_v33, %v4594_v35 }
0x23b1   :  { %5912 = vset.pattern.permute.xlu0 %v7784_v49  ;;  %v4602_v8 = vadd.f32 %v7285_v33, %v4598_v59  ;;  %v4617_v15 = vadd.f32 %v6990_v54, %v4601_v38  ;;  %v4719_v54 = vcvt.f32.s32 %v7113_v5 }
0x23b3   :  { %v4618_v53 = vadd.f32 %v7000_v47, %v4602_v8  ;;  %v4619_v16 = vsel %vm519_vm10, %v4617_v15, -inf  ;;  %v4733_v47 = vcvt.f32.s32 %v7151_v34  ;;  %v4720_v61 = vshll.u32 %v4719_v54, 16 }
0x23b4   :  { %v7787_v34 = vmov 0.0  }
0x23b5   :  { %v4622_v48 = vsel %vm519_vm10, %v4618_v53, -inf  ;;  %v4736_v57 = vadd.s32 %v4735_v3, %v4733_v47  ;;  %v4721_v56 = vadd.s32 %v4720_v61, %v4718_v37  ;;  %v7788_v37 = vmov 7  }
0x23b7   :  { %v5157_v44 = vrot.slane %v4736_v57, %v6773_v2  ;;  %v5153_v13 = vrot.slane %v4721_v56, %v6773_v2 }
0x23cc   :  { %4620 = vmax.xlane.f32.xlu0 %v4619_v16  ;;  %4623 = vmax.xlane.f32.xlu1 %v4622_v48  ;;  %v5158_v16 = vsel %vm2653_vm11, %v5157_v44, %v5153_v13 }
0x23dd   :  { %3875 = vperm.xlu1 %5913, %v7130_v32  }
0x23e1   :  { %5914 = vset.pattern.permute.xlu1 %v7785_v10 }
0x23e2   :  { %3582 = vperm.xlu0 %5912, %v7130_v32  }
0x23e6   :  { %5915 = vset.pattern.permute.xlu0 %v7786_v21 }
0x2420   :  { %v5133_v63 = vpop.xlane.xlu1 %5132  ;;  %v5135_v24 = vpop.xlane.xlu0 %5134 }
0x2421   :  { %v5137_v49 = vcvt.f32.s32 %v5135_v24  ;;  %v5136_v42 = vcvt.f32.s32 %v5133_v63 }
0x2423   :  { %v5138_v26 = vshll.u32 %v5137_v49, 16 }
0x2424   :  { %v3290_v20 = vpop.permute.xlu1 %3289 }
0x2425   :  { %v5139_v35 = vadd.s32 %v5138_v26, %v5136_v42  ;;  %vm3291_vm2 = vcmp.eq.s32.totalorder %v6169_v19, %v3290_v20 }
0x2426   :  { %v7307_v5 = vsel %vm3291_vm2, 1.0, %v7787_v34  ;;  %vm5143_vm2 = vcmp.ge.s32.totalorder %v7250_v31, 6 }
0x2427   :  { %v5140_v59 = vsel %vm5110_vm6, %v5139_v35, %v7256_v9  ;;  %5839 = vmatmul.mubr.msk.f32.vlgmr.msra.gmra.mxu0 %vm519_vm10, %v7307_v5 }
0x2428   :  { %v3038_v38 = vpop.permute.xlu0 %3037  ;;  %v7317_v8 = vsel %vm5141_vm1, %v7252_v1, %v5140_v59  ;;  %5847 = vmatpush3.msra.mxu0 %v7285_v33  ;;  %5848 = vmatprep.mubr.msk.f32.mxu0 %vm6050_vm8, %v7787_v34  ;;  %v4441_v59 = vcvt.f32.s32 %v7158_v51  ;;  %vm5174_vm1 = vcmp.eq.s32.totalorder %v7250_v31, 5 }
0x2429   :  { %vm3039_vm14 = vcmp.eq.s32.totalorder %v6169_v19, %v3038_v38  ;;  %vm5149_vm15 = vcmp.eq.s32.totalorder %v6169_v19, %v7317_v8  ;;  %5856 = vmatprep.subr.mxu0 %v7787_v34  ;;  %v4426_v38 = vcvt.f32.s32 %v7160_v23 }
0x242a   :  { %v7328_v48 = vsel %vm3039_vm14, 1.0, %v7787_v34  ;;  %v5159_v10 = vsel %vm5149_vm15, %v5158_v16, 0  ;;  %v4440_v16 = vcvt.f32.s32 %v7198_v40 }
0x242b   :  { %5834 = vmatmul.mubr.msk.f32.vlgmr.msra.gmra.mxu1 %vm519_vm10, %v7328_v48  ;;  %v5160_v21 = vsel %vm3032_vm13, %v5159_v10, 0 }
0x242c   :  { %v5162_v62 = vshrl.u32 %v5160_v21, 16  ;;  %5842 = vmatpush3.msra.mxu1 %v7285_v33  ;;  %5843 = vmatprep.mubr.msk.f32.mxu1 %vm6050_vm8, %v7787_v34  ;;  %v5161_v47 = vand.u32 65535, %v5160_v21  ;;  %v4442_v21 = vshll.u32 %v4441_v59, 16 }
0x242d   :  { %5851 = vmatprep.subr.mxu1 %v7787_v34 }
0x242e   :  { %v5164_v54 = vcvt.s32.f32 %v5162_v62  ;;  %v5163_v3 = vcvt.s32.f32 %v5161_v47  ;;  %v4425_v62 = vcvt.f32.s32 %v7196_v45  ;;  %v4427_v47 = vshll.u32 %v4426_v38, 16 }
0x2430   :  { %5167 = vadd.xlane.f32.xlu1 %v5164_v54 }
0x2434   :  { %5165 = vadd.xlane.f32.xlu1 %v5163_v3  ;;  %v4443_v3 = vadd.s32 %v4442_v21, %v4440_v16  ;;  %v7789_v21 = vmov 0  }
0x2445   :  { %4168 = vperm.xlu1 %5914, %v7130_v32  }
0x2449   :  { %5916 = vset.pattern.permute.xlu1 %v7788_v37 }
0x2455   :  { %v7339_v63 = vpop.xlane.xlu1 %4623  ;;  %v7341_v24 = vpop.xlane.xlu0 %4620 }
0x2456   :  { %v4626_v61 = vsub.f32 %v4618_v53, %v7339_v63  ;;  %v4625_v57 = vsub.f32 %v4617_v15, %v7341_v24 }
0x2458   :  { %v4627_v49 = vmul.f32 1.442695, %v4625_v57  ;;  %v4629_v56 = vmul.f32 1.442695, %v4626_v61  ;;  %v4428_v57 = vadd.s32 %v4427_v47, %v4425_v62 }
0x2459   :  { %v3876_v42 = vpop.permute.xlu1 %3875 }
0x245a   :  { %vm3877_vm4 = vcmp.eq.s32.totalorder %v6169_v19, %v3876_v42  ;;  %6021 = vpow2.f32 %v4627_v49  ;;  %v5190_v42 = vrot.slane %v4443_v3, %v6773_v2  ;;  %v5186_v23 = vrot.slane %v4428_v57, %v6773_v2 }
0x245b   :  { %v7347_v26 = vsel %vm3877_vm4, 1.0, %v7787_v34  ;;  %6023 = vpow2.f32 %v4629_v56  ;;  %vm3531_vm4 = vcmp.ge.f32.partialorder %v6792_v28, %v6821_v6 }
0x245c   :  { %5849 = vmatmul.mubr.msk.f32.vlgmr.msra.gmra.mxu0 %vm519_vm10, %v7347_v26 }
0x245d   :  { %v3583_v20 = vpop.permute.xlu0 %3582  ;;  %5857 = vmatpush3.msra.mxu0 %v7285_v33  ;;  %5858 = vmatprep.mubr.msk.f32.mxu0 %vm6050_vm8, %v7787_v34 }
0x245e   :  { %vm3584_vm5 = vcmp.eq.s32.totalorder %v6169_v19, %v3583_v20 }
0x245f   :  { %v7356_v15 = vsel %vm3584_vm5, 1.0, %v7787_v34  ;;  %vm5176_vm5 = vcmp.ge.s32.totalorder %v7250_v31, 5 }
0x2460   :  { %5844 = vmatmul.mubr.msk.f32.vlgmr.msra.gmra.mxu1 %vm519_vm10, %v7356_v15 }
0x2461   :  { %5852 = vmatpush3.msra.mxu1 %v7285_v33  ;;  %5853 = vmatprep.mubr.msk.f32.mxu1 %vm6050_vm8, %v7787_v34 }
0x2462   :  { %5861 = vmatprep.subr.mxu1 %v7787_v34 }
0x2467   :  { %v6022_v53 = vpop.eup %6021 }
0x2468   :  { %v4631_v44 = vsel %vm519_vm10, %v6022_v53, 0.0  ;;  %v6024_v35 = vpop.eup %6023 }
0x2469   :  { %4632 = vadd.xlane.f32.xlu0 %v4631_v44  ;;  %v4634_v13 = vsel %vm519_vm10, %v6024_v35, 0.0  ;;  %v5191_v44 = vsel %vm2653_vm11, %v5190_v42, %v5186_v23  ;;  %v3533_v42 = vsel %vm3531_vm4, %v6169_v19, 8 }
0x246d   :  { %4635 = vadd.xlane.f32.xlu0 %v4634_v13 }
0x24b9   :  { %v5168_v10 = vpop.xlane.xlu1 %5167 }
0x24ba   :  { %v5170_v54 = vcvt.f32.s32 %v5168_v10 }
0x24bc   :  { %v5171_v49 = vshll.u32 %v5170_v54, 16 }
0x24bd   :  { %v5166_v61 = vpop.xlane.xlu1 %5165 }
0x24be   :  { %v5169_v56 = vcvt.f32.s32 %v5166_v61 }
0x24c0   :  { %v5172_v20 = vadd.s32 %v5171_v49, %v5169_v56 }
0x24c1   :  { %v4169_v51 = vpop.permute.xlu1 %4168 }
0x24c2   :  { %v5173_v45 = vsel %vm5143_vm2, %v5172_v20, %v7317_v8  ;;  %vm4170_vm14 = vcmp.eq.s32.totalorder %v6169_v19, %v4169_v51 }
0x24c3   :  { %v7379_v40 = vsel %vm5174_vm1, %v7252_v1, %v5173_v45  ;;  %v7382_v53 = vsel %vm4170_vm14, 1.0, %v7787_v34  ;;  %vm5207_vm1 = vcmp.eq.s32.totalorder %v7250_v31, 4 }
0x24c4   :  { %5854 = vmatmul.mubr.msk.f32.vlgmr.msra.gmra.mxu1 %vm519_vm10, %v7382_v53  ;;  %vm5182_vm15 = vcmp.eq.s32.totalorder %v6169_v19, %v7379_v40 }
0x24c5   :  { %v5192_v35 = vsel %vm5182_vm15, %v5191_v44, 0  ;;  %5862 = vmatpush3.msra.mxu1 %v7285_v33  ;;  %5863 = vmatprep.mubr.msk.f32.mxu1 %vm6050_vm8, %v7787_v34  ;;  %vm3532_vm8 = vcmp.ge.f32.partialorder %v6798_v43, %v6823_v7  ;;  %v7414_v43 = vsel %vm519_vm10, %v3533_v42, 2147483647 }
0x24c6   :  { %v5193_v13 = vsel %vm3032_vm13, %v5192_v35, 0  ;;  %v3534_v57 = vsel %vm3532_vm8, %v6169_v19, 8  ;;  %v3537_v23 = vshra.s32 %v7414_v43, 16  ;;  %vm3238_vm8 = vcmp.ge.f32.partialorder %v6738_v46, %v6749_v18 }
0x24c7   :  { %v5195_v59 = vshrl.u32 %v5193_v13, 16  ;;  %v5194_v38 = vand.u32 65535, %v5193_v13  ;;  %v7405_v56 = vsel %vm519_vm10, %v3534_v57, 2147483647  ;;  %v4166_v57 = vsel %vm3219_vm12, %v7130_v32, %v7298_v22 }
0x24c8   :  { %v7421_v44 = vcvt.s32.f32 %v3537_v23  ;;  %v3855_v46 = vcvt.f32.s32 %v7244_v41 }
0x24c9   :  { %v5197_v16 = vcvt.s32.f32 %v5195_v59  ;;  %v5196_v10 = vcvt.s32.f32 %v5194_v38 }
0x24cb   :  { %5200 = vadd.xlane.f32.xlu1 %v5197_v16  ;;  %5198 = vadd.xlane.f32.xlu0 %v5196_v10 }
0x24dc   :  { %4754 = vperm.xlu1 %5916, %v7130_v32  }
0x24e0   :  { %5917 = vset.pattern.permute.xlu1 %v7789_v21 }
0x24e1   :  { %4461 = vperm.xlu0 %5915, %v7130_v32  }
0x24e5   :  { %5918 = vset.pattern.permute.xlu0 %v7788_v37  ;;  %v3552_v37 = vshra.s32 %v7405_v56, 16 }
0x24e7   :  { %v7397_v62 = vpop.f32.mrf.mxu0  ;;  %v7411_v20 = vcvt.s32.f32 %v3552_v37 }
0x24e9   :  { %v5840_v54 = vpop.f32.mrf.mxu0 }
0x24eb   :  { %v7399_v47 = vpop.f32.mrf.mxu1 }
0x24ed   :  { %v5835_v3 = vpop.f32.mrf.mxu1 }
0x24f2   :  { %v4633_v61 = vpop.xlane.xlu0 %4632 }
0x24f3   :  { %6025 = vlog2.f32 %v4633_v61 }
0x24f6   :  { %v4636_v49 = vpop.xlane.xlu0 %4635 }
0x24f7   :  { %6027 = vlog2.f32 %v4636_v49  ;;  %v4132_v49 = vcvt.f32.s32 %v7234_v50 }
0x2500   :  { %3555 = vmin.xlane.f32.xlu1 %v7411_v20  ;;  %3837 = vmin.xlane.f32.xlu0 %v7242_v11  ;;  %v6026_v7 = vpop.eup %6025 }
0x2501   :  { %v4638_v51 = vmul.f32 0.6931472, %v6026_v7 }
0x2503   :  { %v4641_v6 = vadd.f32 %v4638_v51, %v7341_v24 }
0x2504   :  { %3852 = vmin.xlane.f32.xlu0 %v7248_v58  ;;  %v6028_v28 = vpop.eup %6027 }
0x2505   :  { %v4640_v45 = vmul.f32 0.6931472, %v6028_v28  ;;  %v4652_v13 = vrot.slane %v4641_v6, %v6773_v2 }
0x2507   :  { %v4642_v35 = vadd.f32 %v4640_v45, %v7339_v63 }
0x2508   :  { %3540 = vmin.xlane.f32.xlu0 %v7421_v44 }
0x2509   :  { %v4656_v11 = vrot.slane %v4642_v35, %v6773_v2  ;;  %v5223_v35 = vrot.slane %v7236_v39, %v6773_v2 }
0x250b   :  { %v4657_v59 = vsel %vm2653_vm11, %v4656_v11, %v4652_v13 }
0x250c   :  { %v7431_v58 = vsel %vm4646_vm3, %v4657_v59, %v7273_v52 }
0x250d   :  { %v4875_v24 = vrot.slane %v7431_v58, %v6267_v30 }
0x250f   :  { %v4876_v38 = vcombine.high %v4875_v24, %v4875_v24  ;;  %v4883_v39 = vrot.slane %v4875_v24, %v6267_v30 }
0x2511   :  { %v4890_v16 = vrot.slane %v4876_v38, %v6267_v30  ;;  %v4894_v24 = vrot.slane %v4883_v39, %v6131_v4 }
0x2513   :  { %v4898_v63 = vrot.slane %v4890_v16, %v6131_v4  ;;  %v3240_v4 = vsel %vm3238_vm8, %v6169_v19, 8 }
0x2515   :  { %v4902_v10 = vadd.f32 %v7285_v33, %v4898_v63 }
0x2517   :  { %v7439_v21 = vadd.f32 %v7055_v12, %v4902_v10  ;;  %v4133_v12 = vcvt.f32.s32 %v7191_v55 }
0x2519   :  { %v4922_v54 = vsel %vm519_vm10, %v7439_v21, -inf  ;;  %v4134_v7 = vshll.u32 %v4133_v12, 16 }
0x251a   :  { %4923 = vmax.xlane.f32.xlu0 %v4922_v54 }
0x251b   :  { %v4135_v23 = vadd.s32 %v4134_v7, %v4132_v49  ;;  %v7497_v7 = vsel %vm519_vm10, %v3240_v4, 2147483647 }
0x251c   :  { %v7443_v14 = vpop.f32.mrf.mxu0 }
0x251d   :  { %v5219_v50 = vrot.slane %v4135_v23, %v6773_v2 }
0x251e   :  { %v5850_v52 = vpop.f32.mrf.mxu0 }
0x251f   :  { %v5224_v38 = vsel %vm2653_vm11, %v5223_v35, %v5219_v50 }
0x2520   :  { %v7445_v3 = vpop.f32.mrf.mxu1 }
0x2522   :  { %v5845_v61 = vpop.f32.mrf.mxu1 }
0x2523   :  { %v4901_v61 = vadd.f32 %v7285_v33, %v4894_v24  ;;  %v3840_v33 = vcvt.f32.s32 %v7239_v36 }
0x2525   :  { %v7485_v12 = vadd.f32 %v7047_v0, %v4901_v61 }
0x2527   :  { %v4919_v49 = vsel %vm519_vm10, %v7485_v12, -inf }
0x2530   :  { %4457 = vrot.lane.b32.xlu0 %v4166_v57, %s6067_s27 }
0x2554   :  { %v5201_v37 = vpop.xlane.xlu1 %5200  ;;  %v5199_v42 = vpop.xlane.xlu0 %5198 }
0x2555   :  { %v5203_v51 = vcvt.f32.s32 %v5201_v37  ;;  %v5202_v6 = vcvt.f32.s32 %v5199_v42  ;;  %v3551_v42 = vand.u32 65535, %v7405_v56 }
0x2557   :  { %v5204_v28 = vshll.u32 %v5203_v51, 16 }
0x2558   :  { %v4755_v45 = vpop.permute.xlu1 %4754 }
0x2559   :  { %v5205_v13 = vadd.s32 %v5204_v28, %v5202_v6  ;;  %vm4756_vm3 = vcmp.eq.s32.totalorder %v6169_v19, %v4755_v45  ;;  %v3553_v28 = vcvt.s32.f32 %v3551_v42  ;;  %v3244_v6 = vshra.s32 %v7497_v7, 16  ;;  %v6043_v42 = vld [vmem:[%s7762_s6 + $0x6] ss:$0 sm:$0xff] }
0x255a   :  { %v7459_v55 = vsel %vm4756_vm3, 1.0, %v7787_v34  ;;  %v3841_v45 = vshll.u32 %v3840_v33, 16  ;;  %vm3239_vm3 = vcmp.ge.f32.partialorder %v6735_v17, %v6745_v29 }
0x255b   :  { %v5206_v22 = vsel %vm5176_vm5, %v5205_v13, %v7379_v40  ;;  %5864 = vmatmul.mubr.msk.f32.vlgmr.msra.gmra.mxu1 %vm519_vm10, %v7459_v55  ;;  %v3856_v13 = vshll.u32 %v3855_v46, 16 }
0x255c   :  { %v7470_v11 = vsel %vm5207_vm1, %v7252_v1, %v5206_v22  ;;  %v4462_v59 = vpop.permute.xlu0 %4461  ;;  %v3246_v22 = vcvt.s32.f32 %v3244_v6 }
0x255d   :  { %vm4463_vm14 = vcmp.eq.s32.totalorder %v6169_v19, %v4462_v59  ;;  %vm5215_vm15 = vcmp.eq.s32.totalorder %v6169_v19, %v7470_v11 }
0x255e   :  { %v7477_v16 = vsel %vm4463_vm14, 1.0, %v7787_v34  ;;  %v5225_v63 = vsel %vm5215_vm15, %v5224_v38, 0  ;;  %vm5209_vm14 = vcmp.ge.s32.totalorder %v7250_v31, 4  ;;  %vm5240_vm15 = vcmp.eq.s32.totalorder %v7250_v31, 3 }
0x255f   :  { %5859 = vmatmul.mubr.msk.f32.vlgmr.msra.gmra.mxu0 %vm519_vm10, %v7477_v16  ;;  %v5226_v30 = vsel %vm3032_vm13, %v5225_v63, 0 }
0x2560   :  { %v5228_v10 = vshrl.u32 %v5226_v30, 16  ;;  %v5227_v52 = vand.u32 65535, %v5226_v30 }
0x2562   :  { %v5230_v54 = vcvt.s32.f32 %v5228_v10  ;;  %v5229_v57 = vcvt.s32.f32 %v5227_v52  ;;  %v3241_v10 = vsel %vm3239_vm3, %v6169_v19, 8 }
0x2563   :  { %v3257_v52 = vsel %vm519_vm10, %v3241_v10, 2147483647 }
0x2564   :  { %5233 = vadd.xlane.f32.xlu1 %v5230_v54  ;;  %v3536_v54 = vand.u32 65535, %v7414_v43 }
0x2566   :  { %v3538_v61 = vcvt.s32.f32 %v3536_v54 }
0x2568   :  { %5231 = vadd.xlane.f32.xlu1 %v5229_v57  ;;  %v3259_v57 = vshra.s32 %v3257_v52, 16 }
0x256a   :  { %v3261_v4 = vcvt.s32.f32 %v3259_v57 }
0x256c   :  { %4920 = vmax.xlane.f32.xlu1 %v4919_v49 }
0x2584   :  { %v7492_v37 = vpop.f32.mrf.mxu1 }
0x2586   :  { %v5855_v0 = vpop.f32.mrf.mxu1 }
0x2589   :  { %v7499_v51 = vpop.xlane.xlu1 %3555  ;;  %v3838_v23 = vpop.xlane.xlu0 %3837 }
0x258a   :  { %vm3557_vm4 = vcmp.eq.f32.partialorder %v7411_v20, %v7499_v51  ;;  %v3839_v18 = vcvt.f32.s32 %v3838_v23 }
0x258b   :  { %v3558_v56 = vsel %vm3557_vm4, %v3553_v28, inf }
0x258c   :  { %v3842_v35 = vadd.s32 %v3841_v45, %v3839_v18  ;;  %3559 = vmin.xlane.f32.xlu0 %v3558_v56 }
0x258d   :  { %v3853_v36 = vpop.xlane.xlu0 %3852 }
0x258e   :  { %v3854_v50 = vcvt.f32.s32 %v3853_v36  ;;  %v5252_v59 = vrot.slane %v3842_v35, %v6773_v2 }
0x2590   :  { %v3857_v39 = vadd.s32 %v3856_v13, %v3854_v50  ;;  %3247 = vmin.xlane.f32.xlu0 %v3246_v22 }
0x2591   :  { %v3541_v41 = vpop.xlane.xlu0 %3540 }
0x2592   :  { %v5256_v38 = vrot.slane %v3857_v39, %v6773_v2  ;;  %vm3542_vm1 = vcmp.eq.f32.partialorder %v7421_v44, %v3541_v41  ;;  %v3243_v39 = vand.u32 65535, %v7497_v7 }
0x2593   :  { %v3543_v49 = vsel %vm3542_vm1, %v3538_v61, inf }
0x2594   :  { %v7508_v63 = vsel %vm2653_vm11, %v5256_v38, %v5252_v59  ;;  %v3245_v59 = vcvt.s32.f32 %v3243_v39 }
0x25a3   :  { %v7510_v30 = vpop.xlane.xlu0 %4923 }
0x25a4   :  { %v4926_v61 = vsub.f32 %v7439_v21, %v7510_v30 }
0x25a7   :  { %v4458_v20 = vpop.permute.xlu0 %4457 }
0x25a8   :  { %v4459_v24 = vsel %vm3219_vm12, %v7130_v32, %v4458_v20  ;;  %v3562_v20 = vcvt.f32.s32 %v7499_v51 }
0x25a9   :  { %4750 = vrot.lane.b32.xlu1 %v4459_v24, %s6067_s27  ;;  %v3547_v24 = vcvt.f32.s32 %v3541_v41 }
0x25aa   :  { %v3563_v54 = vshll.u32 %v3562_v20, 16 }
0x25cd   :  { %3544 = vmin.xlane.f32.xlu1 %v3543_v49  ;;  %v3258_v49 = vand.u32 65535, %v3257_v52 }
0x25cf   :  { %v3260_v51 = vcvt.s32.f32 %v3258_v49 }
0x25d1   :  { %3262 = vmin.xlane.f32.xlu1 %v3261_v4 }
0x25e2   :  { %2744 = vrot.lane.b32.xlu1 %v6043_v42, %s6049_s12  ;;  %v3548_v42 = vshll.u32 %v3547_v24, 16 }
0x25e6   :  { %3016 = vperm.xlu1 %5917, %v7130_v32  }
0x25ed   :  { %v5234_v17 = vpop.xlane.xlu1 %5233 }
0x25ee   :  { %v5236_v29 = vcvt.f32.s32 %v5234_v17 }
0x25f0   :  { %v5237_v33 = vshll.u32 %v5236_v29, 16 }
0x25f1   :  { %v5232_v43 = vpop.xlane.xlu1 %5231 }
0x25f2   :  { %v5235_v0 = vcvt.f32.s32 %v5232_v43  ;;  %v4929_v43 = vmul.f32 1.442695, %v4926_v61 }
0x25f4   :  { %v5238_v44 = vadd.s32 %v5237_v33, %v5235_v0 }
0x25f5   :  { %v7535_v6 = vpop.xlane.xlu1 %4920 }
0x25f6   :  { %v5239_v23 = vsel %vm5209_vm14, %v5238_v44, %v7470_v11  ;;  %v3119_v44 = vrot.slane %v7328_v48, 7 }
0x25f7   :  { %v7533_v28 = vsel %vm5240_vm15, %v7252_v1, %v5239_v23  ;;  %v3123_v23 = vmul.f32 %v7328_v48, %v6712_v25  ;;  %vm3127_vm15 = vcmask 1042434  }
0x25f8   :  { %vm5248_vm3 = vcmp.eq.s32.totalorder %v6169_v19, %v7533_v28 }
0x2615   :  { %v3560_v13 = vpop.xlane.xlu0 %3559 }
0x2616   :  { %v3561_v10 = vcvt.f32.s32 %v3560_v13  ;;  %v7790_v13 = vld [vmem:[#allocation3_spill] sm:$0xff] }
0x2618   :  { %v3564_v17 = vadd.s32 %v3563_v54, %v3561_v10 }
0x2619   :  { %v7545_v50 = vpop.xlane.xlu0 %3247 }
0x261a   :  { %vm3249_vm8 = vcmp.eq.f32.partialorder %v3246_v22, %v7545_v50  ;;  %v5289_v41 = vrot.slane %v3564_v17, %v6773_v2  ;;  %v7583_v17 = vld [vmem:[%s7763_s2] sm:$0x3]  ;;  %s6069_s2 = smov 126  }
0x261b   :  { %v7537_v45 = vpop.f32.mrf.mxu1  ;;  %v4751_v46 = vpop.permute.xlu1 %4750  ;;  %v3250_v38 = vsel %vm3249_vm8, %v3245_v59, inf  ;;  %vm3130_vm8 = vcmask 59393  }
0x261c   :  { %v4752_v18 = vsel %vm3219_vm12, %v7130_v32, %v4751_v46  ;;  %v4925_v32 = vsub.f32 %v7485_v12, %v7535_v6 }
0x261d   :  { %v5865_v56 = vpop.f32.mrf.mxu1  ;;  %5050 = vrot.lane.b32.xlu0 %v4752_v18, %s6067_s27 }
0x261e   :  { %v4927_v7 = vmul.f32 1.442695, %v4925_v32  ;;  %v3122_v56 = vmul.f32 %v3119_v44, %v6714_v27 }
0x261f   :  { %v7543_v35 = vpop.f32.mrf.mxu0 }
0x2620   :  { %6029 = vpow2.f32 %v4927_v7 }
0x2621   :  { %v5860_v36 = vpop.f32.mrf.mxu0  ;;  %6031 = vpow2.f32 %v4929_v43 }
0x2622   :  { %v5258_v36 = vsel %vm5248_vm3, %v7508_v63, 0  ;;  %vm3673_vm3 = vcmask 1044484  }
0x2623   :  { %v5259_v24 = vsel %vm3032_vm13, %v5258_v36, 0 }
0x2624   :  { %v5261_v54 = vshrl.u32 %v5259_v24, 16  ;;  %v5260_v49 = vand.u32 65535, %v5259_v24 }
0x2626   :  { %v5262_v7 = vcvt.s32.f32 %v5260_v49 }
0x262d   :  { %v6030_v32 = vpop.eup %6029 }
0x262e   :  { %v4931_v61 = vsel %vm519_vm10, %v6030_v32, 0.0 }
0x263c   :  { %3251 = vmin.xlane.f32.xlu0 %v3250_v38 }
0x2656   :  { %v3545_v57 = vpop.xlane.xlu1 %3544 }
0x2657   :  { %v3546_v22 = vcvt.f32.s32 %v3545_v57  ;;  %v6032_v57 = vpop.eup %6031 }
0x2659   :  { %v3549_v29 = vadd.s32 %v3548_v42, %v3546_v22  ;;  %v4934_v42 = vsel %vm519_vm10, %v6032_v57, 0.0 }
0x265a   :  { %v7554_v33 = vpop.xlane.xlu1 %3262 }
0x265b   :  { %v5285_v12 = vrot.slane %v3549_v29, %v6773_v2  ;;  %vm3264_vm4 = vcmp.eq.f32.partialorder %v3261_v4, %v7554_v33  ;;  %v3126_v4 = vrot.slane %v3123_v23, 7  ;;  %v6045_v29 = vld [vmem:[%s7765_s3] sm:$0x3]  ;;  %v3371_v23 = vrot.slane %v7307_v5, 6 }
0x265c   :  { %v3265_v0 = vsel %vm3264_vm4, %v3260_v51, inf  ;;  %v3372_v51 = vrot.slane %v7307_v5, 7  ;;  %vm3383_vm4 = vcmask 60418   ;;  %v3269_v49 = vcvt.f32.s32 %v7554_v33 }
0x265d   :  { %3266 = vmin.xlane.f32.xlu0 %v3265_v0  ;;  %v7560_v21 = vsel %vm2653_vm11, %v5289_v41, %v5285_v12  ;;  %v3128_v10 = vsel %vm3127_vm15, %v3126_v4, %v3122_v56  ;;  %v3367_v41 = vmul.f32 %v7328_v48, %v7397_v62  ;;  %v3665_v0 = vrot.slane %v7356_v15, 6 }
0x265e   :  { %v7562_v52 = vpop.permute.xlu1 %2744  ;;  %v3131_v63 = vsel %vm3130_vm8, %v3128_v10, 0.0  ;;  %v3376_v12 = vmul.f32 %v3372_v51, %v6712_v25  ;;  %v3375_v56 = vmul.f32 %v3371_v23, %v6714_v27  ;;  %vm3966_vm15 = vcmask 1045509  }
0x265f   :  { %v3368_v44 = vsel %vm3032_vm13, %v3367_v41, 0.0  ;;  %v3669_v60 = vmul.f32 %v3665_v0, %v6712_v25  ;;  %vm3969_vm8 = vcmask 62468  }
0x2660   :  { %v3379_v4 = vrot.slane %v3376_v12, 7 }
0x2661   :  { %v3672_v36 = vrot.slane %v3669_v60, 7 }
0x2662   :  { %v3017_v46 = vpop.permute.xlu1 %3016 }
0x2663   :  { %vm3018_vm1 = vcmp.eq.s32.totalorder %v6169_v19, %v3017_v46  ;;  %v3958_v46 = vrot.slane %v7347_v26, 5 }
0x2664   :  { %v5428_v18 = vsel %vm3018_vm1, 1.0, %v7787_v34  ;;  %vm3676_vm1 = vcmask 61443  }
0x2665   :  { %v3031_v39 = vmul.f32 %v5428_v18, %v7790_v13  ;;  %v3115_v59 = vmul.f32 %v5428_v18, %v7399_v47  ;;  %v5263_v47 = vcvt.s32.f32 %v5261_v54  ;;  %v3664_v18 = vrot.slane %v7356_v15, 5 }
0x2666   :  { %v3962_v48 = vmul.f32 %v3958_v46, %v6712_v25  ;;  %v3957_v13 = vrot.slane %v7347_v26, 4 }
0x2667   :  { %v3116_v38 = vsel %vm3032_vm13, %v3115_v59, 0.0  ;;  %v3033_v20 = vsel %vm3032_vm13, %v3031_v39, 0.0  ;;  %v3668_v39 = vmul.f32 %v3664_v18, %v6714_v27 }
0x2668   :  { %3117 = vadd.xlane.f32.xlu1 %v3116_v38  ;;  %3034 = vadd.xlane.f32.xlu0 %v3033_v20  ;;  %v3965_v20 = vrot.slane %v3962_v48, 7  ;;  %v3961_v24 = vmul.f32 %v3957_v13, %v6714_v27 }
0x2669   :  { %v3674_v38 = vsel %vm3673_vm3, %v3672_v36, %v3668_v39 }
0x266a   :  { %v3677_v32 = vsel %vm3676_vm1, %v3674_v38, 0.0  ;;  %v3967_v10 = vsel %vm3966_vm15, %v3965_v20, %v3961_v24  ;;  %vm4851_vm1 = vcmask 57344  }
0x266b   :  { %v3970_v54 = vsel %vm3969_vm8, %v3967_v10, 0.0  ;;  %vm4552_vm8 = vcmask 1047559  }
0x266c   :  { %4932 = vadd.xlane.f32.xlu1 %v4931_v61  ;;  %3132 = vadd.xlane.f32.xlu0 %v3131_v63  ;;  %v3660_v61 = vmul.f32 %v7307_v5, %v7445_v3 }
0x266e   :  { %v3661_v63 = vsel %vm3032_vm13, %v3660_v61, 0.0 }
0x2670   :  { %4935 = vadd.xlane.f32.xlu1 %v4934_v42  ;;  %5266 = vadd.xlane.f32.xlu0 %v5263_v47  ;;  %v3254_v47 = vcvt.f32.s32 %v7545_v50 }
0x2674   :  { %5264 = vadd.xlane.f32.xlu0 %v5262_v7  ;;  %v3255_v7 = vshll.u32 %v3254_v47, 16 }
0x2681   :  { %3139 = vrot.lane.b32.xlu1 %v7583_v17, %s6068_s21 }
0x268f   :  { %v5051_v22 = vpop.permute.xlu0 %5050 }
0x2690   :  { %v5052_v43 = vsel %vm3219_vm12, %v6045_v29, %v5051_v22  ;;  %vm3380_vm12 = vcmask 1043459   ;;  %v3270_v29 = vshll.u32 %v3269_v49, 16 }
0x2691   :  { %5071 = vperm.xlu0 %5918, %v5052_v43   ;;  %v3381_v62 = vsel %vm3380_vm12, %v3379_v4, %v3375_v56  ;;  %vm5242_vm12 = vcmp.ge.s32.totalorder %v7250_v31, 3 }
0x2692   :  { %v3384_v59 = vsel %vm3383_vm4, %v3381_v62, 0.0  ;;  %vm5273_vm4 = vcmp.eq.s32.totalorder %v7250_v31, 2 }
0x26a5   :  { %3369 = vadd.xlane.f32.xlu1 %v3368_v44 }
0x26b0   :  { %3385 = vadd.xlane.f32.xlu0 %v3384_v59 }
0x26b4   :  { %3678 = vadd.xlane.f32.xlu0 %v3677_v32 }
0x26b6   :  { %3391 = vrot.lane.b32.xlu1 %v7583_v17, %s6069_s2 }
0x26b8   :  { %3971 = vadd.xlane.f32.xlu0 %v3970_v54  ;;  %v4837_v54 = vrot.slane %v7459_v55, 2 }
0x26c5   :  { %v3252_v57 = vpop.xlane.xlu0 %3251 }
0x26c6   :  { %v3253_v42 = vcvt.f32.s32 %v3252_v57 }
0x26c8   :  { %v3256_v43 = vadd.s32 %v3255_v7, %v3253_v42 }
0x26ca   :  { %v5318_v12 = vrot.slane %v3256_v43, %v6773_v2  ;;  %v4251_v43 = vrot.slane %v7382_v53, 4 }
0x26da   :  { %3662 = vadd.xlane.f32.xlu1 %v3661_v63 }
0x26e6   :  { %v3267_v22 = vpop.xlane.xlu0 %3266 }
0x26e7   :  { %v3268_v51 = vcvt.f32.s32 %v3267_v22 }
0x26e9   :  { %v3271_v41 = vadd.s32 %v3270_v29, %v3268_v51  ;;  %v4841_v29 = vmul.f32 %v4837_v54, %v6712_v25 }
0x26eb   :  { %v5322_v0 = vrot.slane %v3271_v41, %v6773_v2 }
0x26ed   :  { %v7615_v5 = vsel %vm2653_vm11, %v5322_v0, %v5318_v12 }
0x26f1   :  { %v3118_v3 = vpop.xlane.xlu1 %3117  ;;  %v3035_v44 = vpop.xlane.xlu0 %3034 }
0x26f5   :  { %v4933_v23 = vpop.xlane.xlu1 %4932  ;;  %v3133_v50 = vpop.xlane.xlu0 %3132 }
0x26f6   :  { %6033 = vlog2.f32 %v4933_v23  ;;  %v3135_v33 = vrot.slane %v3133_v50, 1  ;;  %v6046_v23 = vld [vmem:[%s7764_s7 + $0x1] ss:$0 sm:$0xff]  ;;  %v4250_v50 = vrot.slane %v7382_v53, 3  ;;  %s6070_s7 = smov 124  }
0x26f8   :  { %v3137_v46 = vadd.f32 %v3135_v33, %v3118_v3  ;;  %v4844_v3 = vrot.slane %v4841_v29, 7  ;;  %v3953_v33 = vmul.f32 %v7356_v15, %v7443_v14 }
0x26f9   :  { %v4936_v60 = vpop.xlane.xlu1 %4935  ;;  %v5267_v4 = vpop.xlane.xlu0 %5266 }
0x26fa   :  { %6035 = vlog2.f32 %v4936_v60  ;;  %v5269_v18 = vcvt.f32.s32 %v5267_v4  ;;  %v4852_v60 = vsel %vm4851_vm1, %v4844_v3, 0.0  ;;  %v4544_v4 = vrot.slane %v7477_v16, 3 }
0x26fb   :  { %v3954_v15 = vsel %vm3032_vm13, %v3953_v33, 0.0  ;;  %vm5275_vm1 = vcmp.ge.s32.totalorder %v7250_v31, 2 }
0x26fc   :  { %v5270_v62 = vshll.u32 %v5269_v18, 16 }
0x26fd   :  { %v3140_v56 = vpop.permute.xlu1 %3139  ;;  %v5265_v48 = vpop.xlane.xlu0 %5264 }
0x26fe   :  { %v3142_v36 = vmul.f32 %v3140_v56, %v3137_v46  ;;  %v5268_v13 = vcvt.f32.s32 %v5265_v48  ;;  %v4832_v46 = vmul.f32 %v7477_v16, %v7537_v45  ;;  %v4254_v48 = vmul.f32 %v4250_v50, %v6714_v27 }
0x26ff   :  { %v4548_v45 = vmul.f32 %v4544_v4, %v6712_v25 }
0x2700   :  { %v7617_v39 = vadd.f32 %v3142_v36, %v3035_v44  ;;  %v5271_v59 = vadd.s32 %v5270_v62, %v5268_v13  ;;  %v4833_v14 = vsel %vm3032_vm13, %v4832_v46, 0.0  ;;  %v4543_v13 = vrot.slane %v7477_v16, 2 }
0x2702   :  { %v5272_v38 = vsel %vm5242_vm12, %v5271_v59, %v7533_v28 }
0x2703   :  { %v6034_v20 = vpop.eup %6033  ;;  %v7625_v24 = vsel %vm5273_vm4, %v7252_v1, %v5272_v38  ;;  %vm4555_vm4 = vcmask 64518  }
0x2704   :  { %v4938_v32 = vmul.f32 0.6931472, %v6034_v20  ;;  %vm5281_vm3 = vcmp.eq.s32.totalorder %v6169_v19, %v7625_v24  ;;  %v4551_v20 = vrot.slane %v4548_v45, 7 }
0x2705   :  { %v5291_v10 = vsel %vm5281_vm3, %v7560_v21, 0  ;;  %vm4847_vm3 = vcmask 64519  }
0x2706   :  { %v5292_v61 = vsel %vm3032_vm13, %v5291_v10, 0  ;;  %v4941_v47 = vadd.f32 %v4938_v32, %v7535_v6  ;;  %v4255_v6 = vmul.f32 %v4251_v43, %v6712_v25  ;;  %v4547_v32 = vmul.f32 %v4543_v13, %v6714_v27 }
0x2707   :  { %v6036_v63 = vpop.eup %6035  ;;  %v5294_v57 = vshrl.u32 %v5292_v61, 16  ;;  %v5293_v7 = vand.u32 65535, %v5292_v61  ;;  %v4836_v25 = vrot.slane %v7459_v55, 1 }
0x2708   :  { %v4940_v49 = vmul.f32 0.6931472, %v6036_v63  ;;  %v4952_v21 = vrot.slane %v4941_v47, %v6773_v2  ;;  %v4258_v56 = vrot.slane %v4255_v6, 7  ;;  %v4553_v54 = vsel %vm4552_vm8, %v4551_v20, %v4547_v32 }
0x2709   :  { %v5296_v42 = vcvt.s32.f32 %v5294_v57  ;;  %v5295_v12 = vcvt.s32.f32 %v5293_v7  ;;  %v4556_v16 = vsel %vm4555_vm4, %v4553_v54, 0.0  ;;  %v4840_v61 = vmul.f32 %v4836_v25, %v6714_v27 }
0x270a   :  { %v4942_v22 = vadd.f32 %v4940_v49, %v7510_v30  ;;  %vm5177_vm8 = vcmp.eq.s32.totalorder %v6169_v19, 5 }
0x270b   :  { %5299 = vadd.xlane.f32.xlu1 %v5296_v42  ;;  %vm5180_vm0 = vmand %vm5176_vm5, %vm5177_vm8  ;;  %vm5341_vm5 = vcmp.ge.s32.totalorder %v7250_v31, 0  ;;  %vm5342_vm8 = vcmp.eq.s32.totalorder %v6169_v19, 0 }
0x270c   :  { %v4956_v51 = vrot.slane %v4942_v22, %v6773_v2  ;;  %v5072_v41 = vpop.permute.xlu0 %5071 }
0x270d   :  { %vm5073_vm15 = vcmp.eq.s32.totalorder %v6169_v19, %v5072_v41 }
0x270e   :  { %v4957_v0 = vsel %vm2653_vm11, %v4956_v51, %v4952_v21  ;;  %v5445_v18 = vsel %vm5073_vm15, 1.0, %v7787_v34  ;;  %vm4259_vm11 = vcmask 1046534   ;;  %v4246_v34 = vmul.f32 %v7347_v26, %v7492_v37 }
0x270f   :  { %5297 = vadd.xlane.f32.xlu1 %v5295_v12  ;;  %v4959_v30 = vsel %vm4946_vm7, %v4957_v0, %v7431_v58  ;;  %v5076_v62 = vmul.f32 %v6046_v23, %v5445_v18  ;;  %v4260_v36 = vsel %vm4259_vm11, %v4258_v56, %v4254_v48  ;;  %vm4262_vm7 = vcmask 63493  }
0x2710   :  { %v7647_v2 = vadd.f32 %v6046_v23, %v4959_v30  ;;  %v4263_v59 = vsel %vm4262_vm7, %v4260_v36, 0.0  ;;  %v4247_v10 = vsel %vm3032_vm13, %v4246_v34, 0.0  ;;  %v4539_v26 = vmul.f32 %v7382_v53, %v7543_v35 }
0x2711   :  { %v5077_v38 = vsel %vm3032_vm13, %v5076_v62, 0.0  ;;  %v4848_v37 = vsel %vm4847_vm3, %v4840_v61, 0.0  ;;  %vm5306_vm15 = vcmp.eq.s32.totalorder %v7250_v31, 1  ;;  %vm5144_vm7 = vcmp.eq.s32.totalorder %v6169_v19, 6 }
0x2712   :  { %v5058_v58 = vsel %vm3032_vm13, %v7647_v2, -inf  ;;  %v4540_v63 = vsel %vm3032_vm13, %v4539_v26, 0.0  ;;  %vm5210_vm3 = vcmp.eq.s32.totalorder %v6169_v19, 4 }
0x2713   :  { %5059 = vmax.xlane.f32.xlu0 %v5058_v58  ;;  %4853 = vadd.xlane.f32.xlu1 %v4852_v60 }
0x2717   :  { %3955 = vadd.xlane.f32.xlu0 %v3954_v15  ;;  %4834 = vadd.xlane.f32.xlu1 %v4833_v14 }
0x271b   :  { %4264 = vadd.xlane.f32.xlu0 %v4263_v59  ;;  %5078 = vadd.xlane.f32.xlu1 %v5077_v38 }
0x271f   :  { %4248 = vadd.xlane.f32.xlu0 %v4247_v10 }
0x2723   :  { %4557 = vadd.xlane.f32.xlu0 %v4556_v16 }
0x2727   :  { %4849 = vadd.xlane.f32.xlu0 %v4848_v37 }
0x272b   :  { %4541 = vadd.xlane.f32.xlu0 %v4540_v63 }
0x272c   :  { %3977 = vrot.lane.b32.xlu1 %v7583_v17, %s6070_s7 }
0x272e   :  { %v3370_v55 = vpop.xlane.xlu1 %3369 }
0x2730   :  { %4270 = vrot.lane.b32.xlu1 %v7583_v17, %s6071_s9 }
0x2732   :  { %v3392_v27 = vpop.permute.xlu1 %3391 }
0x2739   :  { %v3386_v57 = vpop.xlane.xlu0 %3385 }
0x273a   :  { %v3388_v47 = vrot.slane %v3386_v57, 2 }
0x273c   :  { %v3390_v49 = vadd.f32 %v3388_v47, %v3370_v55 }
0x273d   :  { %v3679_v53 = vpop.xlane.xlu0 %3678 }
0x273e   :  { %v3394_v42 = vmul.f32 %v3392_v27, %v3390_v49  ;;  %v3681_v35 = vrot.slane %v3679_v53, 3 }
0x2740   :  { %v3395_v7 = vadd.f32 %v3394_v42, %v7617_v39 }
0x2741   :  { %3684 = vrot.lane.b32.xlu0 %v7583_v17, %s6072_s10  ;;  %v7677_v51 = vpop.xlane.xlu0 %3971 }
0x2763   :  { %v3663_v22 = vpop.xlane.xlu1 %3662 }
0x2764   :  { %v3683_v29 = vadd.f32 %v3681_v35, %v3663_v22 }
0x2794   :  { %v5300_v43 = vpop.xlane.xlu1 %5299 }
0x2795   :  { %v5302_v21 = vcvt.f32.s32 %v5300_v43 }
0x2797   :  { %v5303_v12 = vshll.u32 %v5302_v21, 16 }
0x2798   :  { %v5298_v41 = vpop.xlane.xlu1 %5297 }
0x2799   :  { %v5301_v0 = vcvt.f32.s32 %v5298_v41 }
0x279b   :  { %v5304_v3 = vadd.s32 %v5303_v12, %v5301_v0 }
0x279c   :  { %v7680_v6 = vpop.xlane.xlu0 %5059  ;;  %v4854_v34 = vpop.xlane.xlu1 %4853 }
0x279d   :  { %v5305_v39 = vsel %vm5275_vm1, %v5304_v3, %v7625_v24  ;;  %v5061_v44 = vsub.f32 %v7647_v2, %v7680_v6  ;;  %v4859_v22 = vrot.slane %v4854_v34, 7 }
0x279e   :  { %v7689_v30 = vsel %vm5306_vm15, %v7252_v1, %v5305_v39  ;;  %vm5147_vm15 = vmand %vm5143_vm2, %vm5144_vm7  ;;  %vm5309_vm2 = vcmp.eq.s32.totalorder %v6169_v19, 1 }
0x279f   :  { %v5062_v23 = vmul.f32 1.442695, %v5061_v44  ;;  %vm5314_vm11 = vcmp.eq.s32.totalorder %v6169_v19, %v7689_v30 }
0x27a0   :  { %v7693_v50 = vpop.xlane.xlu0 %3955  ;;  %v5324_v33 = vsel %vm5314_vm11, %v7615_v5, 0  ;;  %v4835_v59 = vpop.xlane.xlu1 %4834  ;;  %vm5243_vm11 = vcmp.eq.s32.totalorder %v6169_v19, 3 }
0x27a1   :  { %6037 = vpow2.f32 %v5062_v23  ;;  %v5325_v46 = vsel %vm3032_vm13, %v5324_v33, 0  ;;  %vm5246_vm7 = vmand %vm5242_vm12, %vm5243_vm11  ;;  %vm7794_vm11 = vcmask 1041408  }
0x27a2   :  { %v5327_v58 = vshrl.u32 %v5325_v46, 16  ;;  %v5326_v60 = vand.u32 65535, %v5325_v46  ;;  %vm5345_vm12 = vmand %vm5341_vm5, %vm5342_vm8 }
0x27a4   :  { %v7697_v4 = vpop.xlane.xlu0 %4264  ;;  %v5329_v18 = vcvt.s32.f32 %v5327_v58  ;;  %v5328_v2 = vcvt.s32.f32 %v5326_v60  ;;  %v7708_v38 = vpop.xlane.xlu1 %5078  ;;  %v7792_v58 = vld [vmem:[#allocation2_spill] sm:$0xff] }
0x27a5   :  { %v4267_v42 = vrot.slane %v7697_v4, 5  ;;  %v2817_v60 = vadd.f32 %v7792_v58, %v7562_v52 }
0x27a6   :  { %5332 = vadd.xlane.f32.xlu0 %v5329_v18  ;;  %5330 = vadd.xlane.f32.xlu1 %v5328_v2 }
0x27a8   :  { %v7699_v56 = vpop.xlane.xlu0 %4248  ;;  %v3978_v20 = vpop.permute.xlu1 %3977 }
0x27ac   :  { %v7701_v48 = vpop.xlane.xlu0 %4557  ;;  %v4271_v32 = vpop.permute.xlu1 %4270 }
0x27ad   :  { %v4560_v53 = vrot.slane %v7701_v48, 6 }
0x27ae   :  { %v6038_v62 = vpop.eup %6037 }
0x27af   :  { %v5064_v15 = vsel %vm3032_vm13, %v6038_v62, 0.0  ;;  %vm5111_vm13 = vcmp.eq.s32.totalorder %v6169_v19, 7 }
0x27b0   :  { %5065 = vadd.xlane.f32.xlu0 %v5064_v15  ;;  %v7704_v5 = vpop.xlane.xlu0 %4849  ;;  %vm5114_vm4 = vmand %vm5110_vm6, %vm5111_vm13  ;;  %vm5308_vm13 = vcmp.ge.s32.totalorder %v7250_v31, 1 }
0x27b1   :  { %v5115_v54 = vsel %vm5114_vm4, %v7256_v9, 0  ;;  %vm5213_vm6 = vmand %vm5209_vm14, %vm5210_vm3  ;;  %vm5339_vm4 = vcmp.eq.s32.totalorder %v7250_v31, 0  ;;  %v4858_v31 = vrot.slane %v7704_v5, 7  ;;  %vm5358_vm3 = vcmask 39936  }
0x27b2   :  { %v5148_v16 = vsel %vm5147_vm15, %v7317_v8, %v5115_v54  ;;  %vm5312_vm14 = vmand %vm5308_vm13, %vm5309_vm2  ;;  %vm7793_vm15 = vcmask 130048  }
0x27b3   :  { %v5181_v37 = vsel %vm5180_vm0, %v7379_v40, %v5148_v16  ;;  %vm5279_vm0 = vmand %vm5275_vm1, %vm5276_vm9  ;;  %v3974_v40 = vrot.slane %v7677_v51, 4  ;;  %vm4857_vm9 = vcmask 1040384   ;;  %vm5356_vm1 = vcmask 31744  }
0x27b4   :  { %v4542_v14 = vpop.xlane.xlu0 %4541  ;;  %v5214_v9 = vsel %vm5213_vm6, %v7470_v11, %v5181_v37  ;;  %v4860_v51 = vsel %vm4857_vm9, %v4858_v31, %v4859_v22 }
0x27b5   :  { %v5247_v63 = vsel %vm5246_vm7, %v7533_v28, %v5214_v9  ;;  %v3976_v19 = vadd.f32 %v3974_v40, %v7693_v50  ;;  %v4862_v0 = vadd.f32 %v4860_v51, %v4835_v59 }
0x27b6   :  { %v5280_v55 = vsel %vm5279_vm0, %v7625_v24, %v5247_v63  ;;  %v4562_v24 = vadd.f32 %v4560_v53, %v4542_v14 }
0x27b7   :  { %4863 = vrot.lane.b32.xlu1 %v7583_v17, %s6073_s4  ;;  %v5313_v47 = vsel %vm5312_vm14, %v7689_v30, %v5280_v55 }
0x27b8   :  { %v3685_v45 = vpop.permute.xlu0 %3684 }
0x27b9   :  { %v3687_v36 = vmul.f32 %v3685_v45, %v3683_v29 }
0x27bb   :  { %v3688_v13 = vadd.f32 %v3687_v36, %v3395_v7  ;;  %v3980_v7 = vmul.f32 %v3978_v20, %v3976_v19 }
0x27bd   :  { %v3981_v35 = vadd.f32 %v3980_v7, %v3688_v13 }
0x27c6   :  { %4563 = vrot.lane.b32.xlu0 %v7583_v17, %s6074_s11 }
0x282f   :  { %v5331_v25 = vpop.xlane.xlu1 %5330  ;;  %v5333_v10 = vpop.xlane.xlu0 %5332 }
0x2830   :  { %v5335_v17 = vcvt.f32.s32 %v5333_v10  ;;  %v5334_v61 = vcvt.f32.s32 %v5331_v25 }
0x2832   :  { %v5336_v26 = vshll.u32 %v5335_v17, 16 }
0x2833   :  { %v4864_v12 = vpop.permute.xlu1 %4863 }
0x2834   :  { %v5337_v8 = vadd.s32 %v5336_v26, %v5334_v61  ;;  %v4866_v39 = vmul.f32 %v4864_v12, %v4862_v0 }
0x2836   :  { %v5338_v11 = vsel %vm5308_vm13, %v5337_v8, %v7689_v30 }
0x2837   :  { %v5340_v57 = vsel %vm5339_vm4, %v7252_v1, %v5338_v11  ;;  %v4269_v1 = vadd.f32 %v4267_v42, %v7699_v56 }
0x2838   :  { %v5346_v28 = vsel %vm5345_vm12, %v5340_v57, %v5313_v47 }
0x2839   :  { %v5066_v27 = vpop.xlane.xlu0 %5065  ;;  %v5347_v49 = vcvt.s32.f32 %v5346_v28  ;;  %v4273_v43 = vmul.f32 %v4271_v32, %v4269_v1 }
0x283a   :  { %6039 = vlog2.f32 %v5066_v27 }
0x283b   :  { %5353 = vrot.lane.b32.xlu1 %v5347_v49, %s6075_s0  ;;  %v4274_v41 = vadd.f32 %v4273_v43, %v3981_v35 }
0x283d   :  { %v4564_v29 = vpop.permute.xlu0 %4563 }
0x283e   :  { %v4566_v21 = vmul.f32 %v4564_v29, %v4562_v24 }
0x2840   :  { %v4567_v3 = vadd.f32 %v4566_v21, %v4274_v41 }
0x2842   :  { %v4867_v44 = vadd.f32 %v4866_v39, %v4567_v3 }
0x2844   :  { %v5080_v33 = vadd.f32 %v7708_v38, %v4867_v44 }
0x2847   :  { %v6040_v30 = vpop.eup %6039 }
0x2848   :  { %v5068_v23 = vmul.f32 0.6931472, %v6040_v30 }
0x284a   :  { %v5069_v50 = vadd.f32 %v5068_v23, %v7680_v6 }
0x284c   :  { %v5081_v46 = vsub.f32 %v5080_v33, %v5069_v50 }
0x284e   :  { %5349 = vrot.lane.b32.xlu0 %v5081_v46, %s6076_s22 }
0x28ad   :  { %v5354_v2 = vpop.permute.xlu1 %5353 }
0x28c0   :  { %v5350_v4 = vpop.permute.xlu0 %5349 }
0x28c1   :  { %v5357_v18 = vsel %vm5356_vm1, %v2817_v60, %v5350_v4 }
0x28c2   :  { %v5359_v56 = vsel %vm5358_vm3, %v5357_v18, 0.0 }
0x28c3   :  { %v5360_v48 = vsel %vm519_vm10, %v5359_v56, %v5354_v2 }
0x28c4   :  { %v5361_v62 = vsel %vm7793_vm15, %v5360_v48, 0.0 }
0x28c5   :  { %v5362_v6 = vsel %vm7794_vm11, %v5361_v62, 0.0 }
0x28c6   :  { %5363 = vst [vmem:[%s7766_s8] sm:$0xff] %v5362_v6 }

</bundles_post_ra>
